<compile_context>
chip_gen: v5e
topology: v5e:2x2
jax: 0.10.0
libtpu: 0.0.40
codegen_flags: <defaults>
</compile_context>

<pallas_src>
import jax
import jax.numpy as jnp
from jax.experimental import pallas as pl
from jax.experimental.pallas import tpu as pltpu


def _round_up(x, m):
    return (x + m - 1) // m * m


def _make_lstm_kernel(TC, Hp, unroll):
    def lstm_kernel(gx_ref, whh_ref, wlin_ref, blin_ref, out_ref, h_sc, c_sc):
        tc = pl.program_id(1)

        # Fresh state at the start of each batch tile's time sweep.
        @pl.when(tc == 0)
        def _():
            h_sc[...] = jnp.zeros_like(h_sc)
            c_sc[...] = jnp.zeros_like(c_sc)

        def step(t, carry):
            # Serial critical path: bf16 recurrent matmul (f32 accumulate) + gate nonlinearities.
            h_b = h_sc[...].astype(whh_ref.dtype)
            gates = gx_ref[t].astype(jnp.float32) + jnp.dot(
                h_b, whh_ref[...], preferred_element_type=jnp.float32)
            i_g = jax.nn.sigmoid(gates[:, 0 * Hp:1 * Hp])
            f_g = jax.nn.sigmoid(gates[:, 1 * Hp:2 * Hp])
            g_g = jnp.tanh(gates[:, 2 * Hp:3 * Hp])
            o_g = jax.nn.sigmoid(gates[:, 3 * Hp:4 * Hp])
            c_new = f_g * c_sc[...] + i_g * g_g
            h_new = o_g * jnp.tanh(c_new)
            c_sc[...] = c_new
            h_sc[...] = h_new
            return carry

        jax.lax.fori_loop(0, TC, step, 0, unroll=unroll)

        # Final hidden state -> logits, only after the last time chunk.
        @pl.when(tc == pl.num_programs(1) - 1)
        def _():
            logits = jnp.dot(h_sc[...].astype(wlin_ref.dtype), wlin_ref[...],
                             preferred_element_type=jnp.float32) + blin_ref[...]
            out_ref[...] = logits.astype(out_ref.dtype)

    return lstm_kernel


def lstm_fixed_len_forward(x_ids, kparams, lengths=None, time_chunk=16):
    """Forward pass equivalent to LSTM_fixed_len.forward(x, l). `kparams` = padded params.

    time_chunk: recurrence steps per grid iteration (16 is VMEM-safe on v7x; 32-64 is fine
    on v5e/v6e with their 128 MiB VMEM).
    """
    emb_table = kparams["embedding"]      # [V, E]  f32
    wih_p = kparams["w_ih_t"]             # [E, 4Hp]  f32, gate-block padded
    whh_p = kparams["w_hh_t"]             # [Hp, 4Hp] bf16
    bias_p = kparams["bias"]              # [1, 4Hp]  f32
    wlin_p = kparams["w_lin_t"]           # [Hp, Cp]  bf16
    blin_p = kparams["b_lin"]             # [1, Cp]   f32
    C = kparams["num_classes"]

    B, T = x_ids.shape
    Hp = whh_p.shape[0]
    Cp = wlin_p.shape[1]

    # Batch tiling: pad to sublane height; one grid row per batch tile ("parallel").
    TB = min(128, _round_up(B, 8))
    if B > 8 and _round_up(B, TB) // TB == 1:
        # Ensure >= 2 parallel tiles so v7x's second TensorCore gets work.
        TB = _round_up((B + 1) // 2, 8)
    Bp = _round_up(B, TB)
    num_b_tiles = Bp // TB

    # Time chunking: front-pad with zeros (exact no-op on the h=c=0 prefix).
    TC = T if T <= time_chunk else time_chunk
    Tp = _round_up(T, TC)
    num_t_chunks = Tp // TC

    # --- Plain-JAX glue: embedding gather + hoisted input projection (one big matmul). ---
    # TODO(synk): dropout is applied as identity (inference mode); training mask not implemented.
    x_emb = jnp.take(emb_table, x_ids, axis=0)                      # [B, T, E]
    gates_in = jnp.einsum("bte,eg->tbg", x_emb, wih_p,
                          preferred_element_type=jnp.float32) + bias_p   # [T, B, 4Hp] f32
    gates_in = gates_in.astype(jnp.bfloat16)                        # halve the HBM stream
    gates_in = jnp.pad(gates_in, ((Tp - T, 0), (0, Bp - B), (0, 0)))

    unroll = True if TC <= 8 else 4
    kernel = _make_lstm_kernel(TC, Hp, unroll)

    # Explicit VMEM budget: gx double buffer + weights + scratch + output, with headroom.
    vmem_bytes = (
        2 * TC * TB * 4 * Hp * 2        # gx chunk, double-buffered, bf16
        + 2 * Hp * 4 * Hp * 2           # W_hh  (bf16, default double-buffered)
        + 2 * Hp * Cp * 2               # W_lin (bf16)
        + 2 * Cp * 4                    # b_lin (f32)
        + 2 * TB * Hp * 4               # h, c scratch (f32)
        + 2 * TB * Cp * 4               # output block, double-buffered (f32)
    )
    vmem_limit = min(max(int(1.5 * vmem_bytes) + (4 << 20), 16 << 20), 64 << 20)

    out_p = pl.pallas_call(
        kernel,
        out_shape=jax.ShapeDtypeStruct((Bp, Cp), jnp.float32),
        grid_spec=pltpu.PrefetchScalarGridSpec(
            num_scalar_prefetch=0,
            grid=(num_b_tiles, num_t_chunks),
            in_specs=[
                pl.BlockSpec((TC, TB, 4 * Hp), lambda b, tc: (tc, b, 0)),  # gx time chunk
                pl.BlockSpec((Hp, 4 * Hp), lambda b, tc: (0, 0)),          # W_hh^T (bf16)
                pl.BlockSpec((Hp, Cp), lambda b, tc: (0, 0)),              # W_lin^T (bf16)
                pl.BlockSpec((1, Cp), lambda b, tc: (0, 0)),               # b_lin
            ],
            out_specs=pl.BlockSpec((TB, Cp), lambda b, tc: (b, 0)),        # resident across tc
            scratch_shapes=[
                pltpu.VMEM((TB, Hp), jnp.float32),   # h
                pltpu.VMEM((TB, Hp), jnp.float32),   # c
            ],
        ),
        compiler_params=pltpu.CompilerParams(
            # batch tiles independent (v7x: 2 TCs); time chunks are the serial reduction axis.
            dimension_semantics=("parallel", "arbitrary"),
            vmem_limit_bytes=vmem_limit,
        ),
    )(gates_in, whh_p, wlin_p, blin_p)

    return out_p[:B, :C]


# ----------------------------- parameter construction ----------------------------- #

def init_params(key, vocab_size, embedding_dim, hidden_dim, num_classes):
    """Unpadded parameters, PyTorch layout/semantics (padding_idx=0, gate order i,f,g,o)."""
    k = jax.random.split(key, 7)
    E, H, C, V = embedding_dim, hidden_dim, num_classes, vocab_size
    emb = jax.random.normal(k[0], (V, E), jnp.float32) * 0.1
    emb = emb.at[0].set(0.0)                               # padding_idx=0
    s = 1.0 / jnp.sqrt(H)
    w_ih = jax.random.uniform(k[1], (4 * H, E), jnp.float32, -s, s)
    w_hh = jax.random.uniform(k[2], (4 * H, H), jnp.float32, -s, s)
    b_ih = jax.random.uniform(k[3], (4 * H,), jnp.float32, -s, s)
    b_hh = jax.random.uniform(k[4], (4 * H,), jnp.float32, -s, s)
    w_lin = jax.random.uniform(k[5], (C, H), jnp.float32, -s, s)
    b_lin = jax.random.uniform(k[6], (C,), jnp.float32, -s, s)
    return {
        "embedding": emb,
        "w_ih_t": w_ih.T,                                  # [E, 4H]
        "w_hh_t": w_hh.T,                                  # [H, 4H]
        "bias": (b_ih + b_hh).reshape(1, 4 * H),
        "w_lin_t": w_lin.T,                                # [H, C]
        "b_lin": b_lin.reshape(1, C),
        "hidden_dim": H,
        "num_classes": C,
    }


def _pad_gate_blocks(w, H, Hp):
    """[rows, 4H] (gate order i,f,g,o) -> [rows, 4Hp] with each gate block zero-padded."""
    blocks = [w[:, k * H:(k + 1) * H] for k in range(4)]
    blocks = [jnp.pad(b, ((0, 0), (0, Hp - H))) for b in blocks]
    return jnp.concatenate(blocks, axis=1)


def pad_params_for_kernel(params):
    """Pad H and C to multiples of 128 (lane-aligned gate slices / lane-dense output).

    W_hh and W_lin are stored bf16 for the MXU path; biases and W_ih stay f32 (the input
    projection runs in the XLA wrapper and only its bf16 *result* is streamed to the kernel).
    """
    H = params["hidden_dim"]
    C = params["num_classes"]
    Hp = _round_up(H, 128)
    Cp = _round_up(C, 128)
    wih = _pad_gate_blocks(params["w_ih_t"], H, Hp)                     # [E, 4Hp]  f32
    whh = _pad_gate_blocks(params["w_hh_t"], H, Hp)                     # [H, 4Hp]
    whh = jnp.pad(whh, ((0, Hp - H), (0, 0))).astype(jnp.bfloat16)      # [Hp, 4Hp] bf16
    bias = _pad_gate_blocks(params["bias"], H, Hp)                      # [1, 4Hp]  f32
    wlin = jnp.pad(params["w_lin_t"], ((0, Hp - H), (0, Cp - C)))
    wlin = wlin.astype(jnp.bfloat16)                                    # [Hp, Cp]  bf16
    blin = jnp.pad(params["b_lin"], ((0, 0), (0, Cp - C)))              # [1, Cp]   f32
    return {
        "embedding": params["embedding"],
        "w_ih_t": wih, "w_hh_t": whh, "bias": bias,
        "w_lin_t": wlin, "b_lin": blin,
        "hidden_dim": H, "num_classes": C,
    }


# ----------------------------------- reference ----------------------------------- #

def reference_forward(x_ids, params):
    """Pure-JAX f32 reference (matches PyTorch LSTM semantics, eval-mode dropout), unpadded."""
    emb = jnp.take(params["embedding"], x_ids, axis=0)     # [B, T, E]
    B, T, E = emb.shape
    H = params["hidden_dim"]
    h = jnp.zeros((B, H), jnp.float32)
    c = jnp.zeros((B, H), jnp.float32)

    def step(carry, x_t):
        h, c = carry
        g = x_t @ params["w_ih_t"] + h @ params["w_hh_t"] + params["bias"]
        i = jax.nn.sigmoid(g[:, 0 * H:1 * H])
        f = jax.nn.sigmoid(g[:, 1 * H:2 * H])
        gg = jnp.tanh(g[:, 2 * H:3 * H])
        o = jax.nn.sigmoid(g[:, 3 * H:4 * H])
        c = f * c + i * gg
        h = o * jnp.tanh(c)
        return (h, c), None

    (h, c), _ = jax.lax.scan(step, (h, c), jnp.transpose(emb, (1, 0, 2)))
    return h @ params["w_lin_t"] + params["b_lin"]


if __name__ == "__main__":
    VOCAB, EMB, HID, NCLS = 50, 32, 32, 8
    B, T = 2, 8

    key = jax.random.PRNGKey(0)
    kp, kx = jax.random.split(key)
    params = init_params(kp, VOCAB, EMB, HID, NCLS)
    kparams = pad_params_for_kernel(params)
    x_ids = jax.random.randint(kx, (B, T), 0, VOCAB, dtype=jnp.int32)
    lengths = jnp.full((B,), T, dtype=jnp.int32)   # `l` is unused by the module's forward

    out = lstm_fixed_len_forward(x_ids, kparams, lengths)
    out = jax.block_until_ready(out)

    ref = reference_forward(x_ids, params)
    assert out.shape == (B, NCLS)
    # bf16 MXU path (W_hh / W_lin / gates_in stream) -> looser tolerance than pure f32.
    assert jnp.allclose(out, ref, atol=2e-2, rtol=2e-2), (out, ref)
    print("KERNEL_OK")
</pallas_src>

<mosaic_0001>
module attributes {stable_mosaic.version = 11 : i64} {
  func.func @lstm_kernel(%arg0: i32, %arg1: i32, %arg2: memref<8x8x512xbf16, #tpu.memory_space<vmem>>, %arg3: memref<128x512xbf16, #tpu.memory_space<vmem>>, %arg4: memref<128x128xbf16, #tpu.memory_space<vmem>>, %arg5: memref<1x128xf32, #tpu.memory_space<vmem>>, %arg6: memref<8x128xf32, #tpu.memory_space<vmem>>, %arg7: memref<8x128xf32, #tpu.memory_space<vmem>>, %arg8: memref<8x128xf32, #tpu.memory_space<vmem>>) attributes {dimension_semantics = [#tpu.dimension_semantics<parallel>, #tpu.dimension_semantics<arbitrary>], iteration_bounds = array<i64: 1, 1>, scalar_prefetch = 0 : i64, scratch_operands = 2 : i64, tpu.core_type = #tpu.core_type<tc>, window_params = [{transform_indices = @transform_0, window_bounds = array<i64: 8, 8, 512>}, {pipeline_mode = #tpu.pipeline_mode<synchronous>, transform_indices = @transform_1, window_bounds = array<i64: 128, 512>}, {pipeline_mode = #tpu.pipeline_mode<synchronous>, transform_indices = @transform_2, window_bounds = array<i64: 128, 128>}, {pipeline_mode = #tpu.pipeline_mode<synchronous>, transform_indices = @transform_3, window_bounds = array<i64: 1, 128>}, {transform_indices = @transform_4, window_bounds = array<i64: 8, 128>}]} {
    %c0_i32 = arith.constant 0 : i32
    %0 = arith.cmpi eq, %arg1, %c0_i32 : i32
    %1 = arith.extui %0 : i1 to i32
    %c0_i32_0 = arith.constant 0 : i32
    %2 = arith.cmpi ne, %1, %c0_i32_0 : i32
    scf.if %2 {
      %cst_130 = arith.constant 0.000000e+00 : f32
      %302 = vector.broadcast %cst_130 : f32 to vector<8x128xf32>
      %c0_131 = arith.constant 0 : index
      %c0_132 = arith.constant 0 : index
      %303 = vector.load %arg7[%c0_131, %c0_132] : memref<8x128xf32, #tpu.memory_space<vmem>>, vector<8x128xf32>
      tpu.vector_store %arg7[%c0_131, %c0_132], %302 {strides = array<i32>} : memref<8x128xf32, #tpu.memory_space<vmem>>, vector<8x128xf32>,
      %cst_133 = arith.constant 0.000000e+00 : f32
      %304 = vector.broadcast %cst_133 : f32 to vector<8x128xf32>
      %c0_134 = arith.constant 0 : index
      %c0_135 = arith.constant 0 : index
      %305 = vector.load %arg8[%c0_134, %c0_135] : memref<8x128xf32, #tpu.memory_space<vmem>>, vector<8x128xf32>
      tpu.vector_store %arg8[%c0_134, %c0_135], %304 {strides = array<i32>} : memref<8x128xf32, #tpu.memory_space<vmem>>, vector<8x128xf32>,
    } else {
    }
    %c0_i32_1 = arith.constant 0 : i32
    %c0 = arith.constant 0 : index
    %c0_2 = arith.constant 0 : index
    %3 = vector.load %arg7[%c0, %c0_2] : memref<8x128xf32, #tpu.memory_space<vmem>>, vector<8x128xf32>
    %4 = arith.truncf %3 : vector<8x128xf32> to vector<8x128xbf16>
    %5 = arith.index_cast %c0_i32_1 : i32 to index
    %c0_3 = arith.constant 0 : index
    %c0_4 = arith.constant 0 : index
    %6 = vector.load %arg2[%5, %c0_3, %c0_4] : memref<8x8x512xbf16, #tpu.memory_space<vmem>>, vector<1x8x512xbf16>
    %7 = vector.shape_cast %6 : vector<1x8x512xbf16> to vector<8x512xbf16>
    %8 = arith.extf %7 : vector<8x512xbf16> to vector<8x512xf32>
    %c0_5 = arith.constant 0 : index
    %c0_6 = arith.constant 0 : index
    %9 = vector.load %arg3[%c0_5, %c0_6] : memref<128x512xbf16, #tpu.memory_space<vmem>>, vector<128x512xbf16>
    %cst = arith.constant dense<0.000000e+00> : vector<8x512xf32>
    %10 = tpu.matmul %4, %9, %cst {dimension_numbers = #tpu.dot_dimension_numbers<[1], [0], [0], [1], [0, 0, 1, 1], [], []>} : vector<8x128xbf16>, vector<128x512xbf16>, vector<8x512xf32> -> vector<8x512xf32>
    %11 = arith.addf %8, %10 : vector<8x512xf32>
    %12 = vector.extract_strided_slice %11 {offsets = [0, 0], sizes = [8, 128], strides = [1, 1]} : vector<8x512xf32> to vector<8x128xf32>
    %13 = arith.negf %12 : vector<8x128xf32>
    %14 = math.exp %13 : vector<8x128xf32>
    %cst_7 = arith.constant 1.000000e+00 : f32
    %15 = vector.broadcast %cst_7 : f32 to vector<8x128xf32>
    %16 = arith.addf %15, %14 : vector<8x128xf32>
    %17 = arith.divf %15, %16 : vector<8x128xf32>
    %18 = vector.extract_strided_slice %11 {offsets = [0, 128], sizes = [8, 128], strides = [1, 1]} : vector<8x512xf32> to vector<8x128xf32>
    %19 = arith.negf %18 : vector<8x128xf32>
    %20 = math.exp %19 : vector<8x128xf32>
    %cst_8 = arith.constant 1.000000e+00 : f32
    %21 = vector.broadcast %cst_8 : f32 to vector<8x128xf32>
    %22 = arith.addf %21, %20 : vector<8x128xf32>
    %23 = arith.divf %21, %22 : vector<8x128xf32>
    %24 = vector.extract_strided_slice %11 {offsets = [0, 256], sizes = [8, 128], strides = [1, 1]} : vector<8x512xf32> to vector<8x128xf32>
    %25 = math.tanh %24 : vector<8x128xf32>
    %26 = vector.extract_strided_slice %11 {offsets = [0, 384], sizes = [8, 128], strides = [1, 1]} : vector<8x512xf32> to vector<8x128xf32>
    %27 = arith.negf %26 : vector<8x128xf32>
    %28 = math.exp %27 : vector<8x128xf32>
    %cst_9 = arith.constant 1.000000e+00 : f32
    %29 = vector.broadcast %cst_9 : f32 to vector<8x128xf32>
    %30 = arith.addf %29, %28 : vector<8x128xf32>
    %31 = arith.divf %29, %30 : vector<8x128xf32>
    %c0_10 = arith.constant 0 : index
    %c0_11 = arith.constant 0 : index
    %32 = vector.load %arg8[%c0_10, %c0_11] : memref<8x128xf32, #tpu.memory_space<vmem>>, vector<8x128xf32>
    %33 = arith.mulf %23, %32 : vector<8x128xf32>
    %34 = arith.mulf %17, %25 : vector<8x128xf32>
    %35 = arith.addf %33, %34 : vector<8x128xf32>
    %36 = math.tanh %35 : vector<8x128xf32>
    %37 = arith.mulf %31, %36 : vector<8x128xf32>
    %c0_12 = arith.constant 0 : index
    %c0_13 = arith.constant 0 : index
    %38 = vector.load %arg8[%c0_12, %c0_13] : memref<8x128xf32, #tpu.memory_space<vmem>>, vector<8x128xf32>
    tpu.vector_store %arg8[%c0_12, %c0_13], %35 {strides = array<i32>} : memref<8x128xf32, #tpu.memory_space<vmem>>, vector<8x128xf32>,
    %c0_14 = arith.constant 0 : index
    %c0_15 = arith.constant 0 : index
    %39 = vector.load %arg7[%c0_14, %c0_15] : memref<8x128xf32, #tpu.memory_space<vmem>>, vector<8x128xf32>
    tpu.vector_store %arg7[%c0_14, %c0_15], %37 {strides = array<i32>} : memref<8x128xf32, #tpu.memory_space<vmem>>, vector<8x128xf32>,
    %c1_i32 = arith.constant 1 : i32
    %c0_16 = arith.constant 0 : index
    %c0_17 = arith.constant 0 : index
    %40 = vector.load %arg7[%c0_16, %c0_17] : memref<8x128xf32, #tpu.memory_space<vmem>>, vector<8x128xf32>
    %41 = arith.truncf %40 : vector<8x128xf32> to vector<8x128xbf16>
    %42 = arith.index_cast %c1_i32 : i32 to index
    %c0_18 = arith.constant 0 : index
    %c0_19 = arith.constant 0 : index
    %43 = vector.load %arg2[%42, %c0_18, %c0_19] : memref<8x8x512xbf16, #tpu.memory_space<vmem>>, vector<1x8x512xbf16>
    %44 = vector.shape_cast %43 : vector<1x8x512xbf16> to vector<8x512xbf16>
    %45 = arith.extf %44 : vector<8x512xbf16> to vector<8x512xf32>
    %c0_20 = arith.constant 0 : index
    %c0_21 = arith.constant 0 : index
    %46 = vector.load %arg3[%c0_20, %c0_21] : memref<128x512xbf16, #tpu.memory_space<vmem>>, vector<128x512xbf16>
    %cst_22 = arith.constant dense<0.000000e+00> : vector<8x512xf32>
    %47 = tpu.matmul %41, %46, %cst_22 {dimension_numbers = #tpu.dot_dimension_numbers<[1], [0], [0], [1], [0, 0, 1, 1], [], []>} : vector<8x128xbf16>, vector<128x512xbf16>, vector<8x512xf32> -> vector<8x512xf32>
    %48 = arith.addf %45, %47 : vector<8x512xf32>
    %49 = vector.extract_strided_slice %48 {offsets = [0, 0], sizes = [8, 128], strides = [1, 1]} : vector<8x512xf32> to vector<8x128xf32>
    %50 = arith.negf %49 : vector<8x128xf32>
    %51 = math.exp %50 : vector<8x128xf32>
    %cst_23 = arith.constant 1.000000e+00 : f32
    %52 = vector.broadcast %cst_23 : f32 to vector<8x128xf32>
    %53 = arith.addf %52, %51 : vector<8x128xf32>
    %54 = arith.divf %52, %53 : vector<8x128xf32>
    %55 = vector.extract_strided_slice %48 {offsets = [0, 128], sizes = [8, 128], strides = [1, 1]} : vector<8x512xf32> to vector<8x128xf32>
    %56 = arith.negf %55 : vector<8x128xf32>
    %57 = math.exp %56 : vector<8x128xf32>
    %cst_24 = arith.constant 1.000000e+00 : f32
    %58 = vector.broadcast %cst_24 : f32 to vector<8x128xf32>
    %59 = arith.addf %58, %57 : vector<8x128xf32>
    %60 = arith.divf %58, %59 : vector<8x128xf32>
    %61 = vector.extract_strided_slice %48 {offsets = [0, 256], sizes = [8, 128], strides = [1, 1]} : vector<8x512xf32> to vector<8x128xf32>
    %62 = math.tanh %61 : vector<8x128xf32>
    %63 = vector.extract_strided_slice %48 {offsets = [0, 384], sizes = [8, 128], strides = [1, 1]} : vector<8x512xf32> to vector<8x128xf32>
    %64 = arith.negf %63 : vector<8x128xf32>
    %65 = math.exp %64 : vector<8x128xf32>
    %cst_25 = arith.constant 1.000000e+00 : f32
    %66 = vector.broadcast %cst_25 : f32 to vector<8x128xf32>
    %67 = arith.addf %66, %65 : vector<8x128xf32>
    %68 = arith.divf %66, %67 : vector<8x128xf32>
    %c0_26 = arith.constant 0 : index
    %c0_27 = arith.constant 0 : index
    %69 = vector.load %arg8[%c0_26, %c0_27] : memref<8x128xf32, #tpu.memory_space<vmem>>, vector<8x128xf32>
    %70 = arith.mulf %60, %69 : vector<8x128xf32>
    %71 = arith.mulf %54, %62 : vector<8x128xf32>
    %72 = arith.addf %70, %71 : vector<8x128xf32>
    %73 = math.tanh %72 : vector<8x128xf32>
    %74 = arith.mulf %68, %73 : vector<8x128xf32>
    %c0_28 = arith.constant 0 : index
    %c0_29 = arith.constant 0 : index
    %75 = vector.load %arg8[%c0_28, %c0_29] : memref<8x128xf32, #tpu.memory_space<vmem>>, vector<8x128xf32>
    tpu.vector_store %arg8[%c0_28, %c0_29], %72 {strides = array<i32>} : memref<8x128xf32, #tpu.memory_space<vmem>>, vector<8x128xf32>,
    %c0_30 = arith.constant 0 : index
    %c0_31 = arith.constant 0 : index
    %76 = vector.load %arg7[%c0_30, %c0_31] : memref<8x128xf32, #tpu.memory_space<vmem>>, vector<8x128xf32>
    tpu.vector_store %arg7[%c0_30, %c0_31], %74 {strides = array<i32>} : memref<8x128xf32, #tpu.memory_space<vmem>>, vector<8x128xf32>,
    %c2_i32 = arith.constant 2 : i32
    %c0_32 = arith.constant 0 : index
    %c0_33 = arith.constant 0 : index
    %77 = vector.load %arg7[%c0_32, %c0_33] : memref<8x128xf32, #tpu.memory_space<vmem>>, vector<8x128xf32>
    %78 = arith.truncf %77 : vector<8x128xf32> to vector<8x128xbf16>
    %79 = arith.index_cast %c2_i32 : i32 to index
    %c0_34 = arith.constant 0 : index
    %c0_35 = arith.constant 0 : index
    %80 = vector.load %arg2[%79, %c0_34, %c0_35] : memref<8x8x512xbf16, #tpu.memory_space<vmem>>, vector<1x8x512xbf16>
    %81 = vector.shape_cast %80 : vector<1x8x512xbf16> to vector<8x512xbf16>
    %82 = arith.extf %81 : vector<8x512xbf16> to vector<8x512xf32>
    %c0_36 = arith.constant 0 : index
    %c0_37 = arith.constant 0 : index
    %83 = vector.load %arg3[%c0_36, %c0_37] : memref<128x512xbf16, #tpu.memory_space<vmem>>, vector<128x512xbf16>
    %cst_38 = arith.constant dense<0.000000e+00> : vector<8x512xf32>
    %84 = tpu.matmul %78, %83, %cst_38 {dimension_numbers = #tpu.dot_dimension_numbers<[1], [0], [0], [1], [0, 0, 1, 1], [], []>} : vector<8x128xbf16>, vector<128x512xbf16>, vector<8x512xf32> -> vector<8x512xf32>
    %85 = arith.addf %82, %84 : vector<8x512xf32>
    %86 = vector.extract_strided_slice %85 {offsets = [0, 0], sizes = [8, 128], strides = [1, 1]} : vector<8x512xf32> to vector<8x128xf32>
    %87 = arith.negf %86 : vector<8x128xf32>
    %88 = math.exp %87 : vector<8x128xf32>
    %cst_39 = arith.constant 1.000000e+00 : f32
    %89 = vector.broadcast %cst_39 : f32 to vector<8x128xf32>
    %90 = arith.addf %89, %88 : vector<8x128xf32>
    %91 = arith.divf %89, %90 : vector<8x128xf32>
    %92 = vector.extract_strided_slice %85 {offsets = [0, 128], sizes = [8, 128], strides = [1, 1]} : vector<8x512xf32> to vector<8x128xf32>
    %93 = arith.negf %92 : vector<8x128xf32>
    %94 = math.exp %93 : vector<8x128xf32>
    %cst_40 = arith.constant 1.000000e+00 : f32
    %95 = vector.broadcast %cst_40 : f32 to vector<8x128xf32>
    %96 = arith.addf %95, %94 : vector<8x128xf32>
    %97 = arith.divf %95, %96 : vector<8x128xf32>
    %98 = vector.extract_strided_slice %85 {offsets = [0, 256], sizes = [8, 128], strides = [1, 1]} : vector<8x512xf32> to vector<8x128xf32>
    %99 = math.tanh %98 : vector<8x128xf32>
    %100 = vector.extract_strided_slice %85 {offsets = [0, 384], sizes = [8, 128], strides = [1, 1]} : vector<8x512xf32> to vector<8x128xf32>
    %101 = arith.negf %100 : vector<8x128xf32>
    %102 = math.exp %101 : vector<8x128xf32>
    %cst_41 = arith.constant 1.000000e+00 : f32
    %103 = vector.broadcast %cst_41 : f32 to vector<8x128xf32>
    %104 = arith.addf %103, %102 : vector<8x128xf32>
    %105 = arith.divf %103, %104 : vector<8x128xf32>
    %c0_42 = arith.constant 0 : index
    %c0_43 = arith.constant 0 : index
    %106 = vector.load %arg8[%c0_42, %c0_43] : memref<8x128xf32, #tpu.memory_space<vmem>>, vector<8x128xf32>
    %107 = arith.mulf %97, %106 : vector<8x128xf32>
    %108 = arith.mulf %91, %99 : vector<8x128xf32>
    %109 = arith.addf %107, %108 : vector<8x128xf32>
    %110 = math.tanh %109 : vector<8x128xf32>
    %111 = arith.mulf %105, %110 : vector<8x128xf32>
    %c0_44 = arith.constant 0 : index
    %c0_45 = arith.constant 0 : index
    %112 = vector.load %arg8[%c0_44, %c0_45] : memref<8x128xf32, #tpu.memory_space<vmem>>, vector<8x128xf32>
    tpu.vector_store %arg8[%c0_44, %c0_45], %109 {strides = array<i32>} : memref<8x128xf32, #tpu.memory_space<vmem>>, vector<8x128xf32>,
    %c0_46 = arith.constant 0 : index
    %c0_47 = arith.constant 0 : index
    %113 = vector.load %arg7[%c0_46, %c0_47] : memref<8x128xf32, #tpu.memory_space<vmem>>, vector<8x128xf32>
    tpu.vector_store %arg7[%c0_46, %c0_47], %111 {strides = array<i32>} : memref<8x128xf32, #tpu.memory_space<vmem>>, vector<8x128xf32>,
    %c3_i32 = arith.constant 3 : i32
    %c0_48 = arith.constant 0 : index
    %c0_49 = arith.constant 0 : index
    %114 = vector.load %arg7[%c0_48, %c0_49] : memref<8x128xf32, #tpu.memory_space<vmem>>, vector<8x128xf32>
    %115 = arith.truncf %114 : vector<8x128xf32> to vector<8x128xbf16>
    %116 = arith.index_cast %c3_i32 : i32 to index
    %c0_50 = arith.constant 0 : index
    %c0_51 = arith.constant 0 : index
    %117 = vector.load %arg2[%116, %c0_50, %c0_51] : memref<8x8x512xbf16, #tpu.memory_space<vmem>>, vector<1x8x512xbf16>
    %118 = vector.shape_cast %117 : vector<1x8x512xbf16> to vector<8x512xbf16>
    %119 = arith.extf %118 : vector<8x512xbf16> to vector<8x512xf32>
    %c0_52 = arith.constant 0 : index
    %c0_53 = arith.constant 0 : index
    %120 = vector.load %arg3[%c0_52, %c0_53] : memref<128x512xbf16, #tpu.memory_space<vmem>>, vector<128x512xbf16>
    %cst_54 = arith.constant dense<0.000000e+00> : vector<8x512xf32>
    %121 = tpu.matmul %115, %120, %cst_54 {dimension_numbers = #tpu.dot_dimension_numbers<[1], [0], [0], [1], [0, 0, 1, 1], [], []>} : vector<8x128xbf16>, vector<128x512xbf16>, vector<8x512xf32> -> vector<8x512xf32>
    %122 = arith.addf %119, %121 : vector<8x512xf32>
    %123 = vector.extract_strided_slice %122 {offsets = [0, 0], sizes = [8, 128], strides = [1, 1]} : vector<8x512xf32> to vector<8x128xf32>
    %124 = arith.negf %123 : vector<8x128xf32>
    %125 = math.exp %124 : vector<8x128xf32>
    %cst_55 = arith.constant 1.000000e+00 : f32
    %126 = vector.broadcast %cst_55 : f32 to vector<8x128xf32>
    %127 = arith.addf %126, %125 : vector<8x128xf32>
    %128 = arith.divf %126, %127 : vector<8x128xf32>
    %129 = vector.extract_strided_slice %122 {offsets = [0, 128], sizes = [8, 128], strides = [1, 1]} : vector<8x512xf32> to vector<8x128xf32>
    %130 = arith.negf %129 : vector<8x128xf32>
    %131 = math.exp %130 : vector<8x128xf32>
    %cst_56 = arith.constant 1.000000e+00 : f32
    %132 = vector.broadcast %cst_56 : f32 to vector<8x128xf32>
    %133 = arith.addf %132, %131 : vector<8x128xf32>
    %134 = arith.divf %132, %133 : vector<8x128xf32>
    %135 = vector.extract_strided_slice %122 {offsets = [0, 256], sizes = [8, 128], strides = [1, 1]} : vector<8x512xf32> to vector<8x128xf32>
    %136 = math.tanh %135 : vector<8x128xf32>
    %137 = vector.extract_strided_slice %122 {offsets = [0, 384], sizes = [8, 128], strides = [1, 1]} : vector<8x512xf32> to vector<8x128xf32>
    %138 = arith.negf %137 : vector<8x128xf32>
    %139 = math.exp %138 : vector<8x128xf32>
    %cst_57 = arith.constant 1.000000e+00 : f32
    %140 = vector.broadcast %cst_57 : f32 to vector<8x128xf32>
    %141 = arith.addf %140, %139 : vector<8x128xf32>
    %142 = arith.divf %140, %141 : vector<8x128xf32>
    %c0_58 = arith.constant 0 : index
    %c0_59 = arith.constant 0 : index
    %143 = vector.load %arg8[%c0_58, %c0_59] : memref<8x128xf32, #tpu.memory_space<vmem>>, vector<8x128xf32>
    %144 = arith.mulf %134, %143 : vector<8x128xf32>
    %145 = arith.mulf %128, %136 : vector<8x128xf32>
    %146 = arith.addf %144, %145 : vector<8x128xf32>
    %147 = math.tanh %146 : vector<8x128xf32>
    %148 = arith.mulf %142, %147 : vector<8x128xf32>
    %c0_60 = arith.constant 0 : index
    %c0_61 = arith.constant 0 : index
    %149 = vector.load %arg8[%c0_60, %c0_61] : memref<8x128xf32, #tpu.memory_space<vmem>>, vector<8x128xf32>
    tpu.vector_store %arg8[%c0_60, %c0_61], %146 {strides = array<i32>} : memref<8x128xf32, #tpu.memory_space<vmem>>, vector<8x128xf32>,
    %c0_62 = arith.constant 0 : index
    %c0_63 = arith.constant 0 : index
    %150 = vector.load %arg7[%c0_62, %c0_63] : memref<8x128xf32, #tpu.memory_space<vmem>>, vector<8x128xf32>
    tpu.vector_store %arg7[%c0_62, %c0_63], %148 {strides = array<i32>} : memref<8x128xf32, #tpu.memory_space<vmem>>, vector<8x128xf32>,
    %c4_i32 = arith.constant 4 : i32
    %c0_64 = arith.constant 0 : index
    %c0_65 = arith.constant 0 : index
    %151 = vector.load %arg7[%c0_64, %c0_65] : memref<8x128xf32, #tpu.memory_space<vmem>>, vector<8x128xf32>
    %152 = arith.truncf %151 : vector<8x128xf32> to vector<8x128xbf16>
    %153 = arith.index_cast %c4_i32 : i32 to index
    %c0_66 = arith.constant 0 : index
    %c0_67 = arith.constant 0 : index
    %154 = vector.load %arg2[%153, %c0_66, %c0_67] : memref<8x8x512xbf16, #tpu.memory_space<vmem>>, vector<1x8x512xbf16>
    %155 = vector.shape_cast %154 : vector<1x8x512xbf16> to vector<8x512xbf16>
    %156 = arith.extf %155 : vector<8x512xbf16> to vector<8x512xf32>
    %c0_68 = arith.constant 0 : index
    %c0_69 = arith.constant 0 : index
    %157 = vector.load %arg3[%c0_68, %c0_69] : memref<128x512xbf16, #tpu.memory_space<vmem>>, vector<128x512xbf16>
    %cst_70 = arith.constant dense<0.000000e+00> : vector<8x512xf32>
    %158 = tpu.matmul %152, %157, %cst_70 {dimension_numbers = #tpu.dot_dimension_numbers<[1], [0], [0], [1], [0, 0, 1, 1], [], []>} : vector<8x128xbf16>, vector<128x512xbf16>, vector<8x512xf32> -> vector<8x512xf32>
    %159 = arith.addf %156, %158 : vector<8x512xf32>
    %160 = vector.extract_strided_slice %159 {offsets = [0, 0], sizes = [8, 128], strides = [1, 1]} : vector<8x512xf32> to vector<8x128xf32>
    %161 = arith.negf %160 : vector<8x128xf32>
    %162 = math.exp %161 : vector<8x128xf32>
    %cst_71 = arith.constant 1.000000e+00 : f32
    %163 = vector.broadcast %cst_71 : f32 to vector<8x128xf32>
    %164 = arith.addf %163, %162 : vector<8x128xf32>
    %165 = arith.divf %163, %164 : vector<8x128xf32>
    %166 = vector.extract_strided_slice %159 {offsets = [0, 128], sizes = [8, 128], strides = [1, 1]} : vector<8x512xf32> to vector<8x128xf32>
    %167 = arith.negf %166 : vector<8x128xf32>
    %168 = math.exp %167 : vector<8x128xf32>
    %cst_72 = arith.constant 1.000000e+00 : f32
    %169 = vector.broadcast %cst_72 : f32 to vector<8x128xf32>
    %170 = arith.addf %169, %168 : vector<8x128xf32>
    %171 = arith.divf %169, %170 : vector<8x128xf32>
    %172 = vector.extract_strided_slice %159 {offsets = [0, 256], sizes = [8, 128], strides = [1, 1]} : vector<8x512xf32> to vector<8x128xf32>
    %173 = math.tanh %172 : vector<8x128xf32>
    %174 = vector.extract_strided_slice %159 {offsets = [0, 384], sizes = [8, 128], strides = [1, 1]} : vector<8x512xf32> to vector<8x128xf32>
    %175 = arith.negf %174 : vector<8x128xf32>
    %176 = math.exp %175 : vector<8x128xf32>
    %cst_73 = arith.constant 1.000000e+00 : f32
    %177 = vector.broadcast %cst_73 : f32 to vector<8x128xf32>
    %178 = arith.addf %177, %176 : vector<8x128xf32>
    %179 = arith.divf %177, %178 : vector<8x128xf32>
    %c0_74 = arith.constant 0 : index
    %c0_75 = arith.constant 0 : index
    %180 = vector.load %arg8[%c0_74, %c0_75] : memref<8x128xf32, #tpu.memory_space<vmem>>, vector<8x128xf32>
    %181 = arith.mulf %171, %180 : vector<8x128xf32>
    %182 = arith.mulf %165, %173 : vector<8x128xf32>
    %183 = arith.addf %181, %182 : vector<8x128xf32>
    %184 = math.tanh %183 : vector<8x128xf32>
    %185 = arith.mulf %179, %184 : vector<8x128xf32>
    %c0_76 = arith.constant 0 : index
    %c0_77 = arith.constant 0 : index
    %186 = vector.load %arg8[%c0_76, %c0_77] : memref<8x128xf32, #tpu.memory_space<vmem>>, vector<8x128xf32>
    tpu.vector_store %arg8[%c0_76, %c0_77], %183 {strides = array<i32>} : memref<8x128xf32, #tpu.memory_space<vmem>>, vector<8x128xf32>,
    %c0_78 = arith.constant 0 : index
    %c0_79 = arith.constant 0 : index
    %187 = vector.load %arg7[%c0_78, %c0_79] : memref<8x128xf32, #tpu.memory_space<vmem>>, vector<8x128xf32>
    tpu.vector_store %arg7[%c0_78, %c0_79], %185 {strides = array<i32>} : memref<8x128xf32, #tpu.memory_space<vmem>>, vector<8x128xf32>,
    %c5_i32 = arith.constant 5 : i32
    %c0_80 = arith.constant 0 : index
    %c0_81 = arith.constant 0 : index
    %188 = vector.load %arg7[%c0_80, %c0_81] : memref<8x128xf32, #tpu.memory_space<vmem>>, vector<8x128xf32>
    %189 = arith.truncf %188 : vector<8x128xf32> to vector<8x128xbf16>
    %190 = arith.index_cast %c5_i32 : i32 to index
    %c0_82 = arith.constant 0 : index
    %c0_83 = arith.constant 0 : index
    %191 = vector.load %arg2[%190, %c0_82, %c0_83] : memref<8x8x512xbf16, #tpu.memory_space<vmem>>, vector<1x8x512xbf16>
    %192 = vector.shape_cast %191 : vector<1x8x512xbf16> to vector<8x512xbf16>
    %193 = arith.extf %192 : vector<8x512xbf16> to vector<8x512xf32>
    %c0_84 = arith.constant 0 : index
    %c0_85 = arith.constant 0 : index
    %194 = vector.load %arg3[%c0_84, %c0_85] : memref<128x512xbf16, #tpu.memory_space<vmem>>, vector<128x512xbf16>
    %cst_86 = arith.constant dense<0.000000e+00> : vector<8x512xf32>
    %195 = tpu.matmul %189, %194, %cst_86 {dimension_numbers = #tpu.dot_dimension_numbers<[1], [0], [0], [1], [0, 0, 1, 1], [], []>} : vector<8x128xbf16>, vector<128x512xbf16>, vector<8x512xf32> -> vector<8x512xf32>
    %196 = arith.addf %193, %195 : vector<8x512xf32>
    %197 = vector.extract_strided_slice %196 {offsets = [0, 0], sizes = [8, 128], strides = [1, 1]} : vector<8x512xf32> to vector<8x128xf32>
    %198 = arith.negf %197 : vector<8x128xf32>
    %199 = math.exp %198 : vector<8x128xf32>
    %cst_87 = arith.constant 1.000000e+00 : f32
    %200 = vector.broadcast %cst_87 : f32 to vector<8x128xf32>
    %201 = arith.addf %200, %199 : vector<8x128xf32>
    %202 = arith.divf %200, %201 : vector<8x128xf32>
    %203 = vector.extract_strided_slice %196 {offsets = [0, 128], sizes = [8, 128], strides = [1, 1]} : vector<8x512xf32> to vector<8x128xf32>
    %204 = arith.negf %203 : vector<8x128xf32>
    %205 = math.exp %204 : vector<8x128xf32>
    %cst_88 = arith.constant 1.000000e+00 : f32
    %206 = vector.broadcast %cst_88 : f32 to vector<8x128xf32>
    %207 = arith.addf %206, %205 : vector<8x128xf32>
    %208 = arith.divf %206, %207 : vector<8x128xf32>
    %209 = vector.extract_strided_slice %196 {offsets = [0, 256], sizes = [8, 128], strides = [1, 1]} : vector<8x512xf32> to vector<8x128xf32>
    %210 = math.tanh %209 : vector<8x128xf32>
    %211 = vector.extract_strided_slice %196 {offsets = [0, 384], sizes = [8, 128], strides = [1, 1]} : vector<8x512xf32> to vector<8x128xf32>
    %212 = arith.negf %211 : vector<8x128xf32>
    %213 = math.exp %212 : vector<8x128xf32>
    %cst_89 = arith.constant 1.000000e+00 : f32
    %214 = vector.broadcast %cst_89 : f32 to vector<8x128xf32>
    %215 = arith.addf %214, %213 : vector<8x128xf32>
    %216 = arith.divf %214, %215 : vector<8x128xf32>
    %c0_90 = arith.constant 0 : index
    %c0_91 = arith.constant 0 : index
    %217 = vector.load %arg8[%c0_90, %c0_91] : memref<8x128xf32, #tpu.memory_space<vmem>>, vector<8x128xf32>
    %218 = arith.mulf %208, %217 : vector<8x128xf32>
    %219 = arith.mulf %202, %210 : vector<8x128xf32>
    %220 = arith.addf %218, %219 : vector<8x128xf32>
    %221 = math.tanh %220 : vector<8x128xf32>
    %222 = arith.mulf %216, %221 : vector<8x128xf32>
    %c0_92 = arith.constant 0 : index
    %c0_93 = arith.constant 0 : index
    %223 = vector.load %arg8[%c0_92, %c0_93] : memref<8x128xf32, #tpu.memory_space<vmem>>, vector<8x128xf32>
    tpu.vector_store %arg8[%c0_92, %c0_93], %220 {strides = array<i32>} : memref<8x128xf32, #tpu.memory_space<vmem>>, vector<8x128xf32>,
    %c0_94 = arith.constant 0 : index
    %c0_95 = arith.constant 0 : index
    %224 = vector.load %arg7[%c0_94, %c0_95] : memref<8x128xf32, #tpu.memory_space<vmem>>, vector<8x128xf32>
    tpu.vector_store %arg7[%c0_94, %c0_95], %222 {strides = array<i32>} : memref<8x128xf32, #tpu.memory_space<vmem>>, vector<8x128xf32>,
    %c6_i32 = arith.constant 6 : i32
    %c0_96 = arith.constant 0 : index
    %c0_97 = arith.constant 0 : index
    %225 = vector.load %arg7[%c0_96, %c0_97] : memref<8x128xf32, #tpu.memory_space<vmem>>, vector<8x128xf32>
    %226 = arith.truncf %225 : vector<8x128xf32> to vector<8x128xbf16>
    %227 = arith.index_cast %c6_i32 : i32 to index
    %c0_98 = arith.constant 0 : index
    %c0_99 = arith.constant 0 : index
    %228 = vector.load %arg2[%227, %c0_98, %c0_99] : memref<8x8x512xbf16, #tpu.memory_space<vmem>>, vector<1x8x512xbf16>
    %229 = vector.shape_cast %228 : vector<1x8x512xbf16> to vector<8x512xbf16>
    %230 = arith.extf %229 : vector<8x512xbf16> to vector<8x512xf32>
    %c0_100 = arith.constant 0 : index
    %c0_101 = arith.constant 0 : index
    %231 = vector.load %arg3[%c0_100, %c0_101] : memref<128x512xbf16, #tpu.memory_space<vmem>>, vector<128x512xbf16>
    %cst_102 = arith.constant dense<0.000000e+00> : vector<8x512xf32>
    %232 = tpu.matmul %226, %231, %cst_102 {dimension_numbers = #tpu.dot_dimension_numbers<[1], [0], [0], [1], [0, 0, 1, 1], [], []>} : vector<8x128xbf16>, vector<128x512xbf16>, vector<8x512xf32> -> vector<8x512xf32>
    %233 = arith.addf %230, %232 : vector<8x512xf32>
    %234 = vector.extract_strided_slice %233 {offsets = [0, 0], sizes = [8, 128], strides = [1, 1]} : vector<8x512xf32> to vector<8x128xf32>
    %235 = arith.negf %234 : vector<8x128xf32>
    %236 = math.exp %235 : vector<8x128xf32>
    %cst_103 = arith.constant 1.000000e+00 : f32
    %237 = vector.broadcast %cst_103 : f32 to vector<8x128xf32>
    %238 = arith.addf %237, %236 : vector<8x128xf32>
    %239 = arith.divf %237, %238 : vector<8x128xf32>
    %240 = vector.extract_strided_slice %233 {offsets = [0, 128], sizes = [8, 128], strides = [1, 1]} : vector<8x512xf32> to vector<8x128xf32>
    %241 = arith.negf %240 : vector<8x128xf32>
    %242 = math.exp %241 : vector<8x128xf32>
    %cst_104 = arith.constant 1.000000e+00 : f32
    %243 = vector.broadcast %cst_104 : f32 to vector<8x128xf32>
    %244 = arith.addf %243, %242 : vector<8x128xf32>
    %245 = arith.divf %243, %244 : vector<8x128xf32>
    %246 = vector.extract_strided_slice %233 {offsets = [0, 256], sizes = [8, 128], strides = [1, 1]} : vector<8x512xf32> to vector<8x128xf32>
    %247 = math.tanh %246 : vector<8x128xf32>
    %248 = vector.extract_strided_slice %233 {offsets = [0, 384], sizes = [8, 128], strides = [1, 1]} : vector<8x512xf32> to vector<8x128xf32>
    %249 = arith.negf %248 : vector<8x128xf32>
    %250 = math.exp %249 : vector<8x128xf32>
    %cst_105 = arith.constant 1.000000e+00 : f32
    %251 = vector.broadcast %cst_105 : f32 to vector<8x128xf32>
    %252 = arith.addf %251, %250 : vector<8x128xf32>
    %253 = arith.divf %251, %252 : vector<8x128xf32>
    %c0_106 = arith.constant 0 : index
    %c0_107 = arith.constant 0 : index
    %254 = vector.load %arg8[%c0_106, %c0_107] : memref<8x128xf32, #tpu.memory_space<vmem>>, vector<8x128xf32>
    %255 = arith.mulf %245, %254 : vector<8x128xf32>
    %256 = arith.mulf %239, %247 : vector<8x128xf32>
    %257 = arith.addf %255, %256 : vector<8x128xf32>
    %258 = math.tanh %257 : vector<8x128xf32>
    %259 = arith.mulf %253, %258 : vector<8x128xf32>
    %c0_108 = arith.constant 0 : index
    %c0_109 = arith.constant 0 : index
    %260 = vector.load %arg8[%c0_108, %c0_109] : memref<8x128xf32, #tpu.memory_space<vmem>>, vector<8x128xf32>
    tpu.vector_store %arg8[%c0_108, %c0_109], %257 {strides = array<i32>} : memref<8x128xf32, #tpu.memory_space<vmem>>, vector<8x128xf32>,
    %c0_110 = arith.constant 0 : index
    %c0_111 = arith.constant 0 : index
    %261 = vector.load %arg7[%c0_110, %c0_111] : memref<8x128xf32, #tpu.memory_space<vmem>>, vector<8x128xf32>
    tpu.vector_store %arg7[%c0_110, %c0_111], %259 {strides = array<i32>} : memref<8x128xf32, #tpu.memory_space<vmem>>, vector<8x128xf32>,
    %c7_i32 = arith.constant 7 : i32
    %c0_112 = arith.constant 0 : index
    %c0_113 = arith.constant 0 : index
    %262 = vector.load %arg7[%c0_112, %c0_113] : memref<8x128xf32, #tpu.memory_space<vmem>>, vector<8x128xf32>
    %263 = arith.truncf %262 : vector<8x128xf32> to vector<8x128xbf16>
    %264 = arith.index_cast %c7_i32 : i32 to index
    %c0_114 = arith.constant 0 : index
    %c0_115 = arith.constant 0 : index
    %265 = vector.load %arg2[%264, %c0_114, %c0_115] : memref<8x8x512xbf16, #tpu.memory_space<vmem>>, vector<1x8x512xbf16>
    %266 = vector.shape_cast %265 : vector<1x8x512xbf16> to vector<8x512xbf16>
    %267 = arith.extf %266 : vector<8x512xbf16> to vector<8x512xf32>
    %c0_116 = arith.constant 0 : index
    %c0_117 = arith.constant 0 : index
    %268 = vector.load %arg3[%c0_116, %c0_117] : memref<128x512xbf16, #tpu.memory_space<vmem>>, vector<128x512xbf16>
    %cst_118 = arith.constant dense<0.000000e+00> : vector<8x512xf32>
    %269 = tpu.matmul %263, %268, %cst_118 {dimension_numbers = #tpu.dot_dimension_numbers<[1], [0], [0], [1], [0, 0, 1, 1], [], []>} : vector<8x128xbf16>, vector<128x512xbf16>, vector<8x512xf32> -> vector<8x512xf32>
    %270 = arith.addf %267, %269 : vector<8x512xf32>
    %271 = vector.extract_strided_slice %270 {offsets = [0, 0], sizes = [8, 128], strides = [1, 1]} : vector<8x512xf32> to vector<8x128xf32>
    %272 = arith.negf %271 : vector<8x128xf32>
    %273 = math.exp %272 : vector<8x128xf32>
    %cst_119 = arith.constant 1.000000e+00 : f32
    %274 = vector.broadcast %cst_119 : f32 to vector<8x128xf32>
    %275 = arith.addf %274, %273 : vector<8x128xf32>
    %276 = arith.divf %274, %275 : vector<8x128xf32>
    %277 = vector.extract_strided_slice %270 {offsets = [0, 128], sizes = [8, 128], strides = [1, 1]} : vector<8x512xf32> to vector<8x128xf32>
    %278 = arith.negf %277 : vector<8x128xf32>
    %279 = math.exp %278 : vector<8x128xf32>
    %cst_120 = arith.constant 1.000000e+00 : f32
    %280 = vector.broadcast %cst_120 : f32 to vector<8x128xf32>
    %281 = arith.addf %280, %279 : vector<8x128xf32>
    %282 = arith.divf %280, %281 : vector<8x128xf32>
    %283 = vector.extract_strided_slice %270 {offsets = [0, 256], sizes = [8, 128], strides = [1, 1]} : vector<8x512xf32> to vector<8x128xf32>
    %284 = math.tanh %283 : vector<8x128xf32>
    %285 = vector.extract_strided_slice %270 {offsets = [0, 384], sizes = [8, 128], strides = [1, 1]} : vector<8x512xf32> to vector<8x128xf32>
    %286 = arith.negf %285 : vector<8x128xf32>
    %287 = math.exp %286 : vector<8x128xf32>
    %cst_121 = arith.constant 1.000000e+00 : f32
    %288 = vector.broadcast %cst_121 : f32 to vector<8x128xf32>
    %289 = arith.addf %288, %287 : vector<8x128xf32>
    %290 = arith.divf %288, %289 : vector<8x128xf32>
    %c0_122 = arith.constant 0 : index
    %c0_123 = arith.constant 0 : index
    %291 = vector.load %arg8[%c0_122, %c0_123] : memref<8x128xf32, #tpu.memory_space<vmem>>, vector<8x128xf32>
    %292 = arith.mulf %282, %291 : vector<8x128xf32>
    %293 = arith.mulf %276, %284 : vector<8x128xf32>
    %294 = arith.addf %292, %293 : vector<8x128xf32>
    %295 = math.tanh %294 : vector<8x128xf32>
    %296 = arith.mulf %290, %295 : vector<8x128xf32>
    %c0_124 = arith.constant 0 : index
    %c0_125 = arith.constant 0 : index
    %297 = vector.load %arg8[%c0_124, %c0_125] : memref<8x128xf32, #tpu.memory_space<vmem>>, vector<8x128xf32>
    tpu.vector_store %arg8[%c0_124, %c0_125], %294 {strides = array<i32>} : memref<8x128xf32, #tpu.memory_space<vmem>>, vector<8x128xf32>,
    %c0_126 = arith.constant 0 : index
    %c0_127 = arith.constant 0 : index
    %298 = vector.load %arg7[%c0_126, %c0_127] : memref<8x128xf32, #tpu.memory_space<vmem>>, vector<8x128xf32>
    tpu.vector_store %arg7[%c0_126, %c0_127], %296 {strides = array<i32>} : memref<8x128xf32, #tpu.memory_space<vmem>>, vector<8x128xf32>,
    %c8_i32 = arith.constant 8 : i32
    %c0_i32_128 = arith.constant 0 : i32
    %299 = arith.cmpi eq, %arg1, %c0_i32_128 : i32
    %300 = arith.extui %299 : i1 to i32
    %c0_i32_129 = arith.constant 0 : i32
    %301 = arith.cmpi ne, %300, %c0_i32_129 : i32
    scf.if %301 {
      %c0_130 = arith.constant 0 : index
      %c0_131 = arith.constant 0 : index
      %302 = vector.load %arg7[%c0_130, %c0_131] : memref<8x128xf32, #tpu.memory_space<vmem>>, vector<8x128xf32>
      %303 = arith.truncf %302 : vector<8x128xf32> to vector<8x128xbf16>
      %c0_132 = arith.constant 0 : index
      %c0_133 = arith.constant 0 : index
      %304 = vector.load %arg4[%c0_132, %c0_133] : memref<128x128xbf16, #tpu.memory_space<vmem>>, vector<128x128xbf16>
      %cst_134 = arith.constant dense<0.000000e+00> : vector<8x128xf32>
      %305 = tpu.matmul %303, %304, %cst_134 {dimension_numbers = #tpu.dot_dimension_numbers<[1], [0], [0], [1], [0, 0, 1, 1], [], []>} : vector<8x128xbf16>, vector<128x128xbf16>, vector<8x128xf32> -> vector<8x128xf32>
      %c0_135 = arith.constant 0 : index
      %c0_136 = arith.constant 0 : index
      %306 = vector.load %arg5[%c0_135, %c0_136] : memref<1x128xf32, #tpu.memory_space<vmem>>, vector<1x128xf32>
      %307 = vector.broadcast %306 : vector<1x128xf32> to vector<8x128xf32>
      %308 = arith.addf %305, %307 : vector<8x128xf32>
      %c0_137 = arith.constant 0 : index
      %c0_138 = arith.constant 0 : index
      %309 = vector.load %arg6[%c0_137, %c0_138] : memref<8x128xf32, #tpu.memory_space<vmem>>, vector<8x128xf32>
      tpu.vector_store %arg6[%c0_137, %c0_138], %308 {strides = array<i32>} : memref<8x128xf32, #tpu.memory_space<vmem>>, vector<8x128xf32>,
    } else {
    }
    return
  }
  func.func @transform_0(%arg0: i32, %arg1: i32) -> (i32, i32, i32) {
    %c0_i32 = arith.constant 0 : i32
    %c0_i32_0 = arith.constant 0 : i32
    return %arg1, %arg0, %c0_i32 : i32, i32, i32
  }
  func.func @transform_1(%arg0: i32, %arg1: i32) -> (i32, i32) {
    %c0_i32 = arith.constant 0 : i32
    %c0_i32_0 = arith.constant 0 : i32
    %c0_i32_1 = arith.constant 0 : i32
    return %c0_i32, %c0_i32_0 : i32, i32
  }
  func.func @transform_2(%arg0: i32, %arg1: i32) -> (i32, i32) {
    %c0_i32 = arith.constant 0 : i32
    %c0_i32_0 = arith.constant 0 : i32
    %c0_i32_1 = arith.constant 0 : i32
    return %c0_i32, %c0_i32_0 : i32, i32
  }
  func.func @transform_3(%arg0: i32, %arg1: i32) -> (i32, i32) {
    %c0_i32 = arith.constant 0 : i32
    %c0_i32_0 = arith.constant 0 : i32
    %c0_i32_1 = arith.constant 0 : i32
    return %c0_i32, %c0_i32_0 : i32, i32
  }
  func.func @transform_4(%arg0: i32, %arg1: i32) -> (i32, i32) {
    %c0_i32 = arith.constant 0 : i32
    %c0_i32_0 = arith.constant 0 : i32
    return %arg0, %c0_i32 : i32, i32
  }
}

</mosaic_0001>

<bundles_post_ra>
// kernel: tpu_custom_call.1
= control target key start
LH: loop header
LB: loop body
LE: loop exit
PB: predicated region body
PF: predicated region fallthrough
CT: control target
= control target key end

     0   :  { %9 = vsyncpa [#allocation5], 0  ;;  %s4448_s0 = inlined_call_operand.hbm [shape: bf16[8,8,512], index: 0, kind: input, shape index: {}]   ;;  %s4449_s1 = inlined_call_operand.hbm [shape: bf16[128,512], index: 1, kind: input, shape index: {}]   ;;  %s4450_s2 = inlined_call_operand.hbm [shape: bf16[128,128], index: 2, kind: input, shape index: {}]   ;;  %s4451_s3 = inlined_call_operand.vmem [shape: f32[1,128], index: 3, kind: input, shape index: {}]   ;;  %s4452_s4 = inlined_call_operand.hbm [shape: f32[8,128], index: 4, kind: output, shape index: {}]  }
   0x1   :  { %10 = vsyncpa [#allocation8], 0 }
   0x2   :  { %11 = vsyncpa [#allocation6], 0  ;;  %s29_s17 = sshll.u32 %s4449_s1, 4  ;;  %s4343_s18 = smov [#allocation7]   ;;  %s30_s17 = int_to_ptr.hbm [resolvable:$true] %s29_s17 }
   0x3   :  { %s31_s19 = sshll.u32 %s4343_s18, 4  ;;  %s16_s22 = sshll.u32 %s4448_s0, 4  ;;  %s32_s19 = int_to_ptr.vmem [resolvable:$true] %s31_s19  ;;  %s17_s22 = int_to_ptr.hbm [resolvable:$true] %s16_s22 }
   0x4   :  { %s4344_s23 = smov 256   ;;  %s4345_s24 = smov 16  }
   0x5   :  { %37 = dma.hbm_to_vmem [thread:$0]  %s30_s17, 4096, %s32_s19, [#allocation8], %s4344_s23, %s4344_s23, %s4345_s24  }
   0x6   :  { %s4346_s25 = smov [#allocation4]   ;;  %s42_s29 = sshll.u32 %s4450_s2, 4  ;;  %s43_s29 = int_to_ptr.hbm [resolvable:$true] %s42_s29 }
   0x7   :  { %s18_s26 = sshll.u32 %s4346_s25, 4  ;;  %s4347_s1 = smov [#allocation9]   ;;  %s19_s26 = int_to_ptr.vmem [resolvable:$true] %s18_s26 }
   0x8   :  { %24 = dma.hbm_to_vmem [thread:$0]  %s17_s22, 2048, %s19_s26, [#allocation5], %s4344_s23, %s4344_s23, %s4345_s24  }
   0x9   :  { %s44_s30 = sshll.u32 %s4347_s1, 4  ;;  %s4348_s5 = smov 64   ;;  %s45_s30 = int_to_ptr.vmem [resolvable:$true] %s44_s30 }
   0xa   :  { %s4349_s6 = smov 4  }
   0xb   :  { %50 = dma.hbm_to_vmem [thread:$0]  %s43_s29, 1024, %s45_s30, [#allocation8], %s4348_s5, %s4348_s5, %s4349_s6  }
   0xc   :  { %4337 = dma.done.wait [#allocation5], 2048  }
   0xd   :  { %4338 = vsyncadd [#allocation5], 4294965248 }
   0xe   :  { %4339 = dma.done.wait [#allocation8], 5120  }
   0xf   :  { %4340 = vsyncadd [#allocation8], 4294962176  ;;  %v2873_v0 = vld [vmem:[#allocation7 + $0xe0] sm:$0xf]  ;;  %v3869_v1 = vld [vmem:[#allocation7 + $0xec] sm:$0xf0] }
  0x10   :  { %v3867_v2 = vld [vmem:[#allocation7 + $0xe4] sm:$0xf]  ;;  %v2874_v3 = vor.u32 %v3869_v1, %v2873_v0  ;;  %v2875_v4 = vld [vmem:[#allocation7 + $0xf0] sm:$0xf0]  ;;  %v3868_v5 = vld [vmem:[#allocation7 + $0xec] sm:$0xf] }
  0x11   :  { %v2883_v6 = vld [vmem:[#allocation7 + $0xf8] sm:$0xf0]  ;;  %v2878_v7 = vor.u32 %v3867_v2, %v2875_v4  ;;  %v2857_v9 = vld [vmem:[#allocation7 + $0xc0] sm:$0xf]  ;;  %v3865_v10 = vld [vmem:[#allocation7 + $0xcc] sm:$0xf0] }
  0x12   :  { %v2886_v8 = vor.u32 %v3868_v5, %v2883_v6  ;;  %v3863_v11 = vld [vmem:[#allocation7 + $0xc4] sm:$0xf]  ;;  %271 = vmatpush.bf16.msra.mxu0 %v2874_v3  ;;  %v2858_v12 = vor.u32 %v3865_v10, %v2857_v9  ;;  %v2859_v13 = vld [vmem:[#allocation7 + $0xd0] sm:$0xf0]  ;;  %v3864_v14 = vld [vmem:[#allocation7 + $0xcc] sm:$0xf] }
  0x13   :  { %v2867_v15 = vld [vmem:[#allocation7 + $0xd8] sm:$0xf0]  ;;  %284 = vmatpush.bf16.msra.mxu1 %v2878_v7  ;;  %v2862_v16 = vor.u32 %v3863_v11, %v2859_v13  ;;  %v2881_v18 = vld [vmem:[#allocation7 + $0xe8] sm:$0xf]  ;;  %v3870_v19 = vld [vmem:[#allocation7 + $0xf4] sm:$0xf0] }
  0x14   :  { %310 = vmatpush.bf16.msra.mxu3 %v2886_v8  ;;  %v2870_v17 = vor.u32 %v3864_v14, %v2867_v15  ;;  %v2841_v20 = vld [vmem:[#allocation7 + $0xa0] sm:$0xf]  ;;  %v2882_v21 = vor.u32 %v3870_v19, %v2881_v18  ;;  %v3861_v22 = vld [vmem:[#allocation7 + $0xac] sm:$0xf0]  ;;  %v3859_v23 = vld [vmem:[#allocation7 + $0xa4] sm:$0xf] }
  0x15   :  { %v2843_v24 = vld [vmem:[#allocation7 + $0xb0] sm:$0xf0]  ;;  %v3860_v25 = vld [vmem:[#allocation7 + $0xac] sm:$0xf]  ;;  %v2851_v26 = vld [vmem:[#allocation7 + $0xb8] sm:$0xf0]  ;;  %v2842_v28 = vor.u32 %v3861_v22, %v2841_v20 }
  0x16   :  { %v2865_v27 = vld [vmem:[#allocation7 + $0xc8] sm:$0xf]  ;;  %272 = vmatpush.bf16.msra.mxu0 %v2858_v12  ;;  %297 = vmatpush.bf16.msra.mxu2 %v2882_v21  ;;  %v3866_v29 = vld [vmem:[#allocation7 + $0xd4] sm:$0xf0]  ;;  %v2825_v30 = vld [vmem:[#allocation7 + $0x80] sm:$0xf]  ;;  %v2846_v32 = vor.u32 %v3859_v23, %v2843_v24  ;;  %v2854_v33 = vor.u32 %v3860_v25, %v2851_v26 }
  0x17   :  { %v3857_v31 = vld [vmem:[#allocation7 + $0x8c] sm:$0xf0]  ;;  %285 = vmatpush.bf16.msra.mxu1 %v2862_v16  ;;  %v2866_v34 = vor.u32 %v3866_v29, %v2865_v27  ;;  %v3855_v35 = vld [vmem:[#allocation7 + $0x84] sm:$0xf]  ;;  %v2827_v36 = vld [vmem:[#allocation7 + $0x90] sm:$0xf0] }
  0x18   :  { %311 = vmatpush.bf16.msra.mxu3 %v2870_v17  ;;  %v3856_v37 = vld [vmem:[#allocation7 + $0x8c] sm:$0xf]  ;;  %v2835_v38 = vld [vmem:[#allocation7 + $0x98] sm:$0xf0]  ;;  %v2849_v39 = vld [vmem:[#allocation7 + $0xa8] sm:$0xf]  ;;  %v2826_v41 = vor.u32 %v3857_v31, %v2825_v30  ;;  %v2830_v45 = vor.u32 %v3855_v35, %v2827_v36 }
  0x19   :  { %v3862_v40 = vld [vmem:[#allocation7 + $0xb4] sm:$0xf0]  ;;  %v2809_v43 = vld [vmem:[#allocation7 + $0x60] sm:$0xf]  ;;  %v3853_v44 = vld [vmem:[#allocation7 + $0x6c] sm:$0xf0]  ;;  %v2838_v46 = vor.u32 %v3856_v37, %v2835_v38 }
  0x1a   :  { %273 = vmatpush.bf16.msra.mxu0 %v2842_v28  ;;  %298 = vmatpush.bf16.msra.mxu2 %v2866_v34  ;;  %v2850_v42 = vor.u32 %v3862_v40, %v2849_v39  ;;  %v3851_v47 = vld [vmem:[#allocation7 + $0x64] sm:$0xf]  ;;  %v2833_v48 = vld [vmem:[#allocation7 + $0x88] sm:$0xf]  ;;  %v3858_v49 = vld [vmem:[#allocation7 + $0x94] sm:$0xf0]  ;;  %v2810_v53 = vor.u32 %v3853_v44, %v2809_v43 }
  0x1b   :  { %286 = vmatpush.bf16.msra.mxu1 %v2846_v32  ;;  %v2811_v50 = vld [vmem:[#allocation7 + $0x70] sm:$0xf0]  ;;  %v3852_v51 = vld [vmem:[#allocation7 + $0x6c] sm:$0xf]  ;;  %v2819_v52 = vld [vmem:[#allocation7 + $0x78] sm:$0xf0]  ;;  %v2834_v54 = vor.u32 %v3858_v49, %v2833_v48 }
  0x1c   :  { %312 = vmatpush.bf16.msra.mxu3 %v2854_v33  ;;  %v2793_v55 = vld [vmem:[#allocation7 + $0x40] sm:$0xf]  ;;  %v3849_v56 = vld [vmem:[#allocation7 + $0x4c] sm:$0xf0]  ;;  %v2814_v57 = vor.u32 %v3851_v47, %v2811_v50  ;;  %v2822_v58 = vor.u32 %v3852_v51, %v2819_v52  ;;  %v3847_v59 = vld [vmem:[#allocation7 + $0x44] sm:$0xf] }
  0x1d   :  { %v2817_v60 = vld [vmem:[#allocation7 + $0x68] sm:$0xf]  ;;  %v3854_v61 = vld [vmem:[#allocation7 + $0x74] sm:$0xf0]  ;;  %v2795_v62 = vld [vmem:[#allocation7 + $0x50] sm:$0xf0]  ;;  %v2794_v1 = vor.u32 %v3849_v56, %v2793_v55 }
  0x1e   :  { %274 = vmatpush.bf16.msra.mxu0 %v2826_v41  ;;  %299 = vmatpush.bf16.msra.mxu2 %v2850_v42  ;;  %v3848_v63 = vld [vmem:[#allocation7 + $0x4c] sm:$0xf]  ;;  %v2803_v0 = vld [vmem:[#allocation7 + $0x58] sm:$0xf0]  ;;  %v2818_v2 = vor.u32 %v3854_v61, %v2817_v60  ;;  %v2777_v3 = vld [vmem:[#allocation7 + $0x20] sm:$0xf]  ;;  %v2798_v6 = vor.u32 %v3847_v59, %v2795_v62 }
  0x1f   :  { %287 = vmatpush.bf16.msra.mxu1 %v2830_v45  ;;  %v3845_v4 = vld [vmem:[#allocation7 + $0x2c] sm:$0xf0]  ;;  %v3843_v5 = vld [vmem:[#allocation7 + $0x24] sm:$0xf]  ;;  %v2806_v7 = vor.u32 %v3848_v63, %v2803_v0  ;;  %v2779_v8 = vld [vmem:[#allocation7 + $0x30] sm:$0xf0] }
  0x20   :  { %313 = vmatpush.bf16.msra.mxu3 %v2838_v46  ;;  %v2801_v9 = vld [vmem:[#allocation7 + $0x48] sm:$0xf]  ;;  %v3850_v10 = vld [vmem:[#allocation7 + $0x54] sm:$0xf0]  ;;  %v3844_v11 = vld [vmem:[#allocation7 + $0x2c] sm:$0xf]  ;;  %v2778_v13 = vor.u32 %v3845_v4, %v2777_v3  ;;  %v2782_v17 = vor.u32 %v3843_v5, %v2779_v8 }
  0x21   :  { %v2787_v12 = vld [vmem:[#allocation7 + $0x38] sm:$0xf0]  ;;  %v2802_v14 = vor.u32 %v3850_v10, %v2801_v9  ;;  %v2761_v15 = vld [vmem:[#allocation7] sm:$0xf]  ;;  %v3841_v16 = vld [vmem:[#allocation7 + $0xc] sm:$0xf0] }
  0x22   :  { %275 = vmatpush.bf16.msra.mxu0 %v2810_v53  ;;  %300 = vmatpush.bf16.msra.mxu2 %v2834_v54  ;;  %v2790_v18 = vor.u32 %v3844_v11, %v2787_v12  ;;  %v3839_v19 = vld [vmem:[#allocation7 + $0x4] sm:$0xf]  ;;  %v2785_v20 = vld [vmem:[#allocation7 + $0x28] sm:$0xf]  ;;  %v3846_v21 = vld [vmem:[#allocation7 + $0x34] sm:$0xf0]  ;;  %v2762_v25 = vor.u32 %v3841_v16, %v2761_v15 }
  0x23   :  { %288 = vmatpush.bf16.msra.mxu1 %v2814_v57  ;;  %v2763_v22 = vld [vmem:[#allocation7 + $0x10] sm:$0xf0]  ;;  %v3840_v23 = vld [vmem:[#allocation7 + $0xc] sm:$0xf]  ;;  %v2771_v24 = vld [vmem:[#allocation7 + $0x18] sm:$0xf0]  ;;  %v2786_v26 = vor.u32 %v3846_v21, %v2785_v20 }
  0x24   :  { %314 = vmatpush.bf16.msra.mxu3 %v2822_v58  ;;  %v2766_v27 = vor.u32 %v3839_v19, %v2763_v22  ;;  %v2774_v28 = vor.u32 %v3840_v23, %v2771_v24  ;;  %v2769_v29 = vld [vmem:[#allocation7 + $0x8] sm:$0xf]  ;;  %v3842_v30 = vld [vmem:[#allocation7 + $0x14] sm:$0xf0]  ;;  %v4350_v32 = vmov 0.0|0.0   ;;  %v73_v4 = vld [vmem:[#allocation4] sm:$0xff] }
  0x25   :  { %v2770_v31 = vor.u32 %v3842_v30, %v2769_v29  ;;  %v3004_v33 = vld [vmem:[#allocation7 + $0xe0] sm:$0xf]  ;;  %v3901_v34 = vld [vmem:[#allocation7 + $0xec] sm:$0xf0]  ;;  %v3899_v35 = vld [vmem:[#allocation7 + $0xe4] sm:$0xf]  ;;  %v76_v22 = vunpack.c.h.bf16 %v73_v4 }
  0x26   :  { %276 = vmatpush.bf16.msra.mxu0 %v2794_v1  ;;  %301 = vmatpush.bf16.msra.mxu2 %v2818_v2  ;;  %v3005_v36 = vor.u32 %v3901_v34, %v3004_v33  ;;  %v3006_v37 = vld [vmem:[#allocation7 + $0xf0] sm:$0xf0]  ;;  %v3012_v38 = vld [vmem:[#allocation7 + $0xe8] sm:$0xf]  ;;  %v3902_v39 = vld [vmem:[#allocation7 + $0xf4] sm:$0xf0] }
  0x27   :  { %289 = vmatpush.bf16.msra.mxu1 %v2798_v6  ;;  %v3009_v40 = vor.u32 %v3899_v35, %v3006_v37  ;;  %v3013_v41 = vor.u32 %v3902_v39, %v3012_v38  ;;  %v3900_v42 = vld [vmem:[#allocation7 + $0xec] sm:$0xf]  ;;  %v3014_v43 = vld [vmem:[#allocation7 + $0xf8] sm:$0xf0]  ;;  %v2988_v45 = vld [vmem:[#allocation7 + $0xc0] sm:$0xf] }
  0x28   :  { %315 = vmatpush.bf16.msra.mxu3 %v2806_v7  ;;  %v3017_v44 = vor.u32 %v3900_v42, %v3014_v43  ;;  %v3897_v46 = vld [vmem:[#allocation7 + $0xcc] sm:$0xf0]  ;;  %v3895_v47 = vld [vmem:[#allocation7 + $0xc4] sm:$0xf]  ;;  %v2990_v49 = vld [vmem:[#allocation7 + $0xd0] sm:$0xf0] }
  0x29   :  { %v2989_v48 = vor.u32 %v3897_v46, %v2988_v45  ;;  %v2996_v50 = vld [vmem:[#allocation7 + $0xc8] sm:$0xf]  ;;  %v3898_v51 = vld [vmem:[#allocation7 + $0xd4] sm:$0xf0]  ;;  %v2993_v52 = vor.u32 %v3895_v47, %v2990_v49  ;;  %v3896_v54 = vld [vmem:[#allocation7 + $0xcc] sm:$0xf] }
  0x2a   :  { %277 = vmatpush.bf16.msra.mxu0 %v2778_v13  ;;  %302 = vmatpush.bf16.msra.mxu2 %v2802_v14  ;;  %v2997_v53 = vor.u32 %v3898_v51, %v2996_v50  ;;  %v2998_v55 = vld [vmem:[#allocation7 + $0xd8] sm:$0xf0]  ;;  %v2972_v57 = vld [vmem:[#allocation7 + $0xa0] sm:$0xf]  ;;  %v3893_v58 = vld [vmem:[#allocation7 + $0xac] sm:$0xf0] }
  0x2b   :  { %290 = vmatpush.bf16.msra.mxu1 %v2782_v17  ;;  %v3001_v56 = vor.u32 %v3896_v54, %v2998_v55  ;;  %v3891_v59 = vld [vmem:[#allocation7 + $0xa4] sm:$0xf]  ;;  %v2973_v60 = vor.u32 %v3893_v58, %v2972_v57  ;;  %v2974_v61 = vld [vmem:[#allocation7 + $0xb0] sm:$0xf0]  ;;  %v2980_v62 = vld [vmem:[#allocation7 + $0xa8] sm:$0xf] }
  0x2c   :  { %316 = vmatpush.bf16.msra.mxu3 %v2790_v18  ;;  %v3894_v63 = vld [vmem:[#allocation7 + $0xb4] sm:$0xf0]  ;;  %v2977_v0 = vor.u32 %v3891_v59, %v2974_v61  ;;  %v3892_v2 = vld [vmem:[#allocation7 + $0xac] sm:$0xf]  ;;  %v2982_v3 = vld [vmem:[#allocation7 + $0xb8] sm:$0xf0]  ;;  %v75_v18 = vunpack.c.l.bf16 %v73_v4 }
  0x2d   :  { %v2981_v1 = vor.u32 %v3894_v63, %v2980_v62  ;;  %v2985_v5 = vor.u32 %v3892_v2, %v2982_v3  ;;  %v2956_v6 = vld [vmem:[#allocation7 + $0x80] sm:$0xf]  ;;  %v3889_v7 = vld [vmem:[#allocation7 + $0x8c] sm:$0xf0]  ;;  %v3887_v8 = vld [vmem:[#allocation7 + $0x84] sm:$0xf] }
  0x2e   :  { %278 = vmatpush.bf16.msra.mxu0 %v2762_v25  ;;  %303 = vmatpush.bf16.msra.mxu2 %v2786_v26  ;;  %v2957_v9 = vor.u32 %v3889_v7, %v2956_v6  ;;  %v2958_v10 = vld [vmem:[#allocation7 + $0x90] sm:$0xf0]  ;;  %v2964_v11 = vld [vmem:[#allocation7 + $0x88] sm:$0xf]  ;;  %v3890_v12 = vld [vmem:[#allocation7 + $0x94] sm:$0xf0] }
  0x2f   :  { %291 = vmatpush.bf16.msra.mxu1 %v2766_v27  ;;  %v2961_v13 = vor.u32 %v3887_v8, %v2958_v10  ;;  %v2965_v14 = vor.u32 %v3890_v12, %v2964_v11  ;;  %v3888_v15 = vld [vmem:[#allocation7 + $0x8c] sm:$0xf]  ;;  %v2966_v16 = vld [vmem:[#allocation7 + $0x98] sm:$0xf0]  ;;  %v2940_v19 = vld [vmem:[#allocation7 + $0x60] sm:$0xf] }
  0x30   :  { %317 = vmatpush.bf16.msra.mxu3 %v2774_v28  ;;  %v2969_v17 = vor.u32 %v3888_v15, %v2966_v16  ;;  %v3885_v20 = vld [vmem:[#allocation7 + $0x6c] sm:$0xf0]  ;;  %v3883_v21 = vld [vmem:[#allocation7 + $0x64] sm:$0xf]  ;;  %v2942_v24 = vld [vmem:[#allocation7 + $0x70] sm:$0xf0] }
  0x31   :  { %279 = vmatmul.bf16.vlgmr.msra.gmra.mxu0 %v4350_v32  ;;  %v2941_v23 = vor.u32 %v3885_v20, %v2940_v19  ;;  %v2948_v25 = vld [vmem:[#allocation7 + $0x68] sm:$0xf]  ;;  %v3886_v26 = vld [vmem:[#allocation7 + $0x74] sm:$0xf0]  ;;  %v2945_v27 = vor.u32 %v3883_v21, %v2942_v24  ;;  %v3884_v29 = vld [vmem:[#allocation7 + $0x6c] sm:$0xf] }
  0x32   :  { %292 = vmatmul.bf16.vlgmr.msra.gmra.mxu1 %v4350_v32  ;;  %304 = vmatpush.bf16.msra.mxu2 %v2770_v31  ;;  %v2949_v28 = vor.u32 %v3886_v26, %v2948_v25  ;;  %v2950_v30 = vld [vmem:[#allocation7 + $0x78] sm:$0xf0]  ;;  %v3881_v37 = vld [vmem:[#allocation7 + $0x4c] sm:$0xf0]  ;;  %v3879_v38 = vld [vmem:[#allocation7 + $0x44] sm:$0xf] }
  0x33   :  { %318 = vmatmul.bf16.vlgmr.msra.gmra.mxu3 %v4350_v32  ;;  %594 = vmatpush.bf16.msrb.mxu0 %v3005_v36  ;;  %v2953_v33 = vor.u32 %v3884_v29, %v2950_v30  ;;  %v2924_v36 = vld [vmem:[#allocation7 + $0x40] sm:$0xf]  ;;  %v2932_v42 = vld [vmem:[#allocation7 + $0x48] sm:$0xf]  ;;  %v3882_v43 = vld [vmem:[#allocation7 + $0x54] sm:$0xf0] }
  0x34   :  { %607 = vmatpush.bf16.msrb.mxu1 %v3009_v40  ;;  %633 = vmatpush.bf16.msrb.mxu3 %v3017_v44  ;;  %v2925_v40 = vor.u32 %v3881_v37, %v2924_v36  ;;  %v2933_v46 = vor.u32 %v3882_v43, %v2932_v42  ;;  %v3880_v47 = vld [vmem:[#allocation7 + $0x4c] sm:$0xf]  ;;  %v3875_v55 = vld [vmem:[#allocation7 + $0x24] sm:$0xf]  ;;  %v2916_v57 = vld [vmem:[#allocation7 + $0x28] sm:$0xf] }
  0x35   :  { %305 = vmatmul.bf16.vlgmr.msra.gmra.mxu2 %v4350_v32  ;;  %v4386_v32 = vld [vmem:[#allocation4 + $0x8] sm:$0xff]  ;;  %v3878_v59 = vld [vmem:[#allocation7 + $0x34] sm:$0xf0]  ;;  %v2918_v61 = vld [vmem:[#allocation7 + $0x38] sm:$0xf0]  ;;  %s4351_s7 = smov [#allocation10]  }
  0x36   :  { %620 = vmatpush.bf16.msrb.mxu2 %v3013_v41  ;;  %v2926_v41 = vld [vmem:[#allocation7 + $0x50] sm:$0xf0]  ;;  %v78_v50 = vunpack.c.h.bf16 %v4386_v32  ;;  %v2917_v63 = vor.u32 %v3878_v59, %v2916_v57  ;;  %v3873_v2 = vld [vmem:[#allocation7 + $0xc] sm:$0xf0]  ;;  %v3871_v3 = vld [vmem:[#allocation7 + $0x4] sm:$0xf] }
  0x37   :  { %595 = vmatpush.bf16.msrb.mxu0 %v2989_v48  ;;  %v2929_v45 = vor.u32 %v3879_v38, %v2926_v41  ;;  %v2934_v48 = vld [vmem:[#allocation7 + $0x58] sm:$0xf0]  ;;  %v2894_v7 = vld [vmem:[#allocation7 + $0x10] sm:$0xf0]  ;;  %v2900_v8 = vld [vmem:[#allocation7 + $0x8] sm:$0xf] }
  0x38   :  { %608 = vmatpush.bf16.msrb.mxu1 %v2993_v52  ;;  %634 = vmatpush.bf16.msrb.mxu3 %v3001_v56  ;;  %v2937_v51 = vor.u32 %v3880_v47, %v2934_v48  ;;  %v2908_v52 = vld [vmem:[#allocation7 + $0x20] sm:$0xf]  ;;  %v2910_v56 = vld [vmem:[#allocation7 + $0x30] sm:$0xf0]  ;;  %v2897_v11 = vor.u32 %v3871_v3, %v2894_v7  ;;  %v3931_v3 = vld [vmem:[#allocation7 + $0xe4] sm:$0xf] }
  0x39   :  { %v2913_v58 = vor.u32 %v3875_v55, %v2910_v56  ;;  %v3934_v7 = vld [vmem:[#allocation7 + $0xf4] sm:$0xf0]  ;;  %s2746_s8 = sshll.u32 %s4351_s7, 4  ;;  %s2748_s11 = sshll.u32 %s4452_s4, 4  ;;  %s2747_s8 = int_to_ptr.vmem [resolvable:$true] %s2746_s8  ;;  %s2749_s11 = int_to_ptr.hbm [resolvable:$true] %s2748_s11 }
  0x3a   :  { %621 = vmatpush.bf16.msrb.mxu2 %v2997_v53  ;;  %v3877_v53 = vld [vmem:[#allocation7 + $0x2c] sm:$0xf0] }
  0x3b   :  { %596 = vmatpush.bf16.msrb.mxu0 %v2973_v60  ;;  %v2909_v54 = vor.u32 %v3877_v53, %v2908_v52  ;;  %v3876_v60 = vld [vmem:[#allocation7 + $0x2c] sm:$0xf] }
  0x3c   :  { %609 = vmatpush.bf16.msrb.mxu1 %v2977_v0  ;;  %635 = vmatpush.bf16.msrb.mxu3 %v2985_v5  ;;  %v2921_v0 = vor.u32 %v3876_v60, %v2918_v61 }
  0x3e   :  { %622 = vmatpush.bf16.msrb.mxu2 %v2981_v1  ;;  %v2892_v1 = vld [vmem:[#allocation7] sm:$0xf] }
  0x3f   :  { %597 = vmatpush.bf16.msrb.mxu0 %v2957_v9  ;;  %v2893_v6 = vor.u32 %v3873_v2, %v2892_v1  ;;  %v3874_v9 = vld [vmem:[#allocation7 + $0x14] sm:$0xf0]  ;;  %v3135_v1 = vld [vmem:[#allocation7 + $0xe0] sm:$0xf]  ;;  %v3933_v2 = vld [vmem:[#allocation7 + $0xec] sm:$0xf0] }
  0x40   :  { %610 = vmatpush.bf16.msrb.mxu1 %v2961_v13  ;;  %636 = vmatpush.bf16.msrb.mxu3 %v2969_v17  ;;  %v2901_v12 = vor.u32 %v3874_v9, %v2900_v8  ;;  %v3872_v13 = vld [vmem:[#allocation7 + $0xc] sm:$0xf] }
  0x42   :  { %623 = vmatpush.bf16.msrb.mxu2 %v2965_v14  ;;  %v2902_v14 = vld [vmem:[#allocation7 + $0x18] sm:$0xf0] }
  0x43   :  { %598 = vmatpush.bf16.msrb.mxu0 %v2941_v23  ;;  %v2905_v16 = vor.u32 %v3872_v13, %v2902_v14  ;;  %v3119_v13 = vld [vmem:[#allocation7 + $0xc0] sm:$0xf]  ;;  %v3929_v14 = vld [vmem:[#allocation7 + $0xcc] sm:$0xf0] }
  0x44   :  { %611 = vmatpush.bf16.msrb.mxu1 %v2945_v27  ;;  %637 = vmatpush.bf16.msrb.mxu3 %v2953_v33 }
  0x46   :  { %624 = vmatpush.bf16.msrb.mxu2 %v2949_v28 }
  0x47   :  { %599 = vmatpush.bf16.msrb.mxu0 %v2925_v40 }
  0x48   :  { %612 = vmatpush.bf16.msrb.mxu1 %v2929_v45  ;;  %638 = vmatpush.bf16.msrb.mxu3 %v2937_v51 }
  0x4a   :  { %625 = vmatpush.bf16.msrb.mxu2 %v2933_v46 }
  0x4b   :  { %600 = vmatpush.bf16.msrb.mxu0 %v2909_v54 }
  0x4c   :  { %613 = vmatpush.bf16.msrb.mxu1 %v2913_v58  ;;  %639 = vmatpush.bf16.msrb.mxu3 %v2921_v0 }
  0x4e   :  { %626 = vmatpush.bf16.msrb.mxu2 %v2917_v63 }
  0x4f   :  { %601 = vmatpush.bf16.msrb.mxu0 %v2893_v6  ;;  %v3143_v6 = vld [vmem:[#allocation7 + $0xe8] sm:$0xf] }
  0x50   :  { %614 = vmatpush.bf16.msrb.mxu1 %v2897_v11  ;;  %640 = vmatpush.bf16.msrb.mxu3 %v2905_v16  ;;  %v3144_v9 = vor.u32 %v3934_v7, %v3143_v6  ;;  %v3145_v11 = vld [vmem:[#allocation7 + $0xf8] sm:$0xf0]  ;;  %v3120_v16 = vor.u32 %v3929_v14, %v3119_v13  ;;  %v3055_v6 = vld [vmem:[#allocation7 + $0x40] sm:$0xf]  ;;  %v3913_v7 = vld [vmem:[#allocation7 + $0x4c] sm:$0xf0] }
  0x52   :  { %627 = vmatpush.bf16.msrb.mxu2 %v2901_v12 }
  0x56   :  { %943 = vmatpush.bf16.msra.mxu2 %v3144_v9  ;;  %v3056_v9 = vor.u32 %v3913_v7, %v3055_v6 }
  0xae   :  { %v280_v31 = vpop.f32.mrf.mxu0 }
  0xaf   :  { %v323_v34 = vadd.f32 %v280_v31, %v75_v18  ;;  %v293_v35 = vpop.f32.mrf.mxu1 }
  0xb0   :  { %v324_v39 = vadd.f32 %v293_v35, %v76_v22  ;;  %v77_v22 = vunpack.c.l.bf16 %v4386_v32 }
  0xb1   :  { %v2887_v44 = vmul.f32 -1.442695, %v323_v34 }
  0xb2   :  { %v2888_v49 = vmul.f32 -1.442695, %v324_v39 }
  0xb3   :  { %4113 = vpow2.f32 %v2887_v44 }
  0xb4   :  { %4115 = vpow2.f32 %v2888_v49 }
  0xb6   :  { %v319_v62 = vpop.f32.mrf.mxu3  ;;  %v282_v5 = vpop.f32.mrf.mxu0 }
  0xb7   :  { %v326_v4 = vadd.f32 %v319_v62, %v78_v50  ;;  %v295_v10 = vpop.f32.mrf.mxu1  ;;  %v3137_v5 = vld [vmem:[#allocation7 + $0xf0] sm:$0xf0] }
  0xb8   :  { %v306_v18 = vpop.f32.mrf.mxu2  ;;  %v3140_v8 = vor.u32 %v3931_v3, %v3137_v5  ;;  %v3932_v10 = vld [vmem:[#allocation7 + $0xec] sm:$0xf] }
  0xb9   :  { %v2889_v15 = vmul.f32 -1.442695, %v326_v4  ;;  %v4114_v17 = vpop.eup %4113  ;;  %v325_v25 = vadd.f32 %v306_v18, %v77_v22  ;;  %v3136_v4 = vor.u32 %v3933_v2, %v3135_v1  ;;  %v3148_v12 = vor.u32 %v3932_v10, %v3145_v11  ;;  %v3127_v18 = vld [vmem:[#allocation7 + $0xc8] sm:$0xf]  ;;  %v3928_v22 = vld [vmem:[#allocation7 + $0xcc] sm:$0xf] }
  0xba   :  { %v4116_v19 = vpop.eup %4115  ;;  %v330_v20 = vadd.f32 1.0, %v4114_v17  ;;  %930 = vmatpush.bf16.msra.mxu1 %v3140_v8  ;;  %v3121_v17 = vld [vmem:[#allocation7 + $0xd0] sm:$0xf0]  ;;  %v4393_v2 = vld [vmem:[#allocation4 + $0x18] sm:$0xff]  ;;  %v3911_v8 = vld [vmem:[#allocation7 + $0x44] sm:$0xf] }
  0xbb   :  { %4117 = vpow2.f32 %v2889_v15  ;;  %v349_v21 = vadd.f32 1.0, %v4116_v19  ;;  %917 = vmatpush.bf16.msra.mxu0 %v3136_v4  ;;  %v3927_v15 = vld [vmem:[#allocation7 + $0xc4] sm:$0xf]  ;;  %956 = vmatpush.bf16.msra.mxu3 %v3148_v12  ;;  %v3930_v19 = vld [vmem:[#allocation7 + $0xd4] sm:$0xf0] }
  0xbc   :  { %4119 = vrcp.f32 %v330_v20  ;;  %v342_v35 = vand.u32 2147483648, %v330_v20  ;;  %v340_v32 = vand.u32 2147483647, %v330_v20  ;;  %vm336_vm2 = vweird.f32 %v330_v20  ;;  %v3057_v10 = vld [vmem:[#allocation7 + $0x50] sm:$0xf0] }
  0xbd   :  { %4121 = vrcp.f32 %v349_v21  ;;  %v361_v36 = vand.u32 2147483648, %v349_v21  ;;  %v359_v39 = vand.u32 2147483647, %v349_v21  ;;  %vm355_vm3 = vweird.f32 %v349_v21  ;;  %v3063_v11 = vld [vmem:[#allocation7 + $0x48] sm:$0xf] }
  0xbe   :  { %v321_v23 = vpop.f32.mrf.mxu3  ;;  %v343_v44 = vor.u32 1.1754944e-38, %v342_v35  ;;  %vm341_vm5 = vcmp.eq.f32.partialorder %v340_v32, 8.507059e+37  ;;  %v3924_v35 = vld [vmem:[#allocation7 + $0xac] sm:$0xf]  ;;  %v3914_v12 = vld [vmem:[#allocation7 + $0x54] sm:$0xf0] }
  0xbf   :  { %v362_v46 = vor.u32 1.1754944e-38, %v361_v36  ;;  %vm360_vm7 = vcmp.eq.f32.partialorder %v359_v39, 8.507059e+37  ;;  %v3129_v23 = vld [vmem:[#allocation7 + $0xd8] sm:$0xf0]  ;;  %918 = vmatpush.bf16.msra.mxu0 %v3120_v16  ;;  %v3921_v39 = vld [vmem:[#allocation7 + $0x8c] sm:$0xf0]  ;;  %v3064_v16 = vor.u32 %v3914_v12, %v3063_v11 }
  0xc0   :  { %v308_v27 = vpop.f32.mrf.mxu2  ;;  %v3113_v36 = vld [vmem:[#allocation7 + $0xb8] sm:$0xf0] }
  0xc1   :  { %v4118_v24 = vpop.eup %4117  ;;  %v3923_v27 = vld [vmem:[#allocation7 + $0xa4] sm:$0xf]  ;;  %v3116_v32 = vor.u32 %v3924_v35, %v3113_v36  ;;  %v3023_v36 = vld [vmem:[#allocation7] sm:$0xf] }
  0xc2   :  { %v369_v26 = vadd.f32 1.0, %v4118_v24  ;;  %v4120_v28 = vpop.eup %4119  ;;  %v3132_v24 = vor.u32 %v3928_v22, %v3129_v23 }
  0xc3   :  { %v4122_v29 = vpop.eup %4121  ;;  %v332_v30 = vmul.f32 %v4120_v28, %v330_v20  ;;  %vm337_vm0 = vweird.f32 %v4120_v28  ;;  %v3124_v20 = vor.u32 %v3927_v15, %v3121_v17  ;;  %v3060_v15 = vor.u32 %v3911_v8, %v3057_v10  ;;  %v3912_v17 = vld [vmem:[#allocation7 + $0x4c] sm:$0xf] }
  0xc4   :  { %4123 = vrcp.f32 %v369_v26  ;;  %v351_v31 = vmul.f32 %v4122_v29, %v349_v21  ;;  %vm356_vm1 = vweird.f32 %v4122_v29  ;;  %vm338_vm4 = vmor %vm336_vm2, %vm337_vm0  ;;  %v381_v57 = vand.u32 2147483648, %v369_v26  ;;  %957 = vmatpush.bf16.msra.mxu3 %v3132_v24  ;;  %v3907_v24 = vld [vmem:[#allocation7 + $0x24] sm:$0xf] }
  0xc5   :  { %4125 = vtanh.f32 %v325_v25  ;;  %v333_v33 = vsub.f32 1.0, %v332_v30  ;;  %vm357_vm6 = vmor %vm355_vm3, %vm356_vm1  ;;  %vm375_vm9 = vweird.f32 %v369_v26  ;;  %v379_v58 = vand.u32 2147483647, %v369_v26  ;;  %931 = vmatpush.bf16.msra.mxu1 %v3124_v20  ;;  %v3103_v25 = vld [vmem:[#allocation7 + $0xa0] sm:$0xf] }
  0xc6   :  { %v352_v34 = vsub.f32 1.0, %v351_v31  ;;  %v382_v60 = vor.u32 1.1754944e-38, %v381_v57  ;;  %v3128_v21 = vor.u32 %v3930_v19, %v3127_v18  ;;  %v3111_v30 = vld [vmem:[#allocation7 + $0xa8] sm:$0xf]  ;;  %v3926_v31 = vld [vmem:[#allocation7 + $0xb4] sm:$0xf0]  ;;  %v401_v18 = vunpack.c.h.bf16 %v4393_v2 }
  0xc7   :  { %v334_v37 = vmul.f32 %v4120_v28, %v333_v33  ;;  %vm380_vm11 = vcmp.eq.f32.partialorder %v379_v58, 8.507059e+37  ;;  %v3073_v57 = vld [vmem:[#allocation7 + $0x70] sm:$0xf0]  ;;  %v3079_v58 = vld [vmem:[#allocation7 + $0x68] sm:$0xf] }
  0xc8   :  { %v353_v38 = vmul.f32 %v4122_v29, %v352_v34  ;;  %944 = vmatpush.bf16.msra.mxu2 %v3128_v21  ;;  %v3112_v34 = vor.u32 %v3926_v31, %v3111_v30  ;;  %958 = vmatpush.bf16.msra.mxu3 %v3116_v32  ;;  %v3065_v19 = vld [vmem:[#allocation7 + $0x58] sm:$0xf0]  ;;  %v3039_v20 = vld [vmem:[#allocation7 + $0x20] sm:$0xf]  ;;  %v3909_v21 = vld [vmem:[#allocation7 + $0x2c] sm:$0xf0] }
  0xc9   :  { %v335_v41 = vadd.f32 %v4120_v28, %v334_v37  ;;  %v396_v37 = vld [vmem:[#allocation4 + $0x10] sm:$0xff]  ;;  %v3068_v22 = vor.u32 %v3912_v17, %v3065_v19  ;;  %v3040_v23 = vor.u32 %v3909_v21, %v3039_v20  ;;  %v3049_v30 = vld [vmem:[#allocation7 + $0x38] sm:$0xf0]  ;;  %v3903_v32 = vld [vmem:[#allocation7 + $0x4] sm:$0xf] }
  0xca   :  { %v4124_v40 = vpop.eup %4123  ;;  %v354_v45 = vadd.f32 %v4122_v29, %v353_v38  ;;  %v3087_v38 = vld [vmem:[#allocation7 + $0x80] sm:$0xf] }
  0xcb   :  { %v4126_v42 = vpop.eup %4125  ;;  %v371_v43 = vmul.f32 %v4124_v40, %v369_v26  ;;  %v339_v47 = vsel %vm338_vm4, %v4120_v28, %v335_v41  ;;  %vm376_vm8 = vweird.f32 %v4124_v40  ;;  %v3925_v26 = vld [vmem:[#allocation7 + $0xac] sm:$0xf0]  ;;  %v3088_v41 = vor.u32 %v3921_v39, %v3087_v38 }
  0xcc   :  { %v344_v49 = vsel %vm341_vm5, %v343_v44, %v339_v47  ;;  %v358_v50 = vsel %vm357_vm6, %v4122_v29, %v354_v45  ;;  %vm377_vm10 = vmor %vm375_vm9, %vm376_vm8  ;;  %v3104_v28 = vor.u32 %v3925_v26, %v3103_v25  ;;  %v3105_v29 = vld [vmem:[#allocation7 + $0xb0] sm:$0xf0]  ;;  %945 = vmatpush.bf16.msra.mxu2 %v3112_v34  ;;  %v3922_v44 = vld [vmem:[#allocation7 + $0x94] sm:$0xf0] }
  0xcd   :  { %v372_v48 = vsub.f32 1.0, %v371_v43  ;;  %v363_v51 = vsel %vm360_vm7, %v362_v46, %v358_v50  ;;  %v387_v52 = vmul.f32 %v4126_v42, %v344_v49  ;;  %v3108_v33 = vor.u32 %v3923_v27, %v3105_v29  ;;  %v3089_v42 = vld [vmem:[#allocation7 + $0x90] sm:$0xf0]  ;;  %v3095_v43 = vld [vmem:[#allocation7 + $0x88] sm:$0xf] }
  0xce   :  { %v386_v53 = vmul.f32 0.0, %v363_v51  ;;  %919 = vmatpush.bf16.msra.mxu0 %v3104_v28  ;;  %v3096_v46 = vor.u32 %v3922_v44, %v3095_v43  ;;  %v3920_v47 = vld [vmem:[#allocation7 + $0x8c] sm:$0xf]  ;;  %v398_v50 = vunpack.c.l.bf16 %v396_v37  ;;  %v399_v51 = vunpack.c.h.bf16 %v396_v37  ;;  %v3041_v25 = vld [vmem:[#allocation7 + $0x30] sm:$0xf0] }
  0xcf   :  { %v373_v54 = vmul.f32 %v4124_v40, %v372_v48  ;;  %932 = vmatpush.bf16.msra.mxu1 %v3108_v33  ;;  %v3097_v48 = vld [vmem:[#allocation7 + $0x98] sm:$0xf0]  ;;  %v3047_v26 = vld [vmem:[#allocation7 + $0x28] sm:$0xf]  ;;  %v3044_v27 = vor.u32 %v3907_v24, %v3041_v25  ;;  %v3910_v28 = vld [vmem:[#allocation7 + $0x34] sm:$0xf0] }
  0xd0   :  { %v4390_v55 = vadd.f32 %v387_v52, %v386_v53  ;;  %v3100_v49 = vor.u32 %v3920_v47, %v3097_v48  ;;  %946 = vmatpush.bf16.msra.mxu2 %v3096_v46  ;;  %v3071_v52 = vld [vmem:[#allocation7 + $0x60] sm:$0xf]  ;;  %v3917_v53 = vld [vmem:[#allocation7 + $0x6c] sm:$0xf0]  ;;  %v3908_v29 = vld [vmem:[#allocation7 + $0x2c] sm:$0xf]  ;;  %v3048_v34 = vor.u32 %v3910_v28, %v3047_v26 }
  0xd1   :  { %v374_v56 = vadd.f32 %v4124_v40, %v373_v54  ;;  %v3915_v54 = vld [vmem:[#allocation7 + $0x64] sm:$0xf]  ;;  %v3052_v35 = vor.u32 %v3908_v29, %v3049_v30  ;;  %v3905_v37 = vld [vmem:[#allocation7 + $0xc] sm:$0xf0]  ;;  %v3031_v43 = vld [vmem:[#allocation7 + $0x8] sm:$0xf] }
  0xd2   :  { %4127 = vtanh.f32 %v4390_v55  ;;  %920 = vmatpush.bf16.msra.mxu0 %v3088_v41  ;;  %959 = vmatpush.bf16.msra.mxu3 %v3100_v49  ;;  %v3024_v41 = vor.u32 %v3905_v37, %v3023_v36  ;;  %v3906_v44 = vld [vmem:[#allocation7 + $0x14] sm:$0xf0]  ;;  %v3904_v47 = vld [vmem:[#allocation7 + $0xc] sm:$0xf]  ;;  %v3033_v48 = vld [vmem:[#allocation7 + $0x18] sm:$0xf0] }
  0xd3   :  { %v378_v59 = vsel %vm377_vm10, %v4124_v40, %v374_v56  ;;  %v3919_v40 = vld [vmem:[#allocation7 + $0x84] sm:$0xf]  ;;  %v3072_v56 = vor.u32 %v3917_v53, %v3071_v52  ;;  %v3032_v46 = vor.u32 %v3906_v44, %v3031_v43  ;;  %v3965_v36 = vld [vmem:[#allocation7 + $0xec] sm:$0xf0]  ;;  %v3964_v43 = vld [vmem:[#allocation7 + $0xec] sm:$0xf] }
  0xd4   :  { %v383_v62 = vsel %vm380_vm11, %v382_v60, %v378_v59  ;;  %v3092_v45 = vor.u32 %v3919_v40, %v3089_v42  ;;  %v3918_v59 = vld [vmem:[#allocation7 + $0x74] sm:$0xf0]  ;;  %v3076_v60 = vor.u32 %v3915_v54, %v3073_v57  ;;  %v3025_v42 = vld [vmem:[#allocation7 + $0x10] sm:$0xf0]  ;;  %v3963_v37 = vld [vmem:[#allocation7 + $0xe4] sm:$0xf] }
  0xd5   :  { %v3276_v44 = vld [vmem:[#allocation7 + $0xf8] sm:$0xf0] }
  0xd6   :  { %933 = vmatpush.bf16.msra.mxu1 %v3092_v45  ;;  %921 = vmatpush.bf16.msra.mxu0 %v3072_v56  ;;  %v3028_v45 = vor.u32 %v3903_v32, %v3025_v42 }
  0xd8   :  { %v4128_v61 = vpop.eup %4127 }
  0xd9   :  { %v390_v63 = vmul.f32 %v4128_v61, %v383_v62  ;;  %v3080_v61 = vor.u32 %v3918_v59, %v3079_v58  ;;  %v3916_v62 = vld [vmem:[#allocation7 + $0x6c] sm:$0xf]  ;;  %v400_v58 = vunpack.c.l.bf16 %v4393_v2 }
  0xda   :  { %934 = vmatpush.bf16.msra.mxu1 %v3076_v60  ;;  %922 = vmatpush.bf16.msra.mxu0 %v3056_v9 }
  0xdb   :  { %v394_v0 = vpack.c.bf16 %v390_v63, %v390_v63  ;;  %v3081_v63 = vld [vmem:[#allocation7 + $0x78] sm:$0xf0]  ;;  %947 = vmatpush.bf16.msra.mxu2 %v3080_v61 }
  0xdc   :  { %v3084_v3 = vor.u32 %v3916_v62, %v3081_v63 }
  0xdd   :  { %602 = vmatmul.bf16.vlgmr.msrb.gmra.mxu0 %v394_v0  ;;  %615 = vmatmul.bf16.vlgmr.msrb.gmra.mxu1 %v394_v0 }
  0xde   :  { %628 = vmatmul.bf16.vlgmr.msrb.gmra.mxu2 %v394_v0  ;;  %641 = vmatmul.bf16.vlgmr.msrb.gmra.mxu3 %v394_v0 }
  0xdf   :  { %960 = vmatpush.bf16.msra.mxu3 %v3084_v3  ;;  %935 = vmatpush.bf16.msra.mxu1 %v3060_v15 }
  0xe0   :  { %948 = vmatpush.bf16.msra.mxu2 %v3064_v16  ;;  %923 = vmatpush.bf16.msra.mxu0 %v3040_v23 }
  0xe3   :  { %961 = vmatpush.bf16.msra.mxu3 %v3068_v22  ;;  %936 = vmatpush.bf16.msra.mxu1 %v3044_v27 }
  0xe4   :  { %949 = vmatpush.bf16.msra.mxu2 %v3048_v34  ;;  %924 = vmatpush.bf16.msra.mxu0 %v3024_v41 }
  0xe7   :  { %962 = vmatpush.bf16.msra.mxu3 %v3052_v35  ;;  %937 = vmatpush.bf16.msra.mxu1 %v3028_v45  ;;  %v3279_v45 = vor.u32 %v3964_v43, %v3276_v44  ;;  %v3188_v43 = vld [vmem:[#allocation7 + $0x50] sm:$0xf0]  ;;  %v3194_v44 = vld [vmem:[#allocation7 + $0x48] sm:$0xf] }
  0xe8   :  { %950 = vmatpush.bf16.msra.mxu2 %v3032_v46  ;;  %v3250_v46 = vld [vmem:[#allocation7 + $0xc0] sm:$0xf] }
 0x15a   :  { %v603_v0 = vpop.f32.mrf.mxu0  ;;  %v616_v1 = vpop.f32.mrf.mxu1 }
 0x15b   :  { %v646_v4 = vadd.f32 %v603_v0, %v398_v50  ;;  %v647_v5 = vadd.f32 %v616_v1, %v399_v51  ;;  %v3036_v51 = vor.u32 %v3904_v47, %v3033_v48  ;;  %v3961_v47 = vld [vmem:[#allocation7 + $0xcc] sm:$0xf0]  ;;  %v3959_v48 = vld [vmem:[#allocation7 + $0xc4] sm:$0xf] }
 0x15d   :  { %v3018_v13 = vmul.f32 -1.442695, %v646_v4  ;;  %v3019_v14 = vmul.f32 -1.442695, %v647_v5  ;;  %963 = vmatpush.bf16.msra.mxu3 %v3036_v51  ;;  %v3258_v51 = vld [vmem:[#allocation7 + $0xc8] sm:$0xf] }
 0x15f   :  { %4129 = vpow2.f32 %v3018_v13 }
 0x160   :  { %4131 = vpow2.f32 %v3019_v14 }
 0x161   :  { %v629_v31 = vpop.f32.mrf.mxu2  ;;  %v642_v33 = vpop.f32.mrf.mxu3  ;;  %1279 = vmatpush.bf16.msrb.mxu3 %v3279_v45  ;;  %v3946_v45 = vld [vmem:[#allocation7 + $0x54] sm:$0xf0] }
 0x162   :  { %v649_v38 = vadd.f32 %v642_v33, %v401_v18  ;;  %v605_v39 = vpop.f32.mrf.mxu0  ;;  %v618_v40 = vpop.f32.mrf.mxu1  ;;  %v648_v62 = vadd.f32 %v629_v31, %v400_v58 }
 0x163   :  { %v3274_v39 = vld [vmem:[#allocation7 + $0xe8] sm:$0xf]  ;;  %v3966_v40 = vld [vmem:[#allocation7 + $0xf4] sm:$0xf0] }
 0x164   :  { %v3020_v49 = vmul.f32 -1.442695, %v649_v38  ;;  %v3268_v38 = vld [vmem:[#allocation7 + $0xf0] sm:$0xf0]  ;;  %v3275_v42 = vor.u32 %v3966_v40, %v3274_v39  ;;  %v3186_v39 = vld [vmem:[#allocation7 + $0x40] sm:$0xf] }
 0x165   :  { %v4130_v50 = vpop.eup %4129  ;;  %v3271_v41 = vor.u32 %v3963_v37, %v3268_v38  ;;  %v3945_v40 = vld [vmem:[#allocation7 + $0x4c] sm:$0xf0] }
 0x166   :  { %v4132_v52 = vpop.eup %4131  ;;  %v653_v53 = vadd.f32 1.0, %v4130_v50  ;;  %4133 = vpow2.f32 %v3020_v49  ;;  %1266 = vmatpush.bf16.msrb.mxu2 %v3275_v42  ;;  %v3251_v49 = vor.u32 %v3961_v47, %v3250_v46  ;;  %v3252_v50 = vld [vmem:[#allocation7 + $0xd0] sm:$0xf0]  ;;  %v3187_v42 = vor.u32 %v3945_v40, %v3186_v39 }
 0x167   :  { %v672_v54 = vadd.f32 1.0, %v4132_v52  ;;  %1253 = vmatpush.bf16.msrb.mxu1 %v3271_v41  ;;  %v3962_v52 = vld [vmem:[#allocation7 + $0xd4] sm:$0xf0]  ;;  %v3943_v41 = vld [vmem:[#allocation7 + $0x44] sm:$0xf] }
 0x168   :  { %4135 = vrcp.f32 %v653_v53  ;;  %v665_v5 = vand.u32 2147483648, %v653_v53  ;;  %v663_v8 = vand.u32 2147483647, %v653_v53  ;;  %vm659_vm14 = vweird.f32 %v653_v53 }
 0x169   :  { %4137 = vrcp.f32 %v672_v54  ;;  %v631_v56 = vpop.f32.mrf.mxu2  ;;  %v644_v57 = vpop.f32.mrf.mxu3  ;;  %v684_v6 = vand.u32 2147483648, %v672_v54  ;;  %v682_v10 = vand.u32 2147483647, %v672_v54  ;;  %vm678_vm15 = vweird.f32 %v672_v54 }
 0x16a   :  { %v666_v12 = vor.u32 1.1754944e-38, %v665_v5  ;;  %vm664_vm2 = vcmp.eq.f32.partialorder %v663_v8, 8.507059e+37  ;;  %v3960_v56 = vld [vmem:[#allocation7 + $0xcc] sm:$0xf]  ;;  %v3260_v57 = vld [vmem:[#allocation7 + $0xd8] sm:$0xf0] }
 0x16b   :  { %v685_v15 = vor.u32 1.1754944e-38, %v684_v6  ;;  %vm683_vm3 = vcmp.eq.f32.partialorder %v682_v10, 8.507059e+37  ;;  %v3263_v58 = vor.u32 %v3960_v56, %v3260_v57  ;;  %v3956_v5 = vld [vmem:[#allocation7 + $0xac] sm:$0xf]  ;;  %v3244_v6 = vld [vmem:[#allocation7 + $0xb8] sm:$0xf0] }
 0x16c   :  { %v4134_v59 = vpop.eup %4133  ;;  %v3247_v8 = vor.u32 %v3956_v5, %v3244_v6  ;;  %v3953_v10 = vld [vmem:[#allocation7 + $0x8c] sm:$0xf0]  ;;  %v3154_v6 = vld [vmem:[#allocation7] sm:$0xf] }
 0x16d   :  { %v692_v60 = vadd.f32 1.0, %v4134_v59  ;;  %v3234_v59 = vld [vmem:[#allocation7 + $0xa0] sm:$0xf]  ;;  %1280 = vmatpush.bf16.msrb.mxu3 %v3263_v58  ;;  %v3939_v58 = vld [vmem:[#allocation7 + $0x24] sm:$0xf] }
 0x16e   :  { %v4136_v61 = vpop.eup %4135 }
 0x16f   :  { %v4138_v63 = vpop.eup %4137  ;;  %v655_v0 = vmul.f32 %v4136_v61, %v653_v53  ;;  %4139 = vrcp.f32 %v692_v60  ;;  %vm660_vm12 = vweird.f32 %v4136_v61  ;;  %v704_v27 = vand.u32 2147483648, %v692_v60 }
 0x170   :  { %v674_v1 = vmul.f32 %v4138_v63, %v672_v54  ;;  %4141 = vtanh.f32 %v648_v62  ;;  %vm679_vm13 = vweird.f32 %v4138_v63  ;;  %vm661_vm0 = vmor %vm659_vm14, %vm660_vm12  ;;  %vm698_vm5 = vweird.f32 %v692_v60 }
 0x171   :  { %v656_v3 = vsub.f32 1.0, %v655_v0  ;;  %vm680_vm1 = vmor %vm678_vm15, %vm679_vm13  ;;  %v702_v28 = vand.u32 2147483647, %v692_v60  ;;  %v705_v30 = vor.u32 1.1754944e-38, %v704_v27  ;;  %v3255_v53 = vor.u32 %v3959_v48, %v3252_v50  ;;  %v3242_v0 = vld [vmem:[#allocation7 + $0xa8] sm:$0xf]  ;;  %1281 = vmatpush.bf16.msrb.mxu3 %v3247_v8 }
 0x172   :  { %v675_v4 = vsub.f32 1.0, %v674_v1  ;;  %v3259_v54 = vor.u32 %v3962_v52, %v3258_v51  ;;  %v3958_v1 = vld [vmem:[#allocation7 + $0xb4] sm:$0xf0]  ;;  %v3204_v27 = vld [vmem:[#allocation7 + $0x70] sm:$0xf0]  ;;  %v3191_v48 = vor.u32 %v3943_v41, %v3188_v43 }
 0x173   :  { %v657_v7 = vmul.f32 %v4136_v61, %v656_v3  ;;  %vm703_vm7 = vcmp.eq.f32.partialorder %v702_v28, 8.507059e+37  ;;  %1254 = vmatpush.bf16.msrb.mxu1 %v3255_v53  ;;  %v3210_v28 = vld [vmem:[#allocation7 + $0x68] sm:$0xf]  ;;  %v3944_v50 = vld [vmem:[#allocation7 + $0x4c] sm:$0xf] }
 0x174   :  { %v676_v9 = vmul.f32 %v4138_v63, %v675_v4  ;;  %1267 = vmatpush.bf16.msrb.mxu2 %v3259_v54  ;;  %v3243_v4 = vor.u32 %v3958_v1, %v3242_v0  ;;  %v3196_v52 = vld [vmem:[#allocation7 + $0x58] sm:$0xf0]  ;;  %v3170_v53 = vld [vmem:[#allocation7 + $0x20] sm:$0xf]  ;;  %v3941_v54 = vld [vmem:[#allocation7 + $0x2c] sm:$0xf0] }
 0x175   :  { %v4140_v2 = vpop.eup %4139  ;;  %v658_v11 = vadd.f32 %v4136_v61, %v657_v7  ;;  %v719_v7 = vld [vmem:[#allocation4 + $0x20] sm:$0xff]  ;;  %v3199_v56 = vor.u32 %v3944_v50, %v3196_v52  ;;  %v3171_v57 = vor.u32 %v3941_v54, %v3170_v53  ;;  %v3180_v0 = vld [vmem:[#allocation7 + $0x38] sm:$0xf0] }
 0x176   :  { %v677_v13 = vadd.f32 %v4138_v63, %v676_v9  ;;  %v694_v14 = vmul.f32 %v4140_v2, %v692_v60  ;;  %v4142_v17 = vpop.eup %4141  ;;  %vm699_vm4 = vweird.f32 %v4140_v2  ;;  %v3957_v60 = vld [vmem:[#allocation7 + $0xac] sm:$0xf0]  ;;  %v3218_v9 = vld [vmem:[#allocation7 + $0x80] sm:$0xf]  ;;  %v3935_v8 = vld [vmem:[#allocation7 + $0x4] sm:$0xf] }
 0x177   :  { %v662_v16 = vsel %vm661_vm0, %v4136_v61, %v658_v11  ;;  %vm700_vm6 = vmor %vm698_vm5, %vm699_vm4  ;;  %v3955_v61 = vld [vmem:[#allocation7 + $0xa4] sm:$0xf]  ;;  %v3235_v62 = vor.u32 %v3957_v60, %v3234_v59  ;;  %v3219_v11 = vor.u32 %v3953_v10, %v3218_v9  ;;  %v3172_v59 = vld [vmem:[#allocation7 + $0x30] sm:$0xf0] }
 0x178   :  { %v667_v18 = vsel %vm664_vm2, %v666_v12, %v662_v16  ;;  %v681_v19 = vsel %vm680_vm1, %v4138_v63, %v677_v13  ;;  %v695_v20 = vsub.f32 1.0, %v694_v14  ;;  %v3236_v63 = vld [vmem:[#allocation7 + $0xb0] sm:$0xf0]  ;;  %1268 = vmatpush.bf16.msrb.mxu2 %v3243_v4  ;;  %v3226_v13 = vld [vmem:[#allocation7 + $0x88] sm:$0xf] }
 0x179   :  { %v686_v21 = vsel %vm683_vm3, %v685_v15, %v681_v19  ;;  %v710_v22 = vmul.f32 %v4142_v17, %v667_v18  ;;  %v3239_v3 = vor.u32 %v3955_v61, %v3236_v63  ;;  %v3220_v12 = vld [vmem:[#allocation7 + $0x90] sm:$0xf0]  ;;  %v3954_v14 = vld [vmem:[#allocation7 + $0x94] sm:$0xf0]  ;;  %v3952_v17 = vld [vmem:[#allocation7 + $0x8c] sm:$0xf]  ;;  %v3175_v61 = vor.u32 %v3939_v58, %v3172_v59 }
 0x17a   :  { %v709_v23 = vmul.f32 %v686_v21, %v4390_v55  ;;  %v696_v24 = vmul.f32 %v4140_v2, %v695_v20  ;;  %v3266_v55 = vld [vmem:[#allocation7 + $0xe0] sm:$0xf]  ;;  %v3227_v16 = vor.u32 %v3954_v14, %v3226_v13  ;;  %v3228_v18 = vld [vmem:[#allocation7 + $0x98] sm:$0xf0]  ;;  %v721_v20 = vunpack.c.l.bf16 %v719_v7  ;;  %v3178_v60 = vld [vmem:[#allocation7 + $0x28] sm:$0xf] }
 0x17b   :  { %v3267_v32 = vor.u32 %v3965_v36, %v3266_v55  ;;  %1255 = vmatpush.bf16.msrb.mxu1 %v3239_v3  ;;  %v3231_v19 = vor.u32 %v3952_v17, %v3228_v18  ;;  %v722_v21 = vunpack.c.h.bf16 %v719_v7  ;;  %v4401_v36 = vld [vmem:[#allocation4 + $0x28] sm:$0xff]  ;;  %v3937_v7 = vld [vmem:[#allocation7 + $0xc] sm:$0xf0]  ;;  %v3938_v14 = vld [vmem:[#allocation7 + $0x14] sm:$0xf0] }
 0x17c   :  { %v4398_v25 = vadd.f32 %v710_v22, %v709_v23  ;;  %v697_v26 = vadd.f32 %v4140_v2, %v696_v24  ;;  %1269 = vmatpush.bf16.msrb.mxu2 %v3227_v16  ;;  %v3202_v22 = vld [vmem:[#allocation7 + $0x60] sm:$0xf]  ;;  %v3949_v23 = vld [vmem:[#allocation7 + $0x6c] sm:$0xf0]  ;;  %v3947_v24 = vld [vmem:[#allocation7 + $0x64] sm:$0xf]  ;;  %v724_v51 = vunpack.c.h.bf16 %v4401_v36 }
 0x17d   :  { %1240 = vmatpush.bf16.msrb.mxu0 %v3267_v32  ;;  %1282 = vmatpush.bf16.msrb.mxu3 %v3231_v19  ;;  %v3940_v63 = vld [vmem:[#allocation7 + $0x2c] sm:$0xf]  ;;  %v3162_v13 = vld [vmem:[#allocation7 + $0x8] sm:$0xf]  ;;  %v3164_v18 = vld [vmem:[#allocation7 + $0x18] sm:$0xf0] }
 0x17e   :  { %4143 = vtanh.f32 %v4398_v25  ;;  %v701_v29 = vsel %vm700_vm6, %v4140_v2, %v697_v26  ;;  %v3951_v2 = vld [vmem:[#allocation7 + $0x84] sm:$0xf]  ;;  %v3203_v26 = vor.u32 %v3949_v23, %v3202_v22  ;;  %v3183_v5 = vor.u32 %v3940_v63, %v3180_v0  ;;  %v3936_v17 = vld [vmem:[#allocation7 + $0xc] sm:$0xf] }
 0x17f   :  { %v706_v33 = vsel %vm703_vm7, %v705_v30, %v701_v29  ;;  %v3223_v15 = vor.u32 %v3951_v2, %v3220_v12  ;;  %v3950_v29 = vld [vmem:[#allocation7 + $0x74] sm:$0xf0]  ;;  %v3207_v30 = vor.u32 %v3947_v24, %v3204_v27  ;;  %v3156_v12 = vld [vmem:[#allocation7 + $0x10] sm:$0xf0]  ;;  %v3163_v16 = vor.u32 %v3938_v14, %v3162_v13  ;;  %v3996_v13 = vld [vmem:[#allocation7 + $0xec] sm:$0xf] }
 0x180   :  { %v3407_v14 = vld [vmem:[#allocation7 + $0xf8] sm:$0xf0] }
 0x181   :  { %1241 = vmatpush.bf16.msrb.mxu0 %v3251_v49  ;;  %1256 = vmatpush.bf16.msrb.mxu1 %v3223_v15  ;;  %v3195_v49 = vor.u32 %v3946_v45, %v3194_v44  ;;  %v3159_v15 = vor.u32 %v3935_v8, %v3156_v12 }
 0x184   :  { %v4144_v31 = vpop.eup %4143 }
 0x185   :  { %v713_v34 = vmul.f32 %v4144_v31, %v706_v33  ;;  %1242 = vmatpush.bf16.msrb.mxu0 %v3235_v62  ;;  %v3211_v31 = vor.u32 %v3950_v29, %v3210_v28  ;;  %v3948_v33 = vld [vmem:[#allocation7 + $0x6c] sm:$0xf]  ;;  %1257 = vmatpush.bf16.msrb.mxu1 %v3207_v30  ;;  %v3942_v62 = vld [vmem:[#allocation7 + $0x34] sm:$0xf0]  ;;  %v723_v28 = vunpack.c.l.bf16 %v4401_v36 }
 0x186   :  { %v3179_v4 = vor.u32 %v3942_v62, %v3178_v60 }
 0x187   :  { %v717_v35 = vpack.c.bf16 %v713_v34, %v713_v34  ;;  %v3212_v34 = vld [vmem:[#allocation7 + $0x78] sm:$0xf0]  ;;  %1270 = vmatpush.bf16.msrb.mxu2 %v3211_v31 }
 0x188   :  { %v3215_v37 = vor.u32 %v3948_v33, %v3212_v34 }
 0x189   :  { %925 = vmatmul.bf16.vlgmr.msra.gmra.mxu0 %v717_v35  ;;  %938 = vmatmul.bf16.vlgmr.msra.gmra.mxu1 %v717_v35 }
 0x18a   :  { %951 = vmatmul.bf16.vlgmr.msra.gmra.mxu2 %v717_v35  ;;  %964 = vmatmul.bf16.vlgmr.msra.gmra.mxu3 %v717_v35 }
 0x18b   :  { %1243 = vmatpush.bf16.msrb.mxu0 %v3219_v11  ;;  %1283 = vmatpush.bf16.msrb.mxu3 %v3215_v37  ;;  %v3155_v11 = vor.u32 %v3937_v7, %v3154_v6  ;;  %v3997_v6 = vld [vmem:[#allocation7 + $0xec] sm:$0xf0]  ;;  %v3995_v7 = vld [vmem:[#allocation7 + $0xe4] sm:$0xf] }
 0x18c   :  { %1258 = vmatpush.bf16.msrb.mxu1 %v3191_v48  ;;  %1271 = vmatpush.bf16.msrb.mxu2 %v3195_v49 }
 0x18f   :  { %1244 = vmatpush.bf16.msrb.mxu0 %v3203_v26  ;;  %1284 = vmatpush.bf16.msrb.mxu3 %v3199_v56 }
 0x190   :  { %1259 = vmatpush.bf16.msrb.mxu1 %v3175_v61  ;;  %1272 = vmatpush.bf16.msrb.mxu2 %v3179_v4 }
 0x193   :  { %1245 = vmatpush.bf16.msrb.mxu0 %v3187_v42  ;;  %1285 = vmatpush.bf16.msrb.mxu3 %v3183_v5 }
 0x194   :  { %1260 = vmatpush.bf16.msrb.mxu1 %v3159_v15  ;;  %1273 = vmatpush.bf16.msrb.mxu2 %v3163_v16  ;;  %v3410_v15 = vor.u32 %v3996_v13, %v3407_v14  ;;  %v3381_v16 = vld [vmem:[#allocation7 + $0xc0] sm:$0xf]  ;;  %v3319_v13 = vld [vmem:[#allocation7 + $0x50] sm:$0xf0]  ;;  %v3325_v14 = vld [vmem:[#allocation7 + $0x48] sm:$0xf] }
 0x197   :  { %1246 = vmatpush.bf16.msrb.mxu0 %v3171_v57 }
 0x19b   :  { %1247 = vmatpush.bf16.msrb.mxu0 %v3155_v11 }
 0x206   :  { %v926_v35 = vpop.f32.mrf.mxu0  ;;  %v939_v55 = vpop.f32.mrf.mxu1 }
 0x207   :  { %v969_v32 = vadd.f32 %v926_v35, %v721_v20  ;;  %v970_v38 = vadd.f32 %v939_v55, %v722_v21  ;;  %v3167_v21 = vor.u32 %v3936_v17, %v3164_v18  ;;  %v3993_v17 = vld [vmem:[#allocation7 + $0xcc] sm:$0xf0]  ;;  %v3991_v18 = vld [vmem:[#allocation7 + $0xc4] sm:$0xf] }
 0x209   :  { %v3149_v46 = vmul.f32 -1.442695, %v969_v32  ;;  %v3150_v47 = vmul.f32 -1.442695, %v970_v38  ;;  %1286 = vmatpush.bf16.msrb.mxu3 %v3167_v21  ;;  %v3389_v21 = vld [vmem:[#allocation7 + $0xc8] sm:$0xf] }
 0x20b   :  { %4145 = vpow2.f32 %v3149_v46 }
 0x20c   :  { %4147 = vpow2.f32 %v3150_v47 }
 0x20d   :  { %v952_v1 = vpop.f32.mrf.mxu2  ;;  %v965_v3 = vpop.f32.mrf.mxu3  ;;  %1602 = vmatpush.bf16.msra.mxu3 %v3410_v15  ;;  %v3978_v15 = vld [vmem:[#allocation7 + $0x54] sm:$0xf0] }
 0x20e   :  { %v972_v9 = vadd.f32 %v965_v3, %v724_v51  ;;  %v928_v10 = vpop.f32.mrf.mxu0  ;;  %v941_v2 = vpop.f32.mrf.mxu1  ;;  %v971_v33 = vadd.f32 %v952_v1, %v723_v28 }
 0x20f   :  { %v3405_v10 = vld [vmem:[#allocation7 + $0xe8] sm:$0xf]  ;;  %v3998_v2 = vld [vmem:[#allocation7 + $0xf4] sm:$0xf0] }
 0x210   :  { %v3151_v19 = vmul.f32 -1.442695, %v972_v9  ;;  %v3399_v9 = vld [vmem:[#allocation7 + $0xf0] sm:$0xf0]  ;;  %v3406_v12 = vor.u32 %v3998_v2, %v3405_v10  ;;  %v3317_v10 = vld [vmem:[#allocation7 + $0x40] sm:$0xf] }
 0x211   :  { %v4146_v20 = vpop.eup %4145  ;;  %v3402_v11 = vor.u32 %v3995_v7, %v3399_v9  ;;  %v3977_v2 = vld [vmem:[#allocation7 + $0x4c] sm:$0xf0] }
 0x212   :  { %v4148_v22 = vpop.eup %4147  ;;  %v976_v23 = vadd.f32 1.0, %v4146_v20  ;;  %4149 = vpow2.f32 %v3151_v19  ;;  %1589 = vmatpush.bf16.msra.mxu2 %v3406_v12  ;;  %v3382_v19 = vor.u32 %v3993_v17, %v3381_v16  ;;  %v3383_v20 = vld [vmem:[#allocation7 + $0xd0] sm:$0xf0]  ;;  %v3318_v12 = vor.u32 %v3977_v2, %v3317_v10 }
 0x213   :  { %v995_v24 = vadd.f32 1.0, %v4148_v22  ;;  %1576 = vmatpush.bf16.msra.mxu1 %v3402_v11  ;;  %v3994_v22 = vld [vmem:[#allocation7 + $0xd4] sm:$0xf0]  ;;  %v3975_v11 = vld [vmem:[#allocation7 + $0x44] sm:$0xf] }
 0x214   :  { %4151 = vrcp.f32 %v976_v23  ;;  %v988_v38 = vand.u32 2147483648, %v976_v23  ;;  %v986_v41 = vand.u32 2147483647, %v976_v23  ;;  %vm982_vm10 = vweird.f32 %v976_v23 }
 0x215   :  { %4153 = vrcp.f32 %v995_v24  ;;  %v954_v26 = vpop.f32.mrf.mxu2  ;;  %v967_v27 = vpop.f32.mrf.mxu3  ;;  %v1007_v39 = vand.u32 2147483648, %v995_v24  ;;  %v1005_v43 = vand.u32 2147483647, %v995_v24  ;;  %vm1001_vm11 = vweird.f32 %v995_v24 }
 0x216   :  { %v989_v45 = vor.u32 1.1754944e-38, %v988_v38  ;;  %vm987_vm14 = vcmp.eq.f32.partialorder %v986_v41, 8.507059e+37  ;;  %v3992_v26 = vld [vmem:[#allocation7 + $0xcc] sm:$0xf]  ;;  %v3391_v27 = vld [vmem:[#allocation7 + $0xd8] sm:$0xf0] }
 0x217   :  { %v1008_v48 = vor.u32 1.1754944e-38, %v1007_v39  ;;  %vm1006_vm15 = vcmp.eq.f32.partialorder %v1005_v43, 8.507059e+37  ;;  %v3394_v28 = vor.u32 %v3992_v26, %v3391_v27  ;;  %v3988_v38 = vld [vmem:[#allocation7 + $0xac] sm:$0xf]  ;;  %v3375_v39 = vld [vmem:[#allocation7 + $0xb8] sm:$0xf0] }
 0x218   :  { %v4150_v29 = vpop.eup %4149  ;;  %v3378_v41 = vor.u32 %v3988_v38, %v3375_v39  ;;  %v3985_v43 = vld [vmem:[#allocation7 + $0x8c] sm:$0xf0]  ;;  %v3285_v39 = vld [vmem:[#allocation7] sm:$0xf] }
 0x219   :  { %v1015_v30 = vadd.f32 1.0, %v4150_v29  ;;  %v3365_v29 = vld [vmem:[#allocation7 + $0xa0] sm:$0xf]  ;;  %1603 = vmatpush.bf16.msra.mxu3 %v3394_v28  ;;  %v3971_v28 = vld [vmem:[#allocation7 + $0x24] sm:$0xf] }
 0x21a   :  { %v4152_v31 = vpop.eup %4151 }
 0x21b   :  { %v4154_v34 = vpop.eup %4153  ;;  %v978_v35 = vmul.f32 %v4152_v31, %v976_v23  ;;  %4155 = vrcp.f32 %v1015_v30  ;;  %vm983_vm8 = vweird.f32 %v4152_v31  ;;  %v1027_v61 = vand.u32 2147483648, %v1015_v30 }
 0x21c   :  { %v997_v55 = vmul.f32 %v4154_v34, %v995_v24  ;;  %4157 = vtanh.f32 %v971_v33  ;;  %vm1002_vm9 = vweird.f32 %v4154_v34  ;;  %vm984_vm12 = vmor %vm982_vm10, %vm983_vm8  ;;  %vm1021_vm1 = vweird.f32 %v1015_v30 }
 0x21d   :  { %v979_v37 = vsub.f32 1.0, %v978_v35  ;;  %vm1003_vm13 = vmor %vm1001_vm11, %vm1002_vm9  ;;  %v1025_v62 = vand.u32 2147483647, %v1015_v30  ;;  %v1028_v0 = vor.u32 1.1754944e-38, %v1027_v61  ;;  %v3386_v23 = vor.u32 %v3991_v18, %v3383_v20  ;;  %v3373_v35 = vld [vmem:[#allocation7 + $0xa8] sm:$0xf]  ;;  %1604 = vmatpush.bf16.msra.mxu3 %v3378_v41 }
 0x21e   :  { %v998_v32 = vsub.f32 1.0, %v997_v55  ;;  %v3390_v24 = vor.u32 %v3994_v22, %v3389_v21  ;;  %v3990_v55 = vld [vmem:[#allocation7 + $0xb4] sm:$0xf0]  ;;  %v3335_v61 = vld [vmem:[#allocation7 + $0x70] sm:$0xf0]  ;;  %v3322_v18 = vor.u32 %v3975_v11, %v3319_v13 }
 0x21f   :  { %v980_v40 = vmul.f32 %v4152_v31, %v979_v37  ;;  %vm1026_vm3 = vcmp.eq.f32.partialorder %v1025_v62, 8.507059e+37  ;;  %1577 = vmatpush.bf16.msra.mxu1 %v3386_v23  ;;  %v3341_v62 = vld [vmem:[#allocation7 + $0x68] sm:$0xf]  ;;  %v3976_v20 = vld [vmem:[#allocation7 + $0x4c] sm:$0xf] }
 0x220   :  { %v999_v42 = vmul.f32 %v4154_v34, %v998_v32  ;;  %1590 = vmatpush.bf16.msra.mxu2 %v3390_v24  ;;  %v3374_v32 = vor.u32 %v3990_v55, %v3373_v35  ;;  %v3327_v22 = vld [vmem:[#allocation7 + $0x58] sm:$0xf0]  ;;  %v3301_v23 = vld [vmem:[#allocation7 + $0x20] sm:$0xf]  ;;  %v3973_v24 = vld [vmem:[#allocation7 + $0x2c] sm:$0xf0] }
 0x221   :  { %v4156_v36 = vpop.eup %4155  ;;  %v981_v44 = vadd.f32 %v4152_v31, %v980_v40  ;;  %v1042_v40 = vld [vmem:[#allocation4 + $0x30] sm:$0xff]  ;;  %v3330_v26 = vor.u32 %v3976_v20, %v3327_v22  ;;  %v3302_v27 = vor.u32 %v3973_v24, %v3301_v23  ;;  %v3311_v35 = vld [vmem:[#allocation7 + $0x38] sm:$0xf0]  ;;  %v3967_v41 = vld [vmem:[#allocation7 + $0x4] sm:$0xf] }
 0x222   :  { %v1000_v46 = vadd.f32 %v4154_v34, %v999_v42  ;;  %v1017_v47 = vmul.f32 %v4156_v36, %v1015_v30  ;;  %v4158_v50 = vpop.eup %4157  ;;  %vm1022_vm0 = vweird.f32 %v4156_v36  ;;  %v3989_v30 = vld [vmem:[#allocation7 + $0xac] sm:$0xf0]  ;;  %v3349_v42 = vld [vmem:[#allocation7 + $0x80] sm:$0xf] }
 0x223   :  { %v985_v49 = vsel %vm984_vm12, %v4152_v31, %v981_v44  ;;  %vm1023_vm2 = vmor %vm1021_vm1, %vm1022_vm0  ;;  %v3987_v31 = vld [vmem:[#allocation7 + $0xa4] sm:$0xf]  ;;  %v3366_v33 = vor.u32 %v3989_v30, %v3365_v29  ;;  %v3350_v44 = vor.u32 %v3985_v43, %v3349_v42  ;;  %v3303_v29 = vld [vmem:[#allocation7 + $0x30] sm:$0xf0] }
 0x224   :  { %v990_v51 = vsel %vm987_vm14, %v989_v45, %v985_v49  ;;  %v1004_v52 = vsel %vm1003_vm13, %v4154_v34, %v1000_v46  ;;  %v1018_v53 = vsub.f32 1.0, %v1017_v47  ;;  %v3367_v34 = vld [vmem:[#allocation7 + $0xb0] sm:$0xf0]  ;;  %1591 = vmatpush.bf16.msra.mxu2 %v3374_v32  ;;  %v3357_v46 = vld [vmem:[#allocation7 + $0x88] sm:$0xf] }
 0x225   :  { %v1009_v54 = vsel %vm1006_vm15, %v1008_v48, %v1004_v52  ;;  %v1033_v56 = vmul.f32 %v4158_v50, %v990_v51  ;;  %v3370_v37 = vor.u32 %v3987_v31, %v3367_v34  ;;  %v3351_v45 = vld [vmem:[#allocation7 + $0x90] sm:$0xf0]  ;;  %v3986_v47 = vld [vmem:[#allocation7 + $0x94] sm:$0xf0]  ;;  %v3984_v50 = vld [vmem:[#allocation7 + $0x8c] sm:$0xf]  ;;  %v3306_v31 = vor.u32 %v3971_v28, %v3303_v29 }
 0x226   :  { %v1032_v57 = vmul.f32 %v1009_v54, %v4398_v25  ;;  %v1019_v58 = vmul.f32 %v4156_v36, %v1018_v53  ;;  %v3397_v25 = vld [vmem:[#allocation7 + $0xe0] sm:$0xf]  ;;  %v3358_v49 = vor.u32 %v3986_v47, %v3357_v46  ;;  %v3359_v51 = vld [vmem:[#allocation7 + $0x98] sm:$0xf0]  ;;  %v1044_v53 = vunpack.c.l.bf16 %v1042_v40  ;;  %v3309_v30 = vld [vmem:[#allocation7 + $0x28] sm:$0xf] }
 0x227   :  { %v3398_v8 = vor.u32 %v3997_v6, %v3397_v25  ;;  %1578 = vmatpush.bf16.msra.mxu1 %v3370_v37  ;;  %v3362_v52 = vor.u32 %v3984_v50, %v3359_v51  ;;  %v1045_v54 = vunpack.c.h.bf16 %v1042_v40  ;;  %v4409_v6 = vld [vmem:[#allocation4 + $0x38] sm:$0xff]  ;;  %v3972_v34 = vld [vmem:[#allocation7 + $0x2c] sm:$0xf]  ;;  %v3969_v40 = vld [vmem:[#allocation7 + $0xc] sm:$0xf0] }
 0x228   :  { %v4406_v59 = vadd.f32 %v1033_v56, %v1032_v57  ;;  %v1020_v60 = vadd.f32 %v4156_v36, %v1019_v58  ;;  %1592 = vmatpush.bf16.msra.mxu2 %v3358_v49  ;;  %v3333_v56 = vld [vmem:[#allocation7 + $0x60] sm:$0xf]  ;;  %v3981_v57 = vld [vmem:[#allocation7 + $0x6c] sm:$0xf0]  ;;  %v3979_v58 = vld [vmem:[#allocation7 + $0x64] sm:$0xf]  ;;  %v1047_v21 = vunpack.c.h.bf16 %v4409_v6  ;;  %v3314_v38 = vor.u32 %v3972_v34, %v3311_v35 }
 0x229   :  { %1563 = vmatpush.bf16.msra.mxu0 %v3398_v8  ;;  %1605 = vmatpush.bf16.msra.mxu3 %v3362_v52  ;;  %v3293_v46 = vld [vmem:[#allocation7 + $0x8] sm:$0xf]  ;;  %v3970_v47 = vld [vmem:[#allocation7 + $0x14] sm:$0xf0]  ;;  %v3968_v50 = vld [vmem:[#allocation7 + $0xc] sm:$0xf] }
 0x22a   :  { %4159 = vtanh.f32 %v4406_v59  ;;  %v1024_v63 = vsel %vm1023_vm2, %v4156_v36, %v1020_v60  ;;  %v3983_v36 = vld [vmem:[#allocation7 + $0x84] sm:$0xf]  ;;  %v3334_v60 = vor.u32 %v3981_v57, %v3333_v56  ;;  %v3294_v49 = vor.u32 %v3970_v47, %v3293_v46  ;;  %v3295_v51 = vld [vmem:[#allocation7 + $0x18] sm:$0xf0]  ;;  %v4028_v46 = vld [vmem:[#allocation7 + $0xec] sm:$0xf] }
 0x22b   :  { %v1029_v3 = vsel %vm1026_vm3, %v1028_v0, %v1024_v63  ;;  %v3354_v48 = vor.u32 %v3983_v36, %v3351_v45  ;;  %v3982_v63 = vld [vmem:[#allocation7 + $0x74] sm:$0xf0]  ;;  %v3338_v0 = vor.u32 %v3979_v58, %v3335_v61  ;;  %v3287_v45 = vld [vmem:[#allocation7 + $0x10] sm:$0xf0]  ;;  %v3538_v47 = vld [vmem:[#allocation7 + $0xf8] sm:$0xf0] }
 0x22d   :  { %1564 = vmatpush.bf16.msra.mxu0 %v3382_v19  ;;  %1579 = vmatpush.bf16.msra.mxu1 %v3354_v48  ;;  %v3326_v19 = vor.u32 %v3978_v15, %v3325_v14  ;;  %v3290_v48 = vor.u32 %v3967_v41, %v3287_v45 }
 0x230   :  { %v4160_v1 = vpop.eup %4159 }
 0x231   :  { %v1036_v4 = vmul.f32 %v4160_v1, %v1029_v3  ;;  %1565 = vmatpush.bf16.msra.mxu0 %v3366_v33  ;;  %v3342_v1 = vor.u32 %v3982_v63, %v3341_v62  ;;  %v3980_v3 = vld [vmem:[#allocation7 + $0x6c] sm:$0xf]  ;;  %1580 = vmatpush.bf16.msra.mxu1 %v3338_v0  ;;  %v3974_v33 = vld [vmem:[#allocation7 + $0x34] sm:$0xf0]  ;;  %v1046_v62 = vunpack.c.l.bf16 %v4409_v6 }
 0x232   :  { %v3310_v32 = vor.u32 %v3974_v33, %v3309_v30 }
 0x233   :  { %v1040_v5 = vpack.c.bf16 %v1036_v4, %v1036_v4  ;;  %v3343_v4 = vld [vmem:[#allocation7 + $0x78] sm:$0xf0]  ;;  %1593 = vmatpush.bf16.msra.mxu2 %v3342_v1 }
 0x234   :  { %v3346_v7 = vor.u32 %v3980_v3, %v3343_v4 }
 0x235   :  { %1248 = vmatmul.bf16.vlgmr.msrb.gmra.mxu0 %v1040_v5  ;;  %1261 = vmatmul.bf16.vlgmr.msrb.gmra.mxu1 %v1040_v5 }
 0x236   :  { %1274 = vmatmul.bf16.vlgmr.msrb.gmra.mxu2 %v1040_v5  ;;  %1287 = vmatmul.bf16.vlgmr.msrb.gmra.mxu3 %v1040_v5 }
 0x237   :  { %1566 = vmatpush.bf16.msra.mxu0 %v3350_v44  ;;  %1606 = vmatpush.bf16.msra.mxu3 %v3346_v7  ;;  %v3286_v44 = vor.u32 %v3969_v40, %v3285_v39  ;;  %v4029_v39 = vld [vmem:[#allocation7 + $0xec] sm:$0xf0]  ;;  %v4027_v40 = vld [vmem:[#allocation7 + $0xe4] sm:$0xf] }
 0x238   :  { %1581 = vmatpush.bf16.msra.mxu1 %v3322_v18  ;;  %1594 = vmatpush.bf16.msra.mxu2 %v3326_v19 }
 0x23b   :  { %1567 = vmatpush.bf16.msra.mxu0 %v3334_v60  ;;  %1607 = vmatpush.bf16.msra.mxu3 %v3330_v26 }
 0x23c   :  { %1582 = vmatpush.bf16.msra.mxu1 %v3306_v31  ;;  %1595 = vmatpush.bf16.msra.mxu2 %v3310_v32 }
 0x23f   :  { %1568 = vmatpush.bf16.msra.mxu0 %v3318_v12  ;;  %1608 = vmatpush.bf16.msra.mxu3 %v3314_v38 }
 0x240   :  { %1583 = vmatpush.bf16.msra.mxu1 %v3290_v48  ;;  %1596 = vmatpush.bf16.msra.mxu2 %v3294_v49  ;;  %v3541_v48 = vor.u32 %v4028_v46, %v3538_v47  ;;  %v3512_v49 = vld [vmem:[#allocation7 + $0xc0] sm:$0xf]  ;;  %v3450_v46 = vld [vmem:[#allocation7 + $0x50] sm:$0xf0]  ;;  %v3456_v47 = vld [vmem:[#allocation7 + $0x48] sm:$0xf] }
 0x243   :  { %1569 = vmatpush.bf16.msra.mxu0 %v3302_v27 }
 0x247   :  { %1570 = vmatpush.bf16.msra.mxu0 %v3286_v44 }
 0x2b2   :  { %v1249_v5 = vpop.f32.mrf.mxu0  ;;  %v1262_v25 = vpop.f32.mrf.mxu1 }
 0x2b3   :  { %v1292_v8 = vadd.f32 %v1249_v5, %v1044_v53  ;;  %v1293_v9 = vadd.f32 %v1262_v25, %v1045_v54  ;;  %v3298_v54 = vor.u32 %v3968_v50, %v3295_v51  ;;  %v4025_v50 = vld [vmem:[#allocation7 + $0xcc] sm:$0xf0]  ;;  %v4023_v51 = vld [vmem:[#allocation7 + $0xc4] sm:$0xf] }
 0x2b5   :  { %v3280_v16 = vmul.f32 -1.442695, %v1292_v8  ;;  %v3281_v17 = vmul.f32 -1.442695, %v1293_v9  ;;  %1609 = vmatpush.bf16.msra.mxu3 %v3298_v54  ;;  %v3520_v54 = vld [vmem:[#allocation7 + $0xc8] sm:$0xf] }
 0x2b7   :  { %4161 = vpow2.f32 %v3280_v16 }
 0x2b8   :  { %4163 = vpow2.f32 %v3281_v17 }
 0x2b9   :  { %v1275_v55 = vpop.f32.mrf.mxu2  ;;  %v1288_v37 = vpop.f32.mrf.mxu3  ;;  %1925 = vmatpush.bf16.msrb.mxu3 %v3541_v48  ;;  %v4010_v48 = vld [vmem:[#allocation7 + $0x54] sm:$0xf0] }
 0x2ba   :  { %v1295_v42 = vadd.f32 %v1288_v37, %v1047_v21  ;;  %v1251_v43 = vpop.f32.mrf.mxu0  ;;  %v1264_v36 = vpop.f32.mrf.mxu1  ;;  %v1294_v3 = vadd.f32 %v1275_v55, %v1046_v62 }
 0x2bb   :  { %v3536_v43 = vld [vmem:[#allocation7 + $0xe8] sm:$0xf]  ;;  %v4030_v36 = vld [vmem:[#allocation7 + $0xf4] sm:$0xf0] }
 0x2bc   :  { %v3282_v52 = vmul.f32 -1.442695, %v1295_v42  ;;  %v3530_v42 = vld [vmem:[#allocation7 + $0xf0] sm:$0xf0]  ;;  %v3537_v45 = vor.u32 %v4030_v36, %v3536_v43  ;;  %v3448_v43 = vld [vmem:[#allocation7 + $0x40] sm:$0xf] }
 0x2bd   :  { %v4162_v53 = vpop.eup %4161  ;;  %v3533_v44 = vor.u32 %v4027_v40, %v3530_v42  ;;  %v4009_v36 = vld [vmem:[#allocation7 + $0x4c] sm:$0xf0] }
 0x2be   :  { %v4164_v56 = vpop.eup %4163  ;;  %v1299_v57 = vadd.f32 1.0, %v4162_v53  ;;  %4165 = vpow2.f32 %v3282_v52  ;;  %1912 = vmatpush.bf16.msrb.mxu2 %v3537_v45  ;;  %v3513_v52 = vor.u32 %v4025_v50, %v3512_v49  ;;  %v3514_v53 = vld [vmem:[#allocation7 + $0xd0] sm:$0xf0]  ;;  %v3449_v45 = vor.u32 %v4009_v36, %v3448_v43 }
 0x2bf   :  { %v1318_v58 = vadd.f32 1.0, %v4164_v56  ;;  %1899 = vmatpush.bf16.msrb.mxu1 %v3533_v44  ;;  %v4026_v56 = vld [vmem:[#allocation7 + $0xd4] sm:$0xf0]  ;;  %v4007_v44 = vld [vmem:[#allocation7 + $0x44] sm:$0xf] }
 0x2c0   :  { %4167 = vrcp.f32 %v1299_v57  ;;  %v1311_v9 = vand.u32 2147483648, %v1299_v57  ;;  %v1309_v11 = vand.u32 2147483647, %v1299_v57  ;;  %vm1305_vm6 = vweird.f32 %v1299_v57 }
 0x2c1   :  { %4169 = vrcp.f32 %v1318_v58  ;;  %v1277_v60 = vpop.f32.mrf.mxu2  ;;  %v1290_v61 = vpop.f32.mrf.mxu3  ;;  %v1330_v10 = vand.u32 2147483648, %v1318_v58  ;;  %v1328_v13 = vand.u32 2147483647, %v1318_v58  ;;  %vm1324_vm7 = vweird.f32 %v1318_v58 }
 0x2c2   :  { %v1312_v15 = vor.u32 1.1754944e-38, %v1311_v9  ;;  %vm1310_vm10 = vcmp.eq.f32.partialorder %v1309_v11, 8.507059e+37  ;;  %v4024_v60 = vld [vmem:[#allocation7 + $0xcc] sm:$0xf]  ;;  %v3522_v61 = vld [vmem:[#allocation7 + $0xd8] sm:$0xf0] }
 0x2c3   :  { %v1331_v18 = vor.u32 1.1754944e-38, %v1330_v10  ;;  %vm1329_vm11 = vcmp.eq.f32.partialorder %v1328_v13, 8.507059e+37  ;;  %v3525_v62 = vor.u32 %v4024_v60, %v3522_v61  ;;  %v4020_v9 = vld [vmem:[#allocation7 + $0xac] sm:$0xf]  ;;  %v3506_v10 = vld [vmem:[#allocation7 + $0xb8] sm:$0xf0] }
 0x2c4   :  { %v4166_v63 = vpop.eup %4165  ;;  %v3509_v11 = vor.u32 %v4020_v9, %v3506_v10  ;;  %v4017_v13 = vld [vmem:[#allocation7 + $0x8c] sm:$0xf0]  ;;  %v3416_v10 = vld [vmem:[#allocation7] sm:$0xf] }
 0x2c5   :  { %v1338_v0 = vadd.f32 1.0, %v4166_v63  ;;  %v3496_v63 = vld [vmem:[#allocation7 + $0xa0] sm:$0xf]  ;;  %1926 = vmatpush.bf16.msrb.mxu3 %v3525_v62  ;;  %v4003_v62 = vld [vmem:[#allocation7 + $0x24] sm:$0xf] }
 0x2c6   :  { %v4168_v1 = vpop.eup %4167 }
 0x2c7   :  { %v4170_v4 = vpop.eup %4169  ;;  %v1301_v5 = vmul.f32 %v4168_v1, %v1299_v57  ;;  %4171 = vrcp.f32 %v1338_v0  ;;  %vm1306_vm4 = vweird.f32 %v4168_v1  ;;  %v1350_v31 = vand.u32 2147483648, %v1338_v0 }
 0x2c8   :  { %v1320_v25 = vmul.f32 %v4170_v4, %v1318_v58  ;;  %4173 = vtanh.f32 %v1294_v3  ;;  %vm1325_vm5 = vweird.f32 %v4170_v4  ;;  %vm1307_vm8 = vmor %vm1305_vm6, %vm1306_vm4  ;;  %vm1344_vm13 = vweird.f32 %v1338_v0 }
 0x2c9   :  { %v1302_v7 = vsub.f32 1.0, %v1301_v5  ;;  %vm1326_vm9 = vmor %vm1324_vm7, %vm1325_vm5  ;;  %v1348_v33 = vand.u32 2147483647, %v1338_v0  ;;  %v1351_v35 = vor.u32 1.1754944e-38, %v1350_v31  ;;  %v3517_v57 = vor.u32 %v4023_v51, %v3514_v53  ;;  %v3504_v5 = vld [vmem:[#allocation7 + $0xa8] sm:$0xf]  ;;  %1927 = vmatpush.bf16.msrb.mxu3 %v3509_v11 }
 0x2ca   :  { %v1321_v8 = vsub.f32 1.0, %v1320_v25  ;;  %v3521_v58 = vor.u32 %v4026_v56, %v3520_v54  ;;  %v4022_v25 = vld [vmem:[#allocation7 + $0xb4] sm:$0xf0]  ;;  %v3466_v31 = vld [vmem:[#allocation7 + $0x70] sm:$0xf0]  ;;  %v3453_v51 = vor.u32 %v4007_v44, %v3450_v46 }
 0x2cb   :  { %v1303_v2 = vmul.f32 %v4168_v1, %v1302_v7  ;;  %vm1349_vm15 = vcmp.eq.f32.partialorder %v1348_v33, 8.507059e+37  ;;  %1900 = vmatpush.bf16.msrb.mxu1 %v3517_v57  ;;  %v3472_v33 = vld [vmem:[#allocation7 + $0x68] sm:$0xf]  ;;  %v4008_v53 = vld [vmem:[#allocation7 + $0x4c] sm:$0xf] }
 0x2cc   :  { %v1322_v12 = vmul.f32 %v4170_v4, %v1321_v8  ;;  %1913 = vmatpush.bf16.msrb.mxu2 %v3521_v58  ;;  %v3505_v8 = vor.u32 %v4022_v25, %v3504_v5  ;;  %v3458_v56 = vld [vmem:[#allocation7 + $0x58] sm:$0xf0]  ;;  %v3432_v57 = vld [vmem:[#allocation7 + $0x20] sm:$0xf]  ;;  %v4005_v58 = vld [vmem:[#allocation7 + $0x2c] sm:$0xf0] }
 0x2cd   :  { %v4172_v6 = vpop.eup %4171  ;;  %v1304_v14 = vadd.f32 %v4168_v1, %v1303_v2  ;;  %v1365_v2 = vld [vmem:[#allocation4 + $0x40] sm:$0xff]  ;;  %v3461_v60 = vor.u32 %v4008_v53, %v3458_v56  ;;  %v3433_v61 = vor.u32 %v4005_v58, %v3432_v57  ;;  %v3442_v5 = vld [vmem:[#allocation7 + $0x38] sm:$0xf0] }
 0x2ce   :  { %v1323_v16 = vadd.f32 %v4170_v4, %v1322_v12  ;;  %v1340_v17 = vmul.f32 %v4172_v6, %v1338_v0  ;;  %v4174_v20 = vpop.eup %4173  ;;  %vm1345_vm12 = vweird.f32 %v4172_v6  ;;  %v4021_v0 = vld [vmem:[#allocation7 + $0xac] sm:$0xf0]  ;;  %v3480_v12 = vld [vmem:[#allocation7 + $0x80] sm:$0xf]  ;;  %v3999_v11 = vld [vmem:[#allocation7 + $0x4] sm:$0xf] }
 0x2cf   :  { %v1308_v19 = vsel %vm1307_vm8, %v4168_v1, %v1304_v14  ;;  %vm1346_vm14 = vmor %vm1344_vm13, %vm1345_vm12  ;;  %v4019_v1 = vld [vmem:[#allocation7 + $0xa4] sm:$0xf]  ;;  %v3497_v3 = vor.u32 %v4021_v0, %v3496_v63  ;;  %v3481_v14 = vor.u32 %v4017_v13, %v3480_v12  ;;  %v3434_v63 = vld [vmem:[#allocation7 + $0x30] sm:$0xf0] }
 0x2d0   :  { %v1313_v21 = vsel %vm1310_vm10, %v1312_v15, %v1308_v19  ;;  %v1327_v22 = vsel %vm1326_vm9, %v4170_v4, %v1323_v16  ;;  %v1341_v23 = vsub.f32 1.0, %v1340_v17  ;;  %v3498_v4 = vld [vmem:[#allocation7 + $0xb0] sm:$0xf0]  ;;  %1914 = vmatpush.bf16.msrb.mxu2 %v3505_v8  ;;  %v3488_v16 = vld [vmem:[#allocation7 + $0x88] sm:$0xf] }
 0x2d1   :  { %v1332_v24 = vsel %vm1329_vm11, %v1331_v18, %v1327_v22  ;;  %v1356_v26 = vmul.f32 %v4174_v20, %v1313_v21  ;;  %v3501_v7 = vor.u32 %v4019_v1, %v3498_v4  ;;  %v3482_v15 = vld [vmem:[#allocation7 + $0x90] sm:$0xf0]  ;;  %v4018_v17 = vld [vmem:[#allocation7 + $0x94] sm:$0xf0]  ;;  %v4016_v20 = vld [vmem:[#allocation7 + $0x8c] sm:$0xf]  ;;  %v3437_v1 = vor.u32 %v4003_v62, %v3434_v63 }
 0x2d2   :  { %v1355_v27 = vmul.f32 %v1332_v24, %v4406_v59  ;;  %v1342_v28 = vmul.f32 %v4172_v6, %v1341_v23  ;;  %v3528_v59 = vld [vmem:[#allocation7 + $0xe0] sm:$0xf]  ;;  %v3489_v19 = vor.u32 %v4018_v17, %v3488_v16  ;;  %v3490_v21 = vld [vmem:[#allocation7 + $0x98] sm:$0xf0]  ;;  %v1367_v23 = vunpack.c.l.bf16 %v1365_v2  ;;  %v3440_v0 = vld [vmem:[#allocation7 + $0x28] sm:$0xf] }
 0x2d3   :  { %v3529_v41 = vor.u32 %v4029_v39, %v3528_v59  ;;  %1901 = vmatpush.bf16.msrb.mxu1 %v3501_v7  ;;  %v3493_v22 = vor.u32 %v4016_v20, %v3490_v21  ;;  %v1368_v24 = vunpack.c.h.bf16 %v1365_v2  ;;  %v4417_v39 = vld [vmem:[#allocation4 + $0x48] sm:$0xff]  ;;  %v4001_v2 = vld [vmem:[#allocation7 + $0xc] sm:$0xf0]  ;;  %v4002_v17 = vld [vmem:[#allocation7 + $0x14] sm:$0xf0] }
 0x2d4   :  { %v4414_v29 = vadd.f32 %v1356_v26, %v1355_v27  ;;  %v1343_v30 = vadd.f32 %v4172_v6, %v1342_v28  ;;  %1915 = vmatpush.bf16.msrb.mxu2 %v3489_v19  ;;  %v3464_v26 = vld [vmem:[#allocation7 + $0x60] sm:$0xf]  ;;  %v4013_v27 = vld [vmem:[#allocation7 + $0x6c] sm:$0xf0]  ;;  %v4011_v28 = vld [vmem:[#allocation7 + $0x64] sm:$0xf]  ;;  %v1370_v54 = vunpack.c.h.bf16 %v4417_v39 }
 0x2d5   :  { %1886 = vmatpush.bf16.msrb.mxu0 %v3529_v41  ;;  %1928 = vmatpush.bf16.msrb.mxu3 %v3493_v22  ;;  %v4004_v4 = vld [vmem:[#allocation7 + $0x2c] sm:$0xf]  ;;  %v3424_v16 = vld [vmem:[#allocation7 + $0x8] sm:$0xf]  ;;  %v3426_v21 = vld [vmem:[#allocation7 + $0x18] sm:$0xf0] }
 0x2d6   :  { %4175 = vtanh.f32 %v4414_v29  ;;  %v1347_v34 = vsel %vm1346_vm14, %v4172_v6, %v1343_v30  ;;  %v4015_v6 = vld [vmem:[#allocation7 + $0x84] sm:$0xf]  ;;  %v3465_v30 = vor.u32 %v4013_v27, %v3464_v26  ;;  %v3445_v9 = vor.u32 %v4004_v4, %v3442_v5  ;;  %v4000_v20 = vld [vmem:[#allocation7 + $0xc] sm:$0xf] }
 0x2d7   :  { %v1352_v37 = vsel %vm1349_vm15, %v1351_v35, %v1347_v34  ;;  %v3485_v18 = vor.u32 %v4015_v6, %v3482_v15  ;;  %v4014_v34 = vld [vmem:[#allocation7 + $0x74] sm:$0xf0]  ;;  %v3469_v35 = vor.u32 %v4011_v28, %v3466_v31  ;;  %v3418_v15 = vld [vmem:[#allocation7 + $0x10] sm:$0xf0]  ;;  %v3425_v19 = vor.u32 %v4002_v17, %v3424_v16  ;;  %v4060_v16 = vld [vmem:[#allocation7 + $0xec] sm:$0xf] }
 0x2d8   :  { %v3669_v17 = vld [vmem:[#allocation7 + $0xf8] sm:$0xf0] }
 0x2d9   :  { %1887 = vmatpush.bf16.msrb.mxu0 %v3513_v52  ;;  %1902 = vmatpush.bf16.msrb.mxu1 %v3485_v18  ;;  %v3457_v52 = vor.u32 %v4010_v48, %v3456_v47  ;;  %v3421_v18 = vor.u32 %v3999_v11, %v3418_v15 }
 0x2dc   :  { %v4176_v55 = vpop.eup %4175 }
 0x2dd   :  { %v1359_v32 = vmul.f32 %v4176_v55, %v1352_v37  ;;  %1888 = vmatpush.bf16.msrb.mxu0 %v3497_v3  ;;  %v3473_v55 = vor.u32 %v4014_v34, %v3472_v33  ;;  %v4012_v37 = vld [vmem:[#allocation7 + $0x6c] sm:$0xf]  ;;  %1903 = vmatpush.bf16.msrb.mxu1 %v3469_v35  ;;  %v4006_v3 = vld [vmem:[#allocation7 + $0x34] sm:$0xf0]  ;;  %v1369_v33 = vunpack.c.l.bf16 %v4417_v39 }
 0x2de   :  { %v3441_v8 = vor.u32 %v4006_v3, %v3440_v0 }
 0x2df   :  { %v1363_v38 = vpack.c.bf16 %v1359_v32, %v1359_v32  ;;  %v3474_v32 = vld [vmem:[#allocation7 + $0x78] sm:$0xf0]  ;;  %1916 = vmatpush.bf16.msrb.mxu2 %v3473_v55 }
 0x2e0   :  { %v3477_v40 = vor.u32 %v4012_v37, %v3474_v32 }
 0x2e1   :  { %1571 = vmatmul.bf16.vlgmr.msra.gmra.mxu0 %v1363_v38  ;;  %1584 = vmatmul.bf16.vlgmr.msra.gmra.mxu1 %v1363_v38 }
 0x2e2   :  { %1597 = vmatmul.bf16.vlgmr.msra.gmra.mxu2 %v1363_v38  ;;  %1610 = vmatmul.bf16.vlgmr.msra.gmra.mxu3 %v1363_v38 }
 0x2e3   :  { %1889 = vmatpush.bf16.msrb.mxu0 %v3481_v14  ;;  %1929 = vmatpush.bf16.msrb.mxu3 %v3477_v40  ;;  %v3417_v14 = vor.u32 %v4001_v2, %v3416_v10  ;;  %v4061_v10 = vld [vmem:[#allocation7 + $0xec] sm:$0xf0]  ;;  %v4059_v2 = vld [vmem:[#allocation7 + $0xe4] sm:$0xf] }
 0x2e4   :  { %1904 = vmatpush.bf16.msrb.mxu1 %v3453_v51  ;;  %1917 = vmatpush.bf16.msrb.mxu2 %v3457_v52 }
 0x2e7   :  { %1890 = vmatpush.bf16.msrb.mxu0 %v3465_v30  ;;  %1930 = vmatpush.bf16.msrb.mxu3 %v3461_v60 }
 0x2e8   :  { %1905 = vmatpush.bf16.msrb.mxu1 %v3437_v1  ;;  %1918 = vmatpush.bf16.msrb.mxu2 %v3441_v8 }
 0x2eb   :  { %1891 = vmatpush.bf16.msrb.mxu0 %v3449_v45  ;;  %1931 = vmatpush.bf16.msrb.mxu3 %v3445_v9 }
 0x2ec   :  { %1906 = vmatpush.bf16.msrb.mxu1 %v3421_v18  ;;  %1919 = vmatpush.bf16.msrb.mxu2 %v3425_v19  ;;  %v3672_v18 = vor.u32 %v4060_v16, %v3669_v17  ;;  %v3643_v19 = vld [vmem:[#allocation7 + $0xc0] sm:$0xf]  ;;  %v3581_v16 = vld [vmem:[#allocation7 + $0x50] sm:$0xf0]  ;;  %v3587_v17 = vld [vmem:[#allocation7 + $0x48] sm:$0xf] }
 0x2ef   :  { %1892 = vmatpush.bf16.msrb.mxu0 %v3433_v61 }
 0x2f3   :  { %1893 = vmatpush.bf16.msrb.mxu0 %v3417_v14 }
 0x35e   :  { %v1572_v38 = vpop.f32.mrf.mxu0  ;;  %v1585_v59 = vpop.f32.mrf.mxu1 }
 0x35f   :  { %v1615_v41 = vadd.f32 %v1572_v38, %v1367_v23  ;;  %v1616_v42 = vadd.f32 %v1585_v59, %v1368_v24  ;;  %v3429_v24 = vor.u32 %v4000_v20, %v3426_v21  ;;  %v4057_v20 = vld [vmem:[#allocation7 + $0xcc] sm:$0xf0]  ;;  %v4055_v21 = vld [vmem:[#allocation7 + $0xc4] sm:$0xf] }
 0x361   :  { %v3411_v49 = vmul.f32 -1.442695, %v1615_v41  ;;  %v3412_v50 = vmul.f32 -1.442695, %v1616_v42  ;;  %1932 = vmatpush.bf16.msrb.mxu3 %v3429_v24  ;;  %v3651_v24 = vld [vmem:[#allocation7 + $0xc8] sm:$0xf] }
 0x363   :  { %4177 = vpow2.f32 %v3411_v49 }
 0x364   :  { %4179 = vpow2.f32 %v3412_v50 }
 0x365   :  { %v1598_v25 = vpop.f32.mrf.mxu2  ;;  %v1611_v7 = vpop.f32.mrf.mxu3  ;;  %2248 = vmatpush.bf16.msra.mxu3 %v3672_v18  ;;  %v4042_v18 = vld [vmem:[#allocation7 + $0x54] sm:$0xf0] }
 0x366   :  { %v1618_v12 = vadd.f32 %v1611_v7, %v1370_v54  ;;  %v1574_v13 = vpop.f32.mrf.mxu0  ;;  %v1587_v6 = vpop.f32.mrf.mxu1  ;;  %v1617_v37 = vadd.f32 %v1598_v25, %v1369_v33 }
 0x367   :  { %v3667_v13 = vld [vmem:[#allocation7 + $0xe8] sm:$0xf]  ;;  %v4062_v6 = vld [vmem:[#allocation7 + $0xf4] sm:$0xf0] }
 0x368   :  { %v3413_v22 = vmul.f32 -1.442695, %v1618_v12  ;;  %v3661_v12 = vld [vmem:[#allocation7 + $0xf0] sm:$0xf0]  ;;  %v3668_v15 = vor.u32 %v4062_v6, %v3667_v13  ;;  %v3579_v13 = vld [vmem:[#allocation7 + $0x40] sm:$0xf] }
 0x369   :  { %v4178_v23 = vpop.eup %4177  ;;  %v3664_v14 = vor.u32 %v4059_v2, %v3661_v12  ;;  %v4041_v6 = vld [vmem:[#allocation7 + $0x4c] sm:$0xf0] }
 0x36a   :  { %v4180_v26 = vpop.eup %4179  ;;  %v1622_v27 = vadd.f32 1.0, %v4178_v23  ;;  %4181 = vpow2.f32 %v3413_v22  ;;  %2235 = vmatpush.bf16.msra.mxu2 %v3668_v15  ;;  %v3644_v22 = vor.u32 %v4057_v20, %v3643_v19  ;;  %v3645_v23 = vld [vmem:[#allocation7 + $0xd0] sm:$0xf0]  ;;  %v3580_v15 = vor.u32 %v4041_v6, %v3579_v13 }
 0x36b   :  { %v1641_v28 = vadd.f32 1.0, %v4180_v26  ;;  %2222 = vmatpush.bf16.msra.mxu1 %v3664_v14  ;;  %v4058_v26 = vld [vmem:[#allocation7 + $0xd4] sm:$0xf0]  ;;  %v4039_v14 = vld [vmem:[#allocation7 + $0x44] sm:$0xf] }
 0x36c   :  { %4183 = vrcp.f32 %v1622_v27  ;;  %v1634_v42 = vand.u32 2147483648, %v1622_v27  ;;  %v1632_v44 = vand.u32 2147483647, %v1622_v27  ;;  %vm1628_vm2 = vweird.f32 %v1622_v27 }
 0x36d   :  { %4185 = vrcp.f32 %v1641_v28  ;;  %v1600_v30 = vpop.f32.mrf.mxu2  ;;  %v1613_v31 = vpop.f32.mrf.mxu3  ;;  %v1653_v43 = vand.u32 2147483648, %v1641_v28  ;;  %v1651_v46 = vand.u32 2147483647, %v1641_v28  ;;  %vm1647_vm3 = vweird.f32 %v1641_v28 }
 0x36e   :  { %v1635_v48 = vor.u32 1.1754944e-38, %v1634_v42  ;;  %vm1633_vm6 = vcmp.eq.f32.partialorder %v1632_v44, 8.507059e+37  ;;  %v4056_v30 = vld [vmem:[#allocation7 + $0xcc] sm:$0xf]  ;;  %v3653_v31 = vld [vmem:[#allocation7 + $0xd8] sm:$0xf0] }
 0x36f   :  { %v1654_v51 = vor.u32 1.1754944e-38, %v1653_v43  ;;  %vm1652_vm7 = vcmp.eq.f32.partialorder %v1651_v46, 8.507059e+37  ;;  %v3656_v33 = vor.u32 %v4056_v30, %v3653_v31  ;;  %v4052_v42 = vld [vmem:[#allocation7 + $0xac] sm:$0xf]  ;;  %v3637_v43 = vld [vmem:[#allocation7 + $0xb8] sm:$0xf0] }
 0x370   :  { %v4182_v34 = vpop.eup %4181  ;;  %v3640_v44 = vor.u32 %v4052_v42, %v3637_v43  ;;  %v4049_v46 = vld [vmem:[#allocation7 + $0x8c] sm:$0xf0]  ;;  %v3547_v43 = vld [vmem:[#allocation7] sm:$0xf] }
 0x371   :  { %v1661_v35 = vadd.f32 1.0, %v4182_v34  ;;  %v3627_v34 = vld [vmem:[#allocation7 + $0xa0] sm:$0xf]  ;;  %2249 = vmatpush.bf16.msra.mxu3 %v3656_v33  ;;  %v4035_v33 = vld [vmem:[#allocation7 + $0x24] sm:$0xf] }
 0x372   :  { %v4184_v55 = vpop.eup %4183 }
 0x373   :  { %v4186_v32 = vpop.eup %4185  ;;  %v1624_v38 = vmul.f32 %v4184_v55, %v1622_v27  ;;  %4187 = vrcp.f32 %v1661_v35  ;;  %vm1629_vm0 = vweird.f32 %v4184_v55  ;;  %v1673_v1 = vand.u32 2147483648, %v1661_v35 }
 0x374   :  { %v1643_v59 = vmul.f32 %v4186_v32, %v1641_v28  ;;  %4189 = vtanh.f32 %v1617_v37  ;;  %vm1648_vm1 = vweird.f32 %v4186_v32  ;;  %vm1630_vm4 = vmor %vm1628_vm2, %vm1629_vm0  ;;  %vm1667_vm9 = vweird.f32 %v1661_v35 }
 0x375   :  { %v1625_v40 = vsub.f32 1.0, %v1624_v38  ;;  %vm1649_vm5 = vmor %vm1647_vm3, %vm1648_vm1  ;;  %v1671_v3 = vand.u32 2147483647, %v1661_v35  ;;  %v1674_v5 = vor.u32 1.1754944e-38, %v1673_v1  ;;  %v3648_v27 = vor.u32 %v4055_v21, %v3645_v23  ;;  %v3635_v38 = vld [vmem:[#allocation7 + $0xa8] sm:$0xf]  ;;  %2250 = vmatpush.bf16.msra.mxu3 %v3640_v44 }
 0x376   :  { %v1644_v41 = vsub.f32 1.0, %v1643_v59  ;;  %v3652_v28 = vor.u32 %v4058_v26, %v3651_v24  ;;  %v4054_v59 = vld [vmem:[#allocation7 + $0xb4] sm:$0xf0]  ;;  %v3597_v1 = vld [vmem:[#allocation7 + $0x70] sm:$0xf0]  ;;  %v3584_v21 = vor.u32 %v4039_v14, %v3581_v16 }
 0x377   :  { %v1626_v36 = vmul.f32 %v4184_v55, %v1625_v40  ;;  %vm1672_vm11 = vcmp.eq.f32.partialorder %v1671_v3, 8.507059e+37  ;;  %2223 = vmatpush.bf16.msra.mxu1 %v3648_v27  ;;  %v3603_v3 = vld [vmem:[#allocation7 + $0x68] sm:$0xf]  ;;  %v4040_v23 = vld [vmem:[#allocation7 + $0x4c] sm:$0xf] }
 0x378   :  { %v1645_v45 = vmul.f32 %v4186_v32, %v1644_v41  ;;  %2236 = vmatpush.bf16.msra.mxu2 %v3652_v28  ;;  %v3636_v41 = vor.u32 %v4054_v59, %v3635_v38  ;;  %v3589_v26 = vld [vmem:[#allocation7 + $0x58] sm:$0xf0]  ;;  %v3563_v27 = vld [vmem:[#allocation7 + $0x20] sm:$0xf]  ;;  %v4037_v28 = vld [vmem:[#allocation7 + $0x2c] sm:$0xf0] }
 0x379   :  { %v4188_v39 = vpop.eup %4187  ;;  %v1627_v47 = vadd.f32 %v4184_v55, %v1626_v36  ;;  %v1688_v36 = vld [vmem:[#allocation4 + $0x50] sm:$0xff]  ;;  %v3592_v30 = vor.u32 %v4040_v23, %v3589_v26  ;;  %v3564_v31 = vor.u32 %v4037_v28, %v3563_v27  ;;  %v3573_v38 = vld [vmem:[#allocation7 + $0x38] sm:$0xf0]  ;;  %v4031_v44 = vld [vmem:[#allocation7 + $0x4] sm:$0xf] }
 0x37a   :  { %v1646_v49 = vadd.f32 %v4186_v32, %v1645_v45  ;;  %v1663_v50 = vmul.f32 %v4188_v39, %v1661_v35  ;;  %v4190_v53 = vpop.eup %4189  ;;  %vm1668_vm8 = vweird.f32 %v4188_v39  ;;  %v4053_v35 = vld [vmem:[#allocation7 + $0xac] sm:$0xf0]  ;;  %v3611_v45 = vld [vmem:[#allocation7 + $0x80] sm:$0xf] }
 0x37b   :  { %v1631_v52 = vsel %vm1630_vm4, %v4184_v55, %v1627_v47  ;;  %vm1669_vm10 = vmor %vm1667_vm9, %vm1668_vm8  ;;  %v4051_v55 = vld [vmem:[#allocation7 + $0xa4] sm:$0xf]  ;;  %v3628_v37 = vor.u32 %v4053_v35, %v3627_v34  ;;  %v3612_v47 = vor.u32 %v4049_v46, %v3611_v45  ;;  %v3565_v34 = vld [vmem:[#allocation7 + $0x30] sm:$0xf0] }
 0x37c   :  { %v1636_v54 = vsel %vm1633_vm6, %v1635_v48, %v1631_v52  ;;  %v1650_v56 = vsel %vm1649_vm5, %v4186_v32, %v1646_v49  ;;  %v1664_v57 = vsub.f32 1.0, %v1663_v50  ;;  %v3629_v32 = vld [vmem:[#allocation7 + $0xb0] sm:$0xf0]  ;;  %2237 = vmatpush.bf16.msra.mxu2 %v3636_v41  ;;  %v3619_v49 = vld [vmem:[#allocation7 + $0x88] sm:$0xf] }
 0x37d   :  { %v1655_v58 = vsel %vm1652_vm7, %v1654_v51, %v1650_v56  ;;  %v1679_v60 = vmul.f32 %v4190_v53, %v1636_v54  ;;  %v3632_v40 = vor.u32 %v4051_v55, %v3629_v32  ;;  %v3613_v48 = vld [vmem:[#allocation7 + $0x90] sm:$0xf0]  ;;  %v4050_v50 = vld [vmem:[#allocation7 + $0x94] sm:$0xf0]  ;;  %v4048_v53 = vld [vmem:[#allocation7 + $0x8c] sm:$0xf]  ;;  %v3568_v55 = vor.u32 %v4035_v33, %v3565_v34 }
 0x37e   :  { %v1678_v61 = vmul.f32 %v1655_v58, %v4414_v29  ;;  %v1665_v62 = vmul.f32 %v4188_v39, %v1664_v57  ;;  %v3659_v29 = vld [vmem:[#allocation7 + $0xe0] sm:$0xf]  ;;  %v3620_v52 = vor.u32 %v4050_v50, %v3619_v49  ;;  %v3621_v54 = vld [vmem:[#allocation7 + $0x98] sm:$0xf0]  ;;  %v1690_v57 = vunpack.c.l.bf16 %v1688_v36  ;;  %v3571_v35 = vld [vmem:[#allocation7 + $0x28] sm:$0xf] }
 0x37f   :  { %v3660_v11 = vor.u32 %v4061_v10, %v3659_v29  ;;  %2224 = vmatpush.bf16.msra.mxu1 %v3632_v40  ;;  %v3624_v56 = vor.u32 %v4048_v53, %v3621_v54  ;;  %v1691_v58 = vunpack.c.h.bf16 %v1688_v36  ;;  %v4425_v10 = vld [vmem:[#allocation4 + $0x58] sm:$0xff]  ;;  %v4036_v32 = vld [vmem:[#allocation7 + $0x2c] sm:$0xf]  ;;  %v4033_v36 = vld [vmem:[#allocation7 + $0xc] sm:$0xf0] }
 0x380   :  { %v4422_v63 = vadd.f32 %v1679_v60, %v1678_v61  ;;  %v1666_v0 = vadd.f32 %v4188_v39, %v1665_v62  ;;  %2238 = vmatpush.bf16.msra.mxu2 %v3620_v52  ;;  %v3595_v60 = vld [vmem:[#allocation7 + $0x60] sm:$0xf]  ;;  %v4045_v61 = vld [vmem:[#allocation7 + $0x6c] sm:$0xf0]  ;;  %v4043_v62 = vld [vmem:[#allocation7 + $0x64] sm:$0xf]  ;;  %v1693_v24 = vunpack.c.h.bf16 %v4425_v10  ;;  %v3576_v42 = vor.u32 %v4036_v32, %v3573_v38 }
 0x381   :  { %2209 = vmatpush.bf16.msra.mxu0 %v3660_v11  ;;  %2251 = vmatpush.bf16.msra.mxu3 %v3624_v56  ;;  %v3555_v49 = vld [vmem:[#allocation7 + $0x8] sm:$0xf]  ;;  %v4034_v50 = vld [vmem:[#allocation7 + $0x14] sm:$0xf0]  ;;  %v4032_v53 = vld [vmem:[#allocation7 + $0xc] sm:$0xf] }
 0x382   :  { %4191 = vtanh.f32 %v4422_v63  ;;  %v1670_v4 = vsel %vm1669_vm10, %v4188_v39, %v1666_v0  ;;  %v4047_v39 = vld [vmem:[#allocation7 + $0x84] sm:$0xf]  ;;  %v3596_v0 = vor.u32 %v4045_v61, %v3595_v60  ;;  %v3556_v52 = vor.u32 %v4034_v50, %v3555_v49  ;;  %v3557_v54 = vld [vmem:[#allocation7 + $0x18] sm:$0xf0]  ;;  %v4092_v49 = vld [vmem:[#allocation7 + $0xec] sm:$0xf] }
 0x383   :  { %v1675_v7 = vsel %vm1672_vm11, %v1674_v5, %v1670_v4  ;;  %v3616_v51 = vor.u32 %v4047_v39, %v3613_v48  ;;  %v4046_v4 = vld [vmem:[#allocation7 + $0x74] sm:$0xf0]  ;;  %v3600_v5 = vor.u32 %v4043_v62, %v3597_v1  ;;  %v3549_v48 = vld [vmem:[#allocation7 + $0x10] sm:$0xf0]  ;;  %v3800_v50 = vld [vmem:[#allocation7 + $0xf8] sm:$0xf0] }
 0x385   :  { %2210 = vmatpush.bf16.msra.mxu0 %v3644_v22  ;;  %2225 = vmatpush.bf16.msra.mxu1 %v3616_v51  ;;  %v3588_v22 = vor.u32 %v4042_v18, %v3587_v17  ;;  %v3552_v51 = vor.u32 %v4031_v44, %v3549_v48 }
 0x388   :  { %v4192_v25 = vpop.eup %4191 }
 0x389   :  { %v1682_v8 = vmul.f32 %v4192_v25, %v1675_v7  ;;  %2211 = vmatpush.bf16.msra.mxu0 %v3628_v37  ;;  %v3604_v25 = vor.u32 %v4046_v4, %v3603_v3  ;;  %v4044_v7 = vld [vmem:[#allocation7 + $0x6c] sm:$0xf]  ;;  %2226 = vmatpush.bf16.msra.mxu1 %v3600_v5  ;;  %v4038_v37 = vld [vmem:[#allocation7 + $0x34] sm:$0xf0]  ;;  %v1692_v3 = vunpack.c.l.bf16 %v4425_v10 }
 0x38a   :  { %v3572_v41 = vor.u32 %v4038_v37, %v3571_v35 }
 0x38b   :  { %v1686_v9 = vpack.c.bf16 %v1682_v8, %v1682_v8  ;;  %v3605_v8 = vld [vmem:[#allocation7 + $0x78] sm:$0xf0]  ;;  %2239 = vmatpush.bf16.msra.mxu2 %v3604_v25 }
 0x38c   :  { %v3608_v2 = vor.u32 %v4044_v7, %v3605_v8 }
 0x38d   :  { %1894 = vmatmul.bf16.vlgmr.msrb.gmra.mxu0 %v1686_v9  ;;  %1907 = vmatmul.bf16.vlgmr.msrb.gmra.mxu1 %v1686_v9 }
 0x38e   :  { %1920 = vmatmul.bf16.vlgmr.msrb.gmra.mxu2 %v1686_v9  ;;  %1933 = vmatmul.bf16.vlgmr.msrb.gmra.mxu3 %v1686_v9 }
 0x38f   :  { %2212 = vmatpush.bf16.msra.mxu0 %v3612_v47  ;;  %2252 = vmatpush.bf16.msra.mxu3 %v3608_v2  ;;  %v3548_v47 = vor.u32 %v4033_v36, %v3547_v43  ;;  %v4093_v43 = vld [vmem:[#allocation7 + $0xec] sm:$0xf0]  ;;  %v4091_v36 = vld [vmem:[#allocation7 + $0xe4] sm:$0xf] }
 0x390   :  { %2227 = vmatpush.bf16.msra.mxu1 %v3584_v21  ;;  %2240 = vmatpush.bf16.msra.mxu2 %v3588_v22 }
 0x393   :  { %2213 = vmatpush.bf16.msra.mxu0 %v3596_v0  ;;  %2253 = vmatpush.bf16.msra.mxu3 %v3592_v30 }
 0x394   :  { %2228 = vmatpush.bf16.msra.mxu1 %v3568_v55  ;;  %2241 = vmatpush.bf16.msra.mxu2 %v3572_v41 }
 0x397   :  { %2214 = vmatpush.bf16.msra.mxu0 %v3580_v15  ;;  %2254 = vmatpush.bf16.msra.mxu3 %v3576_v42 }
 0x398   :  { %2229 = vmatpush.bf16.msra.mxu1 %v3552_v51  ;;  %2242 = vmatpush.bf16.msra.mxu2 %v3556_v52  ;;  %v3803_v51 = vor.u32 %v4092_v49, %v3800_v50  ;;  %v3774_v52 = vld [vmem:[#allocation7 + $0xc0] sm:$0xf]  ;;  %v3712_v49 = vld [vmem:[#allocation7 + $0x50] sm:$0xf0]  ;;  %v3718_v50 = vld [vmem:[#allocation7 + $0x48] sm:$0xf] }
 0x39b   :  { %2215 = vmatpush.bf16.msra.mxu0 %v3564_v31 }
 0x39f   :  { %2216 = vmatpush.bf16.msra.mxu0 %v3548_v47 }
 0x40a   :  { %v1895_v9 = vpop.f32.mrf.mxu0  ;;  %v1908_v29 = vpop.f32.mrf.mxu1 }
 0x40b   :  { %v1938_v11 = vadd.f32 %v1895_v9, %v1690_v57  ;;  %v1939_v12 = vadd.f32 %v1908_v29, %v1691_v58  ;;  %v3560_v58 = vor.u32 %v4032_v53, %v3557_v54  ;;  %v4089_v53 = vld [vmem:[#allocation7 + $0xcc] sm:$0xf0]  ;;  %v4087_v54 = vld [vmem:[#allocation7 + $0xc4] sm:$0xf] }
 0x40d   :  { %v3542_v19 = vmul.f32 -1.442695, %v1938_v11  ;;  %v3543_v20 = vmul.f32 -1.442695, %v1939_v12  ;;  %2255 = vmatpush.bf16.msra.mxu3 %v3560_v58  ;;  %v3782_v58 = vld [vmem:[#allocation7 + $0xc8] sm:$0xf] }
 0x40f   :  { %4193 = vpow2.f32 %v3542_v19 }
 0x410   :  { %4195 = vpow2.f32 %v3543_v20 }
 0x411   :  { %v1921_v59 = vpop.f32.mrf.mxu2  ;;  %v1934_v40 = vpop.f32.mrf.mxu3  ;;  %2571 = vmatpush.bf16.msrb.mxu3 %v3803_v51  ;;  %v4074_v51 = vld [vmem:[#allocation7 + $0x54] sm:$0xf0] }
 0x412   :  { %v1941_v45 = vadd.f32 %v1934_v40, %v1693_v24  ;;  %v1897_v46 = vpop.f32.mrf.mxu0  ;;  %v1910_v39 = vpop.f32.mrf.mxu1  ;;  %v1940_v7 = vadd.f32 %v1921_v59, %v1692_v3 }
 0x413   :  { %v3798_v46 = vld [vmem:[#allocation7 + $0xe8] sm:$0xf]  ;;  %v4094_v39 = vld [vmem:[#allocation7 + $0xf4] sm:$0xf0] }
 0x414   :  { %v3544_v56 = vmul.f32 -1.442695, %v1941_v45  ;;  %v3792_v45 = vld [vmem:[#allocation7 + $0xf0] sm:$0xf0]  ;;  %v3799_v48 = vor.u32 %v4094_v39, %v3798_v46  ;;  %v3710_v46 = vld [vmem:[#allocation7 + $0x40] sm:$0xf] }
 0x415   :  { %v4194_v57 = vpop.eup %4193  ;;  %v3795_v47 = vor.u32 %v4091_v36, %v3792_v45  ;;  %v4073_v39 = vld [vmem:[#allocation7 + $0x4c] sm:$0xf0] }
 0x416   :  { %v4196_v60 = vpop.eup %4195  ;;  %v1945_v61 = vadd.f32 1.0, %v4194_v57  ;;  %4197 = vpow2.f32 %v3544_v56  ;;  %2558 = vmatpush.bf16.msrb.mxu2 %v3799_v48  ;;  %v3775_v56 = vor.u32 %v4089_v53, %v3774_v52  ;;  %v3776_v57 = vld [vmem:[#allocation7 + $0xd0] sm:$0xf0]  ;;  %v3711_v48 = vor.u32 %v4073_v39, %v3710_v46 }
 0x417   :  { %v1964_v62 = vadd.f32 1.0, %v4196_v60  ;;  %2545 = vmatpush.bf16.msrb.mxu1 %v3795_v47  ;;  %v4090_v60 = vld [vmem:[#allocation7 + $0xd4] sm:$0xf0]  ;;  %v4071_v47 = vld [vmem:[#allocation7 + $0x44] sm:$0xf] }
 0x418   :  { %4199 = vrcp.f32 %v1945_v61  ;;  %v1957_v12 = vand.u32 2147483648, %v1945_v61  ;;  %v1955_v14 = vand.u32 2147483647, %v1945_v61  ;;  %vm1951_vm14 = vweird.f32 %v1945_v61 }
 0x419   :  { %4201 = vrcp.f32 %v1964_v62  ;;  %v1923_v0 = vpop.f32.mrf.mxu2  ;;  %v1936_v1 = vpop.f32.mrf.mxu3  ;;  %v1976_v13 = vand.u32 2147483648, %v1964_v62  ;;  %v1974_v16 = vand.u32 2147483647, %v1964_v62  ;;  %vm1970_vm15 = vweird.f32 %v1964_v62 }
 0x41a   :  { %v1958_v18 = vor.u32 1.1754944e-38, %v1957_v12  ;;  %vm1956_vm2 = vcmp.eq.f32.partialorder %v1955_v14, 8.507059e+37  ;;  %v4088_v0 = vld [vmem:[#allocation7 + $0xcc] sm:$0xf]  ;;  %v3784_v1 = vld [vmem:[#allocation7 + $0xd8] sm:$0xf0] }
 0x41b   :  { %v1977_v21 = vor.u32 1.1754944e-38, %v1976_v13  ;;  %vm1975_vm3 = vcmp.eq.f32.partialorder %v1974_v16, 8.507059e+37  ;;  %v3787_v3 = vor.u32 %v4088_v0, %v3784_v1  ;;  %v4084_v12 = vld [vmem:[#allocation7 + $0xac] sm:$0xf]  ;;  %v3768_v13 = vld [vmem:[#allocation7 + $0xb8] sm:$0xf0] }
 0x41c   :  { %v4198_v4 = vpop.eup %4197  ;;  %v3771_v14 = vor.u32 %v4084_v12, %v3768_v13  ;;  %v4081_v16 = vld [vmem:[#allocation7 + $0x8c] sm:$0xf0]  ;;  %v3678_v13 = vld [vmem:[#allocation7] sm:$0xf] }
 0x41d   :  { %v1984_v5 = vadd.f32 1.0, %v4198_v4  ;;  %v3758_v4 = vld [vmem:[#allocation7 + $0xa0] sm:$0xf]  ;;  %2572 = vmatpush.bf16.msrb.mxu3 %v3787_v3  ;;  %v4067_v3 = vld [vmem:[#allocation7 + $0x24] sm:$0xf] }
 0x41e   :  { %v4200_v25 = vpop.eup %4199 }
 0x41f   :  { %v4202_v8 = vpop.eup %4201  ;;  %v1947_v9 = vmul.f32 %v4200_v25, %v1945_v61  ;;  %4203 = vrcp.f32 %v1984_v5  ;;  %vm1952_vm12 = vweird.f32 %v4200_v25  ;;  %v1996_v55 = vand.u32 2147483648, %v1984_v5 }
 0x420   :  { %v1966_v29 = vmul.f32 %v4202_v8, %v1964_v62  ;;  %4205 = vtanh.f32 %v1940_v7  ;;  %vm1971_vm13 = vweird.f32 %v4202_v8  ;;  %vm1953_vm0 = vmor %vm1951_vm14, %vm1952_vm12  ;;  %vm1990_vm5 = vweird.f32 %v1984_v5 }
 0x421   :  { %v1948_v2 = vsub.f32 1.0, %v1947_v9  ;;  %vm1972_vm1 = vmor %vm1970_vm15, %vm1971_vm13  ;;  %v1994_v37 = vand.u32 2147483647, %v1984_v5  ;;  %v1997_v38 = vor.u32 1.1754944e-38, %v1996_v55  ;;  %v3779_v61 = vor.u32 %v4087_v54, %v3776_v57  ;;  %v3766_v9 = vld [vmem:[#allocation7 + $0xa8] sm:$0xf]  ;;  %2573 = vmatpush.bf16.msrb.mxu3 %v3771_v14 }
 0x422   :  { %v1967_v11 = vsub.f32 1.0, %v1966_v29  ;;  %v3783_v62 = vor.u32 %v4090_v60, %v3782_v58  ;;  %v4086_v29 = vld [vmem:[#allocation7 + $0xb4] sm:$0xf0]  ;;  %v3728_v55 = vld [vmem:[#allocation7 + $0x70] sm:$0xf0]  ;;  %v3715_v54 = vor.u32 %v4071_v47, %v3712_v49 }
 0x423   :  { %v1949_v6 = vmul.f32 %v4200_v25, %v1948_v2  ;;  %vm1995_vm7 = vcmp.eq.f32.partialorder %v1994_v37, 8.507059e+37  ;;  %2546 = vmatpush.bf16.msrb.mxu1 %v3779_v61  ;;  %v3734_v37 = vld [vmem:[#allocation7 + $0x68] sm:$0xf]  ;;  %v4072_v57 = vld [vmem:[#allocation7 + $0x4c] sm:$0xf] }
 0x424   :  { %v1968_v15 = vmul.f32 %v4202_v8, %v1967_v11  ;;  %2559 = vmatpush.bf16.msrb.mxu2 %v3783_v62  ;;  %v3767_v11 = vor.u32 %v4086_v29, %v3766_v9  ;;  %v3720_v60 = vld [vmem:[#allocation7 + $0x58] sm:$0xf0]  ;;  %v3694_v61 = vld [vmem:[#allocation7 + $0x20] sm:$0xf]  ;;  %v4069_v62 = vld [vmem:[#allocation7 + $0x2c] sm:$0xf0] }
 0x425   :  { %v4204_v10 = vpop.eup %4203  ;;  %v1950_v17 = vadd.f32 %v4200_v25, %v1949_v6  ;;  %v2011_v6 = vld [vmem:[#allocation4 + $0x60] sm:$0xff]  ;;  %v3723_v0 = vor.u32 %v4072_v57, %v3720_v60  ;;  %v3695_v1 = vor.u32 %v4069_v62, %v3694_v61  ;;  %v3704_v9 = vld [vmem:[#allocation7 + $0x38] sm:$0xf0] }
 0x426   :  { %v1969_v19 = vadd.f32 %v4202_v8, %v1968_v15  ;;  %v1986_v20 = vmul.f32 %v4204_v10, %v1984_v5  ;;  %v4206_v23 = vpop.eup %4205  ;;  %vm1991_vm4 = vweird.f32 %v4204_v10  ;;  %v4085_v5 = vld [vmem:[#allocation7 + $0xac] sm:$0xf0]  ;;  %v3742_v15 = vld [vmem:[#allocation7 + $0x80] sm:$0xf]  ;;  %v4063_v14 = vld [vmem:[#allocation7 + $0x4] sm:$0xf] }
 0x427   :  { %v1954_v22 = vsel %vm1953_vm0, %v4200_v25, %v1950_v17  ;;  %vm1992_vm6 = vmor %vm1990_vm5, %vm1991_vm4  ;;  %v4083_v25 = vld [vmem:[#allocation7 + $0xa4] sm:$0xf]  ;;  %v3759_v7 = vor.u32 %v4085_v5, %v3758_v4  ;;  %v3743_v17 = vor.u32 %v4081_v16, %v3742_v15  ;;  %v3696_v4 = vld [vmem:[#allocation7 + $0x30] sm:$0xf0] }
 0x428   :  { %v1959_v24 = vsel %vm1956_vm2, %v1958_v18, %v1954_v22  ;;  %v1973_v26 = vsel %vm1972_vm1, %v4202_v8, %v1969_v19  ;;  %v1987_v27 = vsub.f32 1.0, %v1986_v20  ;;  %v3760_v8 = vld [vmem:[#allocation7 + $0xb0] sm:$0xf0]  ;;  %2560 = vmatpush.bf16.msrb.mxu2 %v3767_v11  ;;  %v3750_v19 = vld [vmem:[#allocation7 + $0x88] sm:$0xf] }
 0x429   :  { %v1978_v28 = vsel %vm1975_vm3, %v1977_v21, %v1973_v26  ;;  %v2002_v30 = vmul.f32 %v4206_v23, %v1959_v24  ;;  %v3763_v2 = vor.u32 %v4083_v25, %v3760_v8  ;;  %v3744_v18 = vld [vmem:[#allocation7 + $0x90] sm:$0xf0]  ;;  %v4082_v20 = vld [vmem:[#allocation7 + $0x94] sm:$0xf0]  ;;  %v4080_v23 = vld [vmem:[#allocation7 + $0x8c] sm:$0xf]  ;;  %v3699_v25 = vor.u32 %v4067_v3, %v3696_v4 }
 0x42a   :  { %v2001_v31 = vmul.f32 %v1978_v28, %v4422_v63  ;;  %v1988_v33 = vmul.f32 %v4204_v10, %v1987_v27  ;;  %v3790_v63 = vld [vmem:[#allocation7 + $0xe0] sm:$0xf]  ;;  %v3751_v22 = vor.u32 %v4082_v20, %v3750_v19  ;;  %v3752_v24 = vld [vmem:[#allocation7 + $0x98] sm:$0xf0]  ;;  %v2013_v27 = vunpack.c.l.bf16 %v2011_v6  ;;  %v3702_v5 = vld [vmem:[#allocation7 + $0x28] sm:$0xf] }
 0x42b   :  { %v3791_v44 = vor.u32 %v4093_v43, %v3790_v63  ;;  %2547 = vmatpush.bf16.msrb.mxu1 %v3763_v2  ;;  %v3755_v26 = vor.u32 %v4080_v23, %v3752_v24  ;;  %v2014_v28 = vunpack.c.h.bf16 %v2011_v6  ;;  %v4433_v43 = vld [vmem:[#allocation4 + $0x68] sm:$0xff]  ;;  %v4065_v6 = vld [vmem:[#allocation7 + $0xc] sm:$0xf0]  ;;  %v4066_v20 = vld [vmem:[#allocation7 + $0x14] sm:$0xf0] }
 0x42c   :  { %v4430_v34 = vadd.f32 %v2002_v30, %v2001_v31  ;;  %v1989_v35 = vadd.f32 %v4204_v10, %v1988_v33  ;;  %2561 = vmatpush.bf16.msrb.mxu2 %v3751_v22  ;;  %v3726_v30 = vld [vmem:[#allocation7 + $0x60] sm:$0xf]  ;;  %v4077_v31 = vld [vmem:[#allocation7 + $0x6c] sm:$0xf0]  ;;  %v4075_v33 = vld [vmem:[#allocation7 + $0x64] sm:$0xf]  ;;  %v2016_v58 = vunpack.c.h.bf16 %v4433_v43 }
 0x42d   :  { %2532 = vmatpush.bf16.msrb.mxu0 %v3791_v44  ;;  %2574 = vmatpush.bf16.msrb.mxu3 %v3755_v26  ;;  %v4068_v8 = vld [vmem:[#allocation7 + $0x2c] sm:$0xf]  ;;  %v3686_v19 = vld [vmem:[#allocation7 + $0x8] sm:$0xf]  ;;  %v3688_v24 = vld [vmem:[#allocation7 + $0x18] sm:$0xf0] }
 0x42e   :  { %4207 = vtanh.f32 %v4430_v34  ;;  %v1993_v32 = vsel %vm1992_vm6, %v4204_v10, %v1989_v35  ;;  %v4079_v10 = vld [vmem:[#allocation7 + $0x84] sm:$0xf]  ;;  %v3727_v35 = vor.u32 %v4077_v31, %v3726_v30  ;;  %v3707_v12 = vor.u32 %v4068_v8, %v3704_v9  ;;  %v4064_v23 = vld [vmem:[#allocation7 + $0xc] sm:$0xf] }
 0x42f   :  { %v1998_v40 = vsel %vm1995_vm7, %v1997_v38, %v1993_v32  ;;  %v3747_v21 = vor.u32 %v4079_v10, %v3744_v18  ;;  %v4078_v32 = vld [vmem:[#allocation7 + $0x74] sm:$0xf0]  ;;  %v3731_v38 = vor.u32 %v4075_v33, %v3728_v55  ;;  %v3680_v18 = vld [vmem:[#allocation7 + $0x10] sm:$0xf0]  ;;  %v3687_v22 = vor.u32 %v4066_v20, %v3686_v19 }
 0x431   :  { %2533 = vmatpush.bf16.msrb.mxu0 %v3775_v56  ;;  %2548 = vmatpush.bf16.msrb.mxu1 %v3747_v21  ;;  %v3719_v56 = vor.u32 %v4074_v51, %v3718_v50  ;;  %v3683_v21 = vor.u32 %v4063_v14, %v3680_v18  ;;  %v2334_v14 = vld [vmem:[#allocation4 + $0x70] sm:$0xff] }
 0x434   :  { %v4208_v59 = vpop.eup %4207 }
 0x435   :  { %v2005_v41 = vmul.f32 %v4208_v59, %v1998_v40  ;;  %2534 = vmatpush.bf16.msrb.mxu0 %v3759_v7  ;;  %v3735_v59 = vor.u32 %v4078_v32, %v3734_v37  ;;  %v4076_v40 = vld [vmem:[#allocation7 + $0x6c] sm:$0xf]  ;;  %2549 = vmatpush.bf16.msrb.mxu1 %v3731_v38  ;;  %v4070_v7 = vld [vmem:[#allocation7 + $0x34] sm:$0xf0]  ;;  %v2015_v37 = vunpack.c.l.bf16 %v4433_v43 }
 0x436   :  { %v3703_v11 = vor.u32 %v4070_v7, %v3702_v5 }
 0x437   :  { %v2009_v42 = vpack.c.bf16 %v2005_v41, %v2005_v41  ;;  %v3736_v41 = vld [vmem:[#allocation7 + $0x78] sm:$0xf0]  ;;  %2562 = vmatpush.bf16.msrb.mxu2 %v3735_v59 }
 0x438   :  { %v3739_v36 = vor.u32 %v4076_v40, %v3736_v41 }
 0x439   :  { %2217 = vmatmul.bf16.vlgmr.msra.gmra.mxu0 %v2009_v42  ;;  %2230 = vmatmul.bf16.vlgmr.msra.gmra.mxu1 %v2009_v42 }
 0x43a   :  { %2243 = vmatmul.bf16.vlgmr.msra.gmra.mxu2 %v2009_v42  ;;  %2256 = vmatmul.bf16.vlgmr.msra.gmra.mxu3 %v2009_v42 }
 0x43b   :  { %2535 = vmatpush.bf16.msrb.mxu0 %v3743_v17  ;;  %2575 = vmatpush.bf16.msrb.mxu3 %v3739_v36  ;;  %v3679_v17 = vor.u32 %v4065_v6, %v3678_v13  ;;  %v4101_v13 = vld [vmem:[#allocation9 + $0x30] sm:$0xff]  ;;  %v4100_v6 = vld [vmem:[#allocation9 + $0x28] sm:$0xff] }
 0x43c   :  { %2550 = vmatpush.bf16.msrb.mxu1 %v3715_v54  ;;  %2563 = vmatpush.bf16.msrb.mxu2 %v3719_v56 }
 0x43f   :  { %2536 = vmatpush.bf16.msrb.mxu0 %v3727_v35  ;;  %2576 = vmatpush.bf16.msrb.mxu3 %v3723_v0 }
 0x440   :  { %2551 = vmatpush.bf16.msrb.mxu1 %v3699_v25  ;;  %2564 = vmatpush.bf16.msrb.mxu2 %v3703_v11 }
 0x443   :  { %2537 = vmatpush.bf16.msrb.mxu0 %v3711_v48  ;;  %2577 = vmatpush.bf16.msrb.mxu3 %v3707_v12 }
 0x444   :  { %2552 = vmatpush.bf16.msrb.mxu1 %v3683_v21  ;;  %2565 = vmatpush.bf16.msrb.mxu2 %v3687_v22  ;;  %v2335_v22 = vld [vmem:[#allocation4 + $0x78] sm:$0xff] }
 0x447   :  { %2538 = vmatpush.bf16.msrb.mxu0 %v3695_v1 }
 0x44b   :  { %2539 = vmatpush.bf16.msrb.mxu0 %v3679_v17  ;;  %v4098_v17 = vld [vmem:[#allocation9 + $0x18] sm:$0xff] }
 0x4b6   :  { %v2218_v42 = vpop.f32.mrf.mxu0  ;;  %v2231_v63 = vpop.f32.mrf.mxu1 }
 0x4b7   :  { %v2261_v44 = vadd.f32 %v2218_v42, %v2013_v27  ;;  %v2262_v45 = vadd.f32 %v2231_v63, %v2014_v28  ;;  %v3691_v28 = vor.u32 %v4064_v23, %v3688_v24  ;;  %v4097_v23 = vld [vmem:[#allocation9 + $0x10] sm:$0xff] }
 0x4b9   :  { %v3673_v52 = vmul.f32 -1.442695, %v2261_v44  ;;  %v3674_v53 = vmul.f32 -1.442695, %v2262_v45  ;;  %2578 = vmatpush.bf16.msrb.mxu3 %v3691_v28  ;;  %v4096_v28 = vld [vmem:[#allocation9 + $0x8] sm:$0xff] }
 0x4bb   :  { %4209 = vpow2.f32 %v3673_v52 }
 0x4bc   :  { %4211 = vpow2.f32 %v3674_v53 }
 0x4bd   :  { %v2244_v29 = vpop.f32.mrf.mxu2  ;;  %v2257_v2 = vpop.f32.mrf.mxu3 }
 0x4be   :  { %v2264_v15 = vadd.f32 %v2257_v2, %v2016_v58  ;;  %v2220_v16 = vpop.f32.mrf.mxu0  ;;  %v2233_v10 = vpop.f32.mrf.mxu1  ;;  %v2263_v40 = vadd.f32 %v2244_v29, %v2015_v37  ;;  %v4095_v37 = vld [vmem:[#allocation9] sm:$0xff] }
 0x4bf   :  { %v2336_v16 = vunpack.c.l.bf16 %v2334_v14  ;;  %v2337_v10 = vunpack.c.h.bf16 %v2334_v14 }
 0x4c0   :  { %v3675_v26 = vmul.f32 -1.442695, %v2264_v15  ;;  %v4099_v15 = vld [vmem:[#allocation9 + $0x20] sm:$0xff] }
 0x4c1   :  { %v4210_v27 = vpop.eup %4209 }
 0x4c2   :  { %v4212_v30 = vpop.eup %4211  ;;  %v2268_v31 = vadd.f32 1.0, %v4210_v27  ;;  %4213 = vpow2.f32 %v3675_v26  ;;  %v2339_v27 = vunpack.c.h.bf16 %v2335_v22 }
 0x4c3   :  { %v2287_v33 = vadd.f32 1.0, %v4212_v30 }
 0x4c4   :  { %4215 = vrcp.f32 %v2268_v31  ;;  %v2280_v45 = vand.u32 2147483648, %v2268_v31  ;;  %v2278_v47 = vand.u32 2147483647, %v2268_v31  ;;  %vm2274_vm10 = vweird.f32 %v2268_v31 }
 0x4c5   :  { %4217 = vrcp.f32 %v2287_v33  ;;  %v2246_v35 = vpop.f32.mrf.mxu2  ;;  %v2259_v55 = vpop.f32.mrf.mxu3  ;;  %v2299_v46 = vand.u32 2147483648, %v2287_v33  ;;  %v2297_v49 = vand.u32 2147483647, %v2287_v33  ;;  %vm2293_vm11 = vweird.f32 %v2287_v33 }
 0x4c6   :  { %v2281_v51 = vor.u32 1.1754944e-38, %v2280_v45  ;;  %vm2279_vm14 = vcmp.eq.f32.partialorder %v2278_v47, 8.507059e+37 }
 0x4c7   :  { %v2300_v54 = vor.u32 1.1754944e-38, %v2299_v46  ;;  %vm2298_vm15 = vcmp.eq.f32.partialorder %v2297_v49, 8.507059e+37 }
 0x4c8   :  { %v4214_v32 = vpop.eup %4213 }
 0x4c9   :  { %v2307_v38 = vadd.f32 1.0, %v4214_v32 }
 0x4ca   :  { %v4216_v59 = vpop.eup %4215 }
 0x4cb   :  { %v4218_v41 = vpop.eup %4217  ;;  %v2270_v42 = vmul.f32 %v4216_v59, %v2268_v31  ;;  %4219 = vrcp.f32 %v2307_v38  ;;  %vm2275_vm8 = vweird.f32 %v4216_v59  ;;  %v2319_v25 = vand.u32 2147483648, %v2307_v38 }
 0x4cc   :  { %v2289_v63 = vmul.f32 %v4218_v41, %v2287_v33  ;;  %4221 = vtanh.f32 %v2263_v40  ;;  %vm2294_vm9 = vweird.f32 %v4218_v41  ;;  %vm2276_vm12 = vmor %vm2274_vm10, %vm2275_vm8  ;;  %vm2313_vm1 = vweird.f32 %v2307_v38 }
 0x4cd   :  { %v2271_v36 = vsub.f32 1.0, %v2270_v42  ;;  %vm2295_vm13 = vmor %vm2293_vm11, %vm2294_vm9  ;;  %v2317_v7 = vand.u32 2147483647, %v2307_v38  ;;  %v2320_v9 = vor.u32 1.1754944e-38, %v2319_v25 }
 0x4ce   :  { %v2290_v44 = vsub.f32 1.0, %v2289_v63 }
 0x4cf   :  { %v2272_v39 = vmul.f32 %v4216_v59, %v2271_v36  ;;  %vm2318_vm3 = vcmp.eq.f32.partialorder %v2317_v7, 8.507059e+37  ;;  %v2338_v36 = vunpack.c.l.bf16 %v2335_v22 }
 0x4d0   :  { %v2291_v48 = vmul.f32 %v4218_v41, %v2290_v44 }
 0x4d1   :  { %v4220_v43 = vpop.eup %4219  ;;  %v2273_v50 = vadd.f32 %v4216_v59, %v2272_v39 }
 0x4d2   :  { %v2292_v52 = vadd.f32 %v4218_v41, %v2291_v48  ;;  %v2309_v53 = vmul.f32 %v4220_v43, %v2307_v38  ;;  %v4222_v57 = vpop.eup %4221  ;;  %vm2314_vm0 = vweird.f32 %v4220_v43 }
 0x4d3   :  { %v2277_v56 = vsel %vm2276_vm12, %v4216_v59, %v2273_v50  ;;  %vm2315_vm2 = vmor %vm2313_vm1, %vm2314_vm0 }
 0x4d4   :  { %v2282_v58 = vsel %vm2279_vm14, %v2281_v51, %v2277_v56  ;;  %v2296_v60 = vsel %vm2295_vm13, %v4218_v41, %v2292_v52  ;;  %v2310_v61 = vsub.f32 1.0, %v2309_v53 }
 0x4d5   :  { %v2301_v62 = vsel %vm2298_vm15, %v2300_v54, %v2296_v60  ;;  %v2325_v0 = vmul.f32 %v4222_v57, %v2282_v58 }
 0x4d6   :  { %v2324_v1 = vmul.f32 %v2301_v62, %v4430_v34  ;;  %v2311_v3 = vmul.f32 %v4220_v43, %v2310_v61  ;;  %v4102_v34 = vld [vmem:[#allocation9 + $0x38] sm:$0xff] }
 0x4d7   :  { %2727 = vmatpush.bf16.msra.mxu0 %v4102_v34 }
 0x4d8   :  { %v4438_v4 = vadd.f32 %v2325_v0, %v2324_v1  ;;  %v2312_v5 = vadd.f32 %v4220_v43, %v2311_v3 }
 0x4da   :  { %4223 = vtanh.f32 %v4438_v4  ;;  %v2316_v8 = vsel %vm2315_vm2, %v4220_v43, %v2312_v5 }
 0x4db   :  { %v2321_v2 = vsel %vm2318_vm3, %v2320_v9, %v2316_v8  ;;  %2728 = vmatpush.bf16.msra.mxu0 %v4101_v13 }
 0x4df   :  { %2729 = vmatpush.bf16.msra.mxu0 %v4100_v6 }
 0x4e0   :  { %v4224_v29 = vpop.eup %4223 }
 0x4e1   :  { %v2328_v11 = vmul.f32 %v4224_v29, %v2321_v2 }
 0x4e3   :  { %v2332_v12 = vpack.c.bf16 %v2328_v11, %v2328_v11  ;;  %2730 = vmatpush.bf16.msra.mxu0 %v4099_v15 }
 0x4e5   :  { %2540 = vmatmul.bf16.vlgmr.msrb.gmra.mxu0 %v2332_v12  ;;  %2553 = vmatmul.bf16.vlgmr.msrb.gmra.mxu1 %v2332_v12 }
 0x4e6   :  { %2566 = vmatmul.bf16.vlgmr.msrb.gmra.mxu2 %v2332_v12  ;;  %2579 = vmatmul.bf16.vlgmr.msrb.gmra.mxu3 %v2332_v12 }
 0x4e7   :  { %2731 = vmatpush.bf16.msra.mxu0 %v4098_v17 }
 0x4eb   :  { %2732 = vmatpush.bf16.msra.mxu0 %v4097_v23 }
 0x4ef   :  { %2733 = vmatpush.bf16.msra.mxu0 %v4096_v28 }
 0x4f3   :  { %2734 = vmatpush.bf16.msra.mxu0 %v4095_v37 }
 0x562   :  { %v2541_v18 = vpop.f32.mrf.mxu0  ;;  %v2554_v19 = vpop.f32.mrf.mxu1 }
 0x563   :  { %v2584_v20 = vadd.f32 %v2541_v18, %v2336_v16  ;;  %v2585_v21 = vadd.f32 %v2554_v19, %v2337_v10 }
 0x565   :  { %v3804_v24 = vmul.f32 -1.442695, %v2584_v20  ;;  %v3805_v26 = vmul.f32 -1.442695, %v2585_v21 }
 0x567   :  { %4225 = vpow2.f32 %v3804_v24 }
 0x568   :  { %4227 = vpow2.f32 %v3805_v26 }
 0x569   :  { %v2567_v30 = vpop.f32.mrf.mxu2  ;;  %v2580_v31 = vpop.f32.mrf.mxu3 }
 0x56a   :  { %v2587_v33 = vadd.f32 %v2580_v31, %v2339_v27  ;;  %v2543_v35 = vpop.f32.mrf.mxu0  ;;  %v2556_v55 = vpop.f32.mrf.mxu1  ;;  %v2586_v39 = vadd.f32 %v2567_v30, %v2338_v36 }
 0x56c   :  { %v3806_v32 = vmul.f32 -1.442695, %v2587_v33 }
 0x56d   :  { %v4226_v38 = vpop.eup %4225 }
 0x56e   :  { %v4228_v59 = vpop.eup %4227  ;;  %v2591_v40 = vadd.f32 1.0, %v4226_v38  ;;  %4229 = vpow2.f32 %v3806_v32 }
 0x56f   :  { %v2610_v41 = vadd.f32 1.0, %v4228_v59 }
 0x570   :  { %4231 = vrcp.f32 %v2591_v40  ;;  %v2603_v51 = vand.u32 2147483648, %v2591_v40  ;;  %v2601_v54 = vand.u32 2147483647, %v2591_v40  ;;  %vm2597_vm6 = vweird.f32 %v2591_v40 }
 0x571   :  { %4233 = vrcp.f32 %v2610_v41  ;;  %v2569_v42 = vpop.f32.mrf.mxu2  ;;  %v2582_v63 = vpop.f32.mrf.mxu3  ;;  %v2622_v52 = vand.u32 2147483648, %v2610_v41  ;;  %v2620_v57 = vand.u32 2147483647, %v2610_v41  ;;  %vm2616_vm7 = vweird.f32 %v2610_v41 }
 0x572   :  { %v2604_v61 = vor.u32 1.1754944e-38, %v2603_v51  ;;  %vm2602_vm10 = vcmp.eq.f32.partialorder %v2601_v54, 8.507059e+37 }
 0x573   :  { %v2623_v1 = vor.u32 1.1754944e-38, %v2622_v52  ;;  %vm2621_vm11 = vcmp.eq.f32.partialorder %v2620_v57, 8.507059e+37 }
 0x574   :  { %v4230_v44 = vpop.eup %4229 }
 0x575   :  { %v2630_v45 = vadd.f32 1.0, %v4230_v44 }
 0x576   :  { %v4232_v46 = vpop.eup %4231 }
 0x577   :  { %v4234_v47 = vpop.eup %4233  ;;  %v2593_v48 = vmul.f32 %v4232_v46, %v2591_v40  ;;  %4235 = vrcp.f32 %v2630_v45  ;;  %vm2598_vm4 = vweird.f32 %v4232_v46  ;;  %v2642_v13 = vand.u32 2147483648, %v2630_v45 }
 0x578   :  { %v2612_v49 = vmul.f32 %v4234_v47, %v2610_v41  ;;  %4237 = vtanh.f32 %v2586_v39  ;;  %vm2617_vm5 = vweird.f32 %v4234_v47  ;;  %vm2599_vm8 = vmor %vm2597_vm6, %vm2598_vm4  ;;  %vm2636_vm13 = vweird.f32 %v2630_v45 }
 0x579   :  { %v2594_v43 = vsub.f32 1.0, %v2593_v48  ;;  %vm2618_vm9 = vmor %vm2616_vm7, %vm2617_vm5  ;;  %v2640_v6 = vand.u32 2147483647, %v2630_v45  ;;  %v2643_v15 = vor.u32 1.1754944e-38, %v2642_v13 }
 0x57a   :  { %v2613_v50 = vsub.f32 1.0, %v2612_v49 }
 0x57b   :  { %v2595_v53 = vmul.f32 %v4232_v46, %v2594_v43  ;;  %vm2641_vm15 = vcmp.eq.f32.partialorder %v2640_v6, 8.507059e+37 }
 0x57c   :  { %v2614_v56 = vmul.f32 %v4234_v47, %v2613_v50 }
 0x57d   :  { %v4236_v58 = vpop.eup %4235  ;;  %v2596_v60 = vadd.f32 %v4232_v46, %v2595_v53 }
 0x57e   :  { %v2615_v62 = vadd.f32 %v4234_v47, %v2614_v56  ;;  %v2632_v0 = vmul.f32 %v4236_v58, %v2630_v45  ;;  %v4238_v5 = vpop.eup %4237  ;;  %vm2637_vm12 = vweird.f32 %v4236_v58 }
 0x57f   :  { %v2600_v3 = vsel %vm2599_vm8, %v4232_v46, %v2596_v60  ;;  %vm2638_vm14 = vmor %vm2636_vm13, %vm2637_vm12 }
 0x580   :  { %v2605_v25 = vsel %vm2602_vm10, %v2604_v61, %v2600_v3  ;;  %v2619_v7 = vsel %vm2618_vm9, %v4234_v47, %v2615_v62  ;;  %v2633_v8 = vsub.f32 1.0, %v2632_v0 }
 0x581   :  { %v2624_v9 = vsel %vm2621_vm11, %v2623_v1, %v2619_v7  ;;  %v2648_v29 = vmul.f32 %v4238_v5, %v2605_v25 }
 0x582   :  { %v2647_v2 = vmul.f32 %v2624_v9, %v4438_v4  ;;  %v2634_v11 = vmul.f32 %v4236_v58, %v2633_v8  ;;  %v4112_v4 = vld [vmem:[%s4451_s3] ss:$0 sm:$0xff] }
 0x584   :  { %v2649_v12 = vadd.f32 %v2648_v29, %v2647_v2  ;;  %v2635_v34 = vadd.f32 %v4236_v58, %v2634_v11 }
 0x586   :  { %4239 = vtanh.f32 %v2649_v12  ;;  %v2639_v14 = vsel %vm2638_vm14, %v4236_v58, %v2635_v34 }
 0x587   :  { %v2644_v10 = vsel %vm2641_vm15, %v2643_v15, %v2639_v14 }
 0x58c   :  { %v4240_v16 = vpop.eup %4239 }
 0x58d   :  { %v2651_v17 = vmul.f32 %v4240_v16, %v2644_v10 }
 0x58f   :  { %v2658_v18 = vpack.c.bf16 %v2651_v17, %v2651_v17 }
 0x591   :  { %2735 = vmatmul.bf16.vlgmr.msra.gmra.mxu0 %v2658_v18 }
 0x60e   :  { %v2736_v19 = vpop.f32.mrf.mxu0 }
 0x60f   :  { %v2737_v20 = vadd.f32 %v4112_v4, %v2736_v19 }
 0x611   :  { %2740 = vst [vmem:[#allocation10] sm:$0xff] %v2737_v20 }
 0x612   :  { %2751 = dma.vmem_to_hbm [thread:$0]  %s2747_s8, 128, %s2749_s11, [#allocation6]  }
 0x616   :  { %v2738_v21 = vpop.f32.mrf.mxu0 }
 0x617   :  { %4341 = dma.done.wait [#allocation6], 128  }
 0x618   :  { %4342 = vsyncadd [#allocation6], 4294967168 }
 0x619   :  { %2756 = vsyncpa [#allocation5], 1 }
 0x61a   :  { %2757 = vsyncpa [#allocation8], 1 }
 0x61b   :  { %2758 = vsyncpa [#allocation6], 1 }

</bundles_post_ra>
